<compile_context>
chip_gen: v7x
topology: tpu7x:2x2x1
jax: 0.10.0
libtpu: 0.0.40
codegen_flags: <defaults>
</compile_context>

<pallas_src>
import functools

import jax
import jax.numpy as jnp
from jax import lax
from jax.experimental import pallas as pl
from jax.experimental.pallas import tpu as pltpu


# ----------------------------------------------------------------------------
# Fused Pallas kernel
# ----------------------------------------------------------------------------
def _fused_vlstm_kernel(*refs, e_layers, d_model, batch, seq_len):
    """Whole vLSTM forward in one kernel.

    ref order (positional):
      inputs : x_tm[L*B,3], emb_w[3,D], emb_b[1,D],
               for each layer: w_ih_f[Din,4D], w_hh_f[D,4D], b_f[1,4D],
                               w_ih_b[Din,4D], w_hh_b[D,4D], b_b[1,4D],
               out_w[2D,C], out_b[1,C]
      output : o[L*B,C]
      scratch: emb[L*B,D], hf_seq[L*B,D], hb_seq[L*B,D],
               gxf[L*B,4D], gxb[L*B,4D], hf[B,D], cf[B,D], hb[B,D], cb[B,D]
    """
    D, B, L = d_model, batch, seq_len
    f32 = jnp.float32

    it = iter(refs)
    x_ref = next(it)
    emb_w = next(it)
    emb_b = next(it)
    lstm = [[next(it) for _ in range(6)] for _ in range(e_layers)]
    out_w = next(it)
    out_b = next(it)
    o_ref = next(it)
    emb_sc = next(it)
    hf_seq = next(it)
    hb_seq = next(it)
    gxf_sc = next(it)
    gxb_sc = next(it)
    hf = next(it)
    cf = next(it)
    hb = next(it)
    cb = next(it)

    # ---- embedding: enc = cat(x_dec, x_mark_dec) @ W_emb + b_emb -----------
    emb_sc[...] = (
        jnp.dot(x_ref[...], emb_w[...], preferred_element_type=f32) + emb_b[...]
    )

    def cell(gates, c_prev):
        # PyTorch gate order: i, f, g, o
        i = jax.nn.sigmoid(gates[:, 0 * D:1 * D])
        f = jax.nn.sigmoid(gates[:, 1 * D:2 * D])
        g = jnp.tanh(gates[:, 2 * D:3 * D])
        o = jax.nn.sigmoid(gates[:, 3 * D:4 * D])
        c = f * c_prev + i * g
        h = o * jnp.tanh(c)
        return h, c

    # ---- bidirectional multi-layer LSTM ------------------------------------
    for layer in range(e_layers):
        w_ih_f, w_hh_f, b_f, w_ih_b, w_hh_b, b_b = lstm[layer]

        # Hoisted input projection (off the recurrent critical path).
        if layer == 0:
            x_all = emb_sc[...]                                    # [L*B, D]
            gxf_sc[...] = (
                jnp.dot(x_all, w_ih_f[...], preferred_element_type=f32) + b_f[...]
            )
            gxb_sc[...] = (
                jnp.dot(x_all, w_ih_b[...], preferred_element_type=f32) + b_b[...]
            )
        else:
            # Layer input is concat(h_fwd, h_bwd); realize the concat by
            # splitting the weight rows instead of building a [L*B, 2D] array.
            hfp = hf_seq[...]                                      # [L*B, D]
            hbp = hb_seq[...]                                      # [L*B, D]
            gxf_sc[...] = (
                jnp.dot(hfp, w_ih_f[0:D, :], preferred_element_type=f32)
                + jnp.dot(hbp, w_ih_f[D:2 * D, :], preferred_element_type=f32)
                + b_f[...]
            )
            gxb_sc[...] = (
                jnp.dot(hfp, w_ih_b[0:D, :], preferred_element_type=f32)
                + jnp.dot(hbp, w_ih_b[D:2 * D, :], preferred_element_type=f32)
                + b_b[...]
            )

        hf[...] = jnp.zeros_like(hf)
        cf[...] = jnp.zeros_like(cf)
        hb[...] = jnp.zeros_like(hb)
        cb[...] = jnp.zeros_like(cb)

        # Static (unrolled) time loop: only h @ W_hh stays on the serial chain.
        for t in range(L):
            # forward direction, time step t
            rf = t * B
            gates_f = gxf_sc[rf:rf + B, :] + jnp.dot(
                hf[...], w_hh_f[...], preferred_element_type=f32)
            h_f, c_f = cell(gates_f, cf[...])
            hf[...] = h_f
            cf[...] = c_f
            hf_seq[rf:rf + B, :] = h_f

            # backward direction, time step L-1-t
            rb = (L - 1 - t) * B
            gates_b = gxb_sc[rb:rb + B, :] + jnp.dot(
                hb[...], w_hh_b[...], preferred_element_type=f32)
            h_b, c_b = cell(gates_b, cb[...])
            hb[...] = h_b
            cb[...] = c_b
            hb_seq[rb:rb + B, :] = h_b

    # ---- output projection: concat(h_fwd, h_bwd) @ W_out + b_out -----------
    o_ref[...] = (
        jnp.dot(hf_seq[...], out_w[0:D, :], preferred_element_type=f32)
        + jnp.dot(hb_seq[...], out_w[D:2 * D, :], preferred_element_type=f32)
        + out_b[...]
    ).astype(o_ref.dtype)


# ----------------------------------------------------------------------------
# Model: parameters + forward
# ----------------------------------------------------------------------------
class Configs:
    pred_len = 4
    output_attention = False
    d_model = 32
    e_layers = 2
    c_out = 1


def init_params(key, cfg):
    D, E, C = cfg.d_model, cfg.e_layers, cfg.c_out
    keys = iter(jax.random.split(key, 4 + 8 * E * 2))
    scale = 0.1

    params = {
        "emb_w": scale * jax.random.normal(next(keys), (3, D), jnp.float32),
        "emb_b": scale * jax.random.normal(next(keys), (1, D), jnp.float32),
        "out_w": scale * jax.random.normal(next(keys), (2 * D, C), jnp.float32),
        "out_b": scale * jax.random.normal(next(keys), (1, C), jnp.float32),
        "lstm": [],
    }
    for layer in range(E):
        din = D if layer == 0 else 2 * D
        dirs = []
        for _ in range(2):  # forward, backward
            w_ih = scale * jax.random.normal(next(keys), (din, 4 * D), jnp.float32)
            w_hh = scale * jax.random.normal(next(keys), (D, 4 * D), jnp.float32)
            b_ih = scale * jax.random.normal(next(keys), (1, 4 * D), jnp.float32)
            b_hh = scale * jax.random.normal(next(keys), (1, 4 * D), jnp.float32)
            dirs.append({"w_ih": w_ih, "w_hh": w_hh, "b": b_ih + b_hh})
        params["lstm"].append(dirs)
    return params


def model_forward(params, cfg, x_enc, x_mark_enc, x_dec, x_mark_dec):
    B, L, _ = x_dec.shape
    D = cfg.d_model
    E = cfg.e_layers
    C = cfg.c_out

    # enc_embedding input: cat([x_dec, x_mark_dec], -1), converted to
    # time-major [L, B, 3] -> flattened [L*B, 3] (row = t*B + b).
    x = jnp.concatenate([x_dec, x_mark_dec], axis=-1)          # [B, L, 3]
    x_tm = jnp.transpose(x, (1, 0, 2)).reshape(L * B, 3)

    inputs = [x_tm, params["emb_w"], params["emb_b"]]
    for layer_p in params["lstm"]:
        for d in range(2):  # forward, backward
            inputs += [layer_p[d]["w_ih"], layer_p[d]["w_hh"], layer_p[d]["b"]]
    inputs += [params["out_w"], params["out_b"]]

    kernel = functools.partial(
        _fused_vlstm_kernel, e_layers=E, d_model=D, batch=B, seq_len=L)

    out_tm = pl.pallas_call(
        kernel,
        out_shape=jax.ShapeDtypeStruct((L * B, C), jnp.float32),
        scratch_shapes=[
            pltpu.VMEM((L * B, D), jnp.float32),       # embedding output
            pltpu.VMEM((L * B, D), jnp.float32),       # h_fwd sequence
            pltpu.VMEM((L * B, D), jnp.float32),       # h_bwd sequence
            pltpu.VMEM((L * B, 4 * D), jnp.float32),   # hoisted gates_x fwd
            pltpu.VMEM((L * B, 4 * D), jnp.float32),   # hoisted gates_x bwd
            pltpu.VMEM((B, D), jnp.float32),           # h fwd
            pltpu.VMEM((B, D), jnp.float32),           # c fwd
            pltpu.VMEM((B, D), jnp.float32),           # h bwd
            pltpu.VMEM((B, D), jnp.float32),           # c bwd
        ],
    )(*inputs)

    dec_out = jnp.transpose(out_tm.reshape(L, B, C), (1, 0, 2))  # [B, L, C]
    pred = dec_out[:, -cfg.pred_len:, :]
    if cfg.output_attention:
        return (pred, 0, 0, 0)
    return (pred, 0, 0)


# ----------------------------------------------------------------------------
# Pure-JAX reference (for verification)
# ----------------------------------------------------------------------------
def _lstm_dir_ref(x_seq, w_ih, w_hh, b, reverse):
    L, B, _ = x_seq.shape
    H = w_hh.shape[0]
    xs = x_seq[::-1] if reverse else x_seq

    def step(carry, x):
        hp, cp = carry
        gates = x @ w_ih + hp @ w_hh + b
        i = jax.nn.sigmoid(gates[:, 0 * H:1 * H])
        f = jax.nn.sigmoid(gates[:, 1 * H:2 * H])
        g = jnp.tanh(gates[:, 2 * H:3 * H])
        o = jax.nn.sigmoid(gates[:, 3 * H:4 * H])
        c = f * cp + i * g
        hh = o * jnp.tanh(c)
        return (hh, c), hh

    init = (jnp.zeros((B, H), jnp.float32), jnp.zeros((B, H), jnp.float32))
    _, hs = lax.scan(step, init, xs)
    return hs[::-1] if reverse else hs


def model_forward_ref(params, cfg, x_enc, x_mark_enc, x_dec, x_mark_dec):
    B, L, _ = x_dec.shape
    D = cfg.d_model
    x = jnp.concatenate([x_dec, x_mark_dec], axis=-1)
    enc = (x.reshape(B * L, 3) @ params["emb_w"] + params["emb_b"]).reshape(B, L, D)
    h = jnp.transpose(enc, (1, 0, 2))
    for layer_p in params["lstm"]:
        h_fwd = _lstm_dir_ref(h, layer_p[0]["w_ih"], layer_p[0]["w_hh"],
                              layer_p[0]["b"], False)
        h_bwd = _lstm_dir_ref(h, layer_p[1]["w_ih"], layer_p[1]["w_hh"],
                              layer_p[1]["b"], True)
        h = jnp.concatenate([h_fwd, h_bwd], axis=-1)
    lstm_out = jnp.transpose(h, (1, 0, 2))
    dec_out = (lstm_out.reshape(B * L, 2 * D) @ params["out_w"]
               + params["out_b"]).reshape(B, L, cfg.c_out)
    return dec_out[:, -cfg.pred_len:, :]


# ----------------------------------------------------------------------------
if __name__ == "__main__":
    cfg = Configs()
    B, L = 2, 8

    key = jax.random.PRNGKey(0)
    k_params, k1, k2, k3, k4 = jax.random.split(key, 5)
    params = init_params(k_params, cfg)

    # x_enc / x_mark_enc are unused by the forward pass (kept for signature parity)
    x_enc = jax.random.normal(k1, (B, L, 1), jnp.float32)
    x_mark_enc = jax.random.normal(k2, (B, L, 2), jnp.float32)
    x_dec = jax.random.normal(k3, (B, L, 1), jnp.float32)
    x_mark_dec = jax.random.normal(k4, (B, L, 2), jnp.float32)

    forward = jax.jit(
        lambda p, a, b, c, d: model_forward(p, cfg, a, b, c, d))

    out = forward(params, x_enc, x_mark_enc, x_dec, x_mark_dec)
    pred = jax.block_until_ready(out[0])

    ref = jax.block_until_ready(
        model_forward_ref(params, cfg, x_enc, x_mark_enc, x_dec, x_mark_dec))

    assert pred.shape == (B, cfg.pred_len, cfg.c_out), pred.shape
    assert jnp.allclose(pred, ref, atol=1e-4, rtol=1e-4), (
        float(jnp.max(jnp.abs(pred - ref))))

    print("KERNEL_OK")
</pallas_src>

<mosaic_0001>
module attributes {stable_mosaic.version = 11 : i64} {
  func.func @_fused_vlstm_kernel(%arg0: memref<16x3xf32, #tpu.memory_space<vmem>>, %arg1: memref<3x32xf32, #tpu.memory_space<vmem>>, %arg2: memref<1x32xf32, #tpu.memory_space<vmem>>, %arg3: memref<32x128xf32, #tpu.memory_space<vmem>>, %arg4: memref<32x128xf32, #tpu.memory_space<vmem>>, %arg5: memref<1x128xf32, #tpu.memory_space<vmem>>, %arg6: memref<32x128xf32, #tpu.memory_space<vmem>>, %arg7: memref<32x128xf32, #tpu.memory_space<vmem>>, %arg8: memref<1x128xf32, #tpu.memory_space<vmem>>, %arg9: memref<64x128xf32, #tpu.memory_space<vmem>>, %arg10: memref<32x128xf32, #tpu.memory_space<vmem>>, %arg11: memref<1x128xf32, #tpu.memory_space<vmem>>, %arg12: memref<64x128xf32, #tpu.memory_space<vmem>>, %arg13: memref<32x128xf32, #tpu.memory_space<vmem>>, %arg14: memref<1x128xf32, #tpu.memory_space<vmem>>, %arg15: memref<64x1xf32, #tpu.memory_space<vmem>>, %arg16: memref<1x1xf32, #tpu.memory_space<vmem>>, %arg17: memref<16x1xf32, #tpu.memory_space<vmem>>, %arg18: memref<16x32xf32, #tpu.memory_space<vmem>>, %arg19: memref<16x32xf32, #tpu.memory_space<vmem>>, %arg20: memref<16x32xf32, #tpu.memory_space<vmem>>, %arg21: memref<16x128xf32, #tpu.memory_space<vmem>>, %arg22: memref<16x128xf32, #tpu.memory_space<vmem>>, %arg23: memref<2x32xf32, #tpu.memory_space<vmem>>, %arg24: memref<2x32xf32, #tpu.memory_space<vmem>>, %arg25: memref<2x32xf32, #tpu.memory_space<vmem>>, %arg26: memref<2x32xf32, #tpu.memory_space<vmem>>) attributes {dimension_semantics = [], scalar_prefetch = 0 : i64, scratch_operands = 9 : i64, tpu.core_type = #tpu.core_type<tc>} {
    %c0 = arith.constant 0 : index
    %c0_0 = arith.constant 0 : index
    %0 = vector.load %arg0[%c0, %c0_0] : memref<16x3xf32, #tpu.memory_space<vmem>>, vector<16x3xf32>
    %c0_1 = arith.constant 0 : index
    %c0_2 = arith.constant 0 : index
    %1 = vector.load %arg1[%c0_1, %c0_2] : memref<3x32xf32, #tpu.memory_space<vmem>>, vector<3x32xf32>
    %cst = arith.constant dense<0.000000e+00> : vector<16x32xf32>
    %2 = tpu.matmul %0, %1, %cst {dimension_numbers = #tpu.dot_dimension_numbers<[1], [0], [0], [1], [0, 0, 1, 1], [], []>} : vector<16x3xf32>, vector<3x32xf32>, vector<16x32xf32> -> vector<16x32xf32>
    %c0_3 = arith.constant 0 : index
    %c0_4 = arith.constant 0 : index
    %3 = vector.load %arg2[%c0_3, %c0_4] : memref<1x32xf32, #tpu.memory_space<vmem>>, vector<1x32xf32>
    %4 = vector.broadcast %3 : vector<1x32xf32> to vector<16x32xf32>
    %5 = arith.addf %2, %4 : vector<16x32xf32>
    %c0_5 = arith.constant 0 : index
    %c0_6 = arith.constant 0 : index
    %6 = vector.load %arg18[%c0_5, %c0_6] : memref<16x32xf32, #tpu.memory_space<vmem>>, vector<16x32xf32>
    tpu.vector_store %arg18[%c0_5, %c0_6], %5 {strides = array<i32>} : memref<16x32xf32, #tpu.memory_space<vmem>>, vector<16x32xf32>,
    %c0_7 = arith.constant 0 : index
    %c0_8 = arith.constant 0 : index
    %7 = vector.load %arg18[%c0_7, %c0_8] : memref<16x32xf32, #tpu.memory_space<vmem>>, vector<16x32xf32>
    %c0_9 = arith.constant 0 : index
    %c0_10 = arith.constant 0 : index
    %8 = vector.load %arg3[%c0_9, %c0_10] : memref<32x128xf32, #tpu.memory_space<vmem>>, vector<32x128xf32>
    %cst_11 = arith.constant dense<0.000000e+00> : vector<16x128xf32>
    %9 = tpu.matmul %7, %8, %cst_11 {dimension_numbers = #tpu.dot_dimension_numbers<[1], [0], [0], [1], [0, 0, 1, 1], [], []>} : vector<16x32xf32>, vector<32x128xf32>, vector<16x128xf32> -> vector<16x128xf32>
    %c0_12 = arith.constant 0 : index
    %c0_13 = arith.constant 0 : index
    %10 = vector.load %arg5[%c0_12, %c0_13] : memref<1x128xf32, #tpu.memory_space<vmem>>, vector<1x128xf32>
    %11 = vector.broadcast %10 : vector<1x128xf32> to vector<16x128xf32>
    %12 = arith.addf %9, %11 : vector<16x128xf32>
    %c0_14 = arith.constant 0 : index
    %c0_15 = arith.constant 0 : index
    %13 = vector.load %arg21[%c0_14, %c0_15] : memref<16x128xf32, #tpu.memory_space<vmem>>, vector<16x128xf32>
    tpu.vector_store %arg21[%c0_14, %c0_15], %12 {strides = array<i32>} : memref<16x128xf32, #tpu.memory_space<vmem>>, vector<16x128xf32>,
    %c0_16 = arith.constant 0 : index
    %c0_17 = arith.constant 0 : index
    %14 = vector.load %arg6[%c0_16, %c0_17] : memref<32x128xf32, #tpu.memory_space<vmem>>, vector<32x128xf32>
    %cst_18 = arith.constant dense<0.000000e+00> : vector<16x128xf32>
    %15 = tpu.matmul %7, %14, %cst_18 {dimension_numbers = #tpu.dot_dimension_numbers<[1], [0], [0], [1], [0, 0, 1, 1], [], []>} : vector<16x32xf32>, vector<32x128xf32>, vector<16x128xf32> -> vector<16x128xf32>
    %c0_19 = arith.constant 0 : index
    %c0_20 = arith.constant 0 : index
    %16 = vector.load %arg8[%c0_19, %c0_20] : memref<1x128xf32, #tpu.memory_space<vmem>>, vector<1x128xf32>
    %17 = vector.broadcast %16 : vector<1x128xf32> to vector<16x128xf32>
    %18 = arith.addf %15, %17 : vector<16x128xf32>
    %c0_21 = arith.constant 0 : index
    %c0_22 = arith.constant 0 : index
    %19 = vector.load %arg22[%c0_21, %c0_22] : memref<16x128xf32, #tpu.memory_space<vmem>>, vector<16x128xf32>
    tpu.vector_store %arg22[%c0_21, %c0_22], %18 {strides = array<i32>} : memref<16x128xf32, #tpu.memory_space<vmem>>, vector<16x128xf32>,
    %cst_23 = arith.constant 0.000000e+00 : f32
    %20 = vector.broadcast %cst_23 : f32 to vector<2x32xf32>
    %c0_24 = arith.constant 0 : index
    %c0_25 = arith.constant 0 : index
    %21 = vector.load %arg23[%c0_24, %c0_25] : memref<2x32xf32, #tpu.memory_space<vmem>>, vector<2x32xf32>
    tpu.vector_store %arg23[%c0_24, %c0_25], %20 {strides = array<i32>} : memref<2x32xf32, #tpu.memory_space<vmem>>, vector<2x32xf32>,
    %cst_26 = arith.constant 0.000000e+00 : f32
    %22 = vector.broadcast %cst_26 : f32 to vector<2x32xf32>
    %c0_27 = arith.constant 0 : index
    %c0_28 = arith.constant 0 : index
    %23 = vector.load %arg24[%c0_27, %c0_28] : memref<2x32xf32, #tpu.memory_space<vmem>>, vector<2x32xf32>
    tpu.vector_store %arg24[%c0_27, %c0_28], %22 {strides = array<i32>} : memref<2x32xf32, #tpu.memory_space<vmem>>, vector<2x32xf32>,
    %cst_29 = arith.constant 0.000000e+00 : f32
    %24 = vector.broadcast %cst_29 : f32 to vector<2x32xf32>
    %c0_30 = arith.constant 0 : index
    %c0_31 = arith.constant 0 : index
    %25 = vector.load %arg25[%c0_30, %c0_31] : memref<2x32xf32, #tpu.memory_space<vmem>>, vector<2x32xf32>
    tpu.vector_store %arg25[%c0_30, %c0_31], %24 {strides = array<i32>} : memref<2x32xf32, #tpu.memory_space<vmem>>, vector<2x32xf32>,
    %cst_32 = arith.constant 0.000000e+00 : f32
    %26 = vector.broadcast %cst_32 : f32 to vector<2x32xf32>
    %c0_33 = arith.constant 0 : index
    %c0_34 = arith.constant 0 : index
    %27 = vector.load %arg26[%c0_33, %c0_34] : memref<2x32xf32, #tpu.memory_space<vmem>>, vector<2x32xf32>
    tpu.vector_store %arg26[%c0_33, %c0_34], %26 {strides = array<i32>} : memref<2x32xf32, #tpu.memory_space<vmem>>, vector<2x32xf32>,
    %c0_35 = arith.constant 0 : index
    %c0_36 = arith.constant 0 : index
    %28 = vector.load %arg21[%c0_35, %c0_36] : memref<16x128xf32, #tpu.memory_space<vmem>>, vector<2x128xf32>
    %c0_37 = arith.constant 0 : index
    %c0_38 = arith.constant 0 : index
    %29 = vector.load %arg23[%c0_37, %c0_38] : memref<2x32xf32, #tpu.memory_space<vmem>>, vector<2x32xf32>
    %c0_39 = arith.constant 0 : index
    %c0_40 = arith.constant 0 : index
    %30 = vector.load %arg4[%c0_39, %c0_40] : memref<32x128xf32, #tpu.memory_space<vmem>>, vector<32x128xf32>
    %cst_41 = arith.constant dense<0.000000e+00> : vector<2x128xf32>
    %31 = tpu.matmul %29, %30, %cst_41 {dimension_numbers = #tpu.dot_dimension_numbers<[1], [0], [0], [1], [0, 0, 1, 1], [], []>} : vector<2x32xf32>, vector<32x128xf32>, vector<2x128xf32> -> vector<2x128xf32>
    %32 = arith.addf %28, %31 : vector<2x128xf32>
    %c0_42 = arith.constant 0 : index
    %c0_43 = arith.constant 0 : index
    %33 = vector.load %arg24[%c0_42, %c0_43] : memref<2x32xf32, #tpu.memory_space<vmem>>, vector<2x32xf32>
    %34 = vector.extract_strided_slice %32 {offsets = [0, 0], sizes = [2, 32], strides = [1, 1]} : vector<2x128xf32> to vector<2x32xf32>
    %35 = arith.negf %34 : vector<2x32xf32>
    %36 = math.exp %35 : vector<2x32xf32>
    %cst_44 = arith.constant 1.000000e+00 : f32
    %37 = vector.broadcast %cst_44 : f32 to vector<2x32xf32>
    %38 = arith.addf %37, %36 : vector<2x32xf32>
    %39 = arith.divf %37, %38 : vector<2x32xf32>
    %40 = vector.extract_strided_slice %32 {offsets = [0, 32], sizes = [2, 32], strides = [1, 1]} : vector<2x128xf32> to vector<2x32xf32>
    %41 = arith.negf %40 : vector<2x32xf32>
    %42 = math.exp %41 : vector<2x32xf32>
    %cst_45 = arith.constant 1.000000e+00 : f32
    %43 = vector.broadcast %cst_45 : f32 to vector<2x32xf32>
    %44 = arith.addf %43, %42 : vector<2x32xf32>
    %45 = arith.divf %43, %44 : vector<2x32xf32>
    %46 = vector.extract_strided_slice %32 {offsets = [0, 64], sizes = [2, 32], strides = [1, 1]} : vector<2x128xf32> to vector<2x32xf32>
    %47 = math.tanh %46 : vector<2x32xf32>
    %48 = vector.extract_strided_slice %32 {offsets = [0, 96], sizes = [2, 32], strides = [1, 1]} : vector<2x128xf32> to vector<2x32xf32>
    %49 = arith.negf %48 : vector<2x32xf32>
    %50 = math.exp %49 : vector<2x32xf32>
    %cst_46 = arith.constant 1.000000e+00 : f32
    %51 = vector.broadcast %cst_46 : f32 to vector<2x32xf32>
    %52 = arith.addf %51, %50 : vector<2x32xf32>
    %53 = arith.divf %51, %52 : vector<2x32xf32>
    %54 = arith.mulf %45, %33 : vector<2x32xf32>
    %55 = arith.mulf %39, %47 : vector<2x32xf32>
    %56 = arith.addf %54, %55 : vector<2x32xf32>
    %57 = math.tanh %56 : vector<2x32xf32>
    %58 = arith.mulf %53, %57 : vector<2x32xf32>
    %c0_47 = arith.constant 0 : index
    %c0_48 = arith.constant 0 : index
    %59 = vector.load %arg23[%c0_47, %c0_48] : memref<2x32xf32, #tpu.memory_space<vmem>>, vector<2x32xf32>
    tpu.vector_store %arg23[%c0_47, %c0_48], %58 {strides = array<i32>} : memref<2x32xf32, #tpu.memory_space<vmem>>, vector<2x32xf32>,
    %c0_49 = arith.constant 0 : index
    %c0_50 = arith.constant 0 : index
    %60 = vector.load %arg24[%c0_49, %c0_50] : memref<2x32xf32, #tpu.memory_space<vmem>>, vector<2x32xf32>
    tpu.vector_store %arg24[%c0_49, %c0_50], %56 {strides = array<i32>} : memref<2x32xf32, #tpu.memory_space<vmem>>, vector<2x32xf32>,
    %c0_51 = arith.constant 0 : index
    %c0_52 = arith.constant 0 : index
    %61 = vector.load %arg19[%c0_51, %c0_52] : memref<16x32xf32, #tpu.memory_space<vmem>>, vector<2x32xf32>
    tpu.vector_store %arg19[%c0_51, %c0_52], %58 {strides = array<i32>} : memref<16x32xf32, #tpu.memory_space<vmem>>, vector<2x32xf32>,
    %c14 = arith.constant 14 : index
    %c0_53 = arith.constant 0 : index
    %62 = vector.load %arg22[%c14, %c0_53] : memref<16x128xf32, #tpu.memory_space<vmem>>, vector<2x128xf32>
    %c0_54 = arith.constant 0 : index
    %c0_55 = arith.constant 0 : index
    %63 = vector.load %arg25[%c0_54, %c0_55] : memref<2x32xf32, #tpu.memory_space<vmem>>, vector<2x32xf32>
    %c0_56 = arith.constant 0 : index
    %c0_57 = arith.constant 0 : index
    %64 = vector.load %arg7[%c0_56, %c0_57] : memref<32x128xf32, #tpu.memory_space<vmem>>, vector<32x128xf32>
    %cst_58 = arith.constant dense<0.000000e+00> : vector<2x128xf32>
    %65 = tpu.matmul %63, %64, %cst_58 {dimension_numbers = #tpu.dot_dimension_numbers<[1], [0], [0], [1], [0, 0, 1, 1], [], []>} : vector<2x32xf32>, vector<32x128xf32>, vector<2x128xf32> -> vector<2x128xf32>
    %66 = arith.addf %62, %65 : vector<2x128xf32>
    %c0_59 = arith.constant 0 : index
    %c0_60 = arith.constant 0 : index
    %67 = vector.load %arg26[%c0_59, %c0_60] : memref<2x32xf32, #tpu.memory_space<vmem>>, vector<2x32xf32>
    %68 = vector.extract_strided_slice %66 {offsets = [0, 0], sizes = [2, 32], strides = [1, 1]} : vector<2x128xf32> to vector<2x32xf32>
    %69 = arith.negf %68 : vector<2x32xf32>
    %70 = math.exp %69 : vector<2x32xf32>
    %cst_61 = arith.constant 1.000000e+00 : f32
    %71 = vector.broadcast %cst_61 : f32 to vector<2x32xf32>
    %72 = arith.addf %71, %70 : vector<2x32xf32>
    %73 = arith.divf %71, %72 : vector<2x32xf32>
    %74 = vector.extract_strided_slice %66 {offsets = [0, 32], sizes = [2, 32], strides = [1, 1]} : vector<2x128xf32> to vector<2x32xf32>
    %75 = arith.negf %74 : vector<2x32xf32>
    %76 = math.exp %75 : vector<2x32xf32>
    %cst_62 = arith.constant 1.000000e+00 : f32
    %77 = vector.broadcast %cst_62 : f32 to vector<2x32xf32>
    %78 = arith.addf %77, %76 : vector<2x32xf32>
    %79 = arith.divf %77, %78 : vector<2x32xf32>
    %80 = vector.extract_strided_slice %66 {offsets = [0, 64], sizes = [2, 32], strides = [1, 1]} : vector<2x128xf32> to vector<2x32xf32>
    %81 = math.tanh %80 : vector<2x32xf32>
    %82 = vector.extract_strided_slice %66 {offsets = [0, 96], sizes = [2, 32], strides = [1, 1]} : vector<2x128xf32> to vector<2x32xf32>
    %83 = arith.negf %82 : vector<2x32xf32>
    %84 = math.exp %83 : vector<2x32xf32>
    %cst_63 = arith.constant 1.000000e+00 : f32
    %85 = vector.broadcast %cst_63 : f32 to vector<2x32xf32>
    %86 = arith.addf %85, %84 : vector<2x32xf32>
    %87 = arith.divf %85, %86 : vector<2x32xf32>
    %88 = arith.mulf %79, %67 : vector<2x32xf32>
    %89 = arith.mulf %73, %81 : vector<2x32xf32>
    %90 = arith.addf %88, %89 : vector<2x32xf32>
    %91 = math.tanh %90 : vector<2x32xf32>
    %92 = arith.mulf %87, %91 : vector<2x32xf32>
    %c0_64 = arith.constant 0 : index
    %c0_65 = arith.constant 0 : index
    %93 = vector.load %arg25[%c0_64, %c0_65] : memref<2x32xf32, #tpu.memory_space<vmem>>, vector<2x32xf32>
    tpu.vector_store %arg25[%c0_64, %c0_65], %92 {strides = array<i32>} : memref<2x32xf32, #tpu.memory_space<vmem>>, vector<2x32xf32>,
    %c0_66 = arith.constant 0 : index
    %c0_67 = arith.constant 0 : index
    %94 = vector.load %arg26[%c0_66, %c0_67] : memref<2x32xf32, #tpu.memory_space<vmem>>, vector<2x32xf32>
    tpu.vector_store %arg26[%c0_66, %c0_67], %90 {strides = array<i32>} : memref<2x32xf32, #tpu.memory_space<vmem>>, vector<2x32xf32>,
    %c14_68 = arith.constant 14 : index
    %c0_69 = arith.constant 0 : index
    %95 = vector.load %arg20[%c14_68, %c0_69] : memref<16x32xf32, #tpu.memory_space<vmem>>, vector<2x32xf32>
    tpu.vector_store %arg20[%c14_68, %c0_69], %92 {strides = array<i32>} : memref<16x32xf32, #tpu.memory_space<vmem>>, vector<2x32xf32>,
    %c2 = arith.constant 2 : index
    %c0_70 = arith.constant 0 : index
    %96 = vector.load %arg21[%c2, %c0_70] : memref<16x128xf32, #tpu.memory_space<vmem>>, vector<2x128xf32>
    %c0_71 = arith.constant 0 : index
    %c0_72 = arith.constant 0 : index
    %97 = vector.load %arg23[%c0_71, %c0_72] : memref<2x32xf32, #tpu.memory_space<vmem>>, vector<2x32xf32>
    %c0_73 = arith.constant 0 : index
    %c0_74 = arith.constant 0 : index
    %98 = vector.load %arg4[%c0_73, %c0_74] : memref<32x128xf32, #tpu.memory_space<vmem>>, vector<32x128xf32>
    %cst_75 = arith.constant dense<0.000000e+00> : vector<2x128xf32>
    %99 = tpu.matmul %97, %98, %cst_75 {dimension_numbers = #tpu.dot_dimension_numbers<[1], [0], [0], [1], [0, 0, 1, 1], [], []>} : vector<2x32xf32>, vector<32x128xf32>, vector<2x128xf32> -> vector<2x128xf32>
    %100 = arith.addf %96, %99 : vector<2x128xf32>
    %c0_76 = arith.constant 0 : index
    %c0_77 = arith.constant 0 : index
    %101 = vector.load %arg24[%c0_76, %c0_77] : memref<2x32xf32, #tpu.memory_space<vmem>>, vector<2x32xf32>
    %102 = vector.extract_strided_slice %100 {offsets = [0, 0], sizes = [2, 32], strides = [1, 1]} : vector<2x128xf32> to vector<2x32xf32>
    %103 = arith.negf %102 : vector<2x32xf32>
    %104 = math.exp %103 : vector<2x32xf32>
    %cst_78 = arith.constant 1.000000e+00 : f32
    %105 = vector.broadcast %cst_78 : f32 to vector<2x32xf32>
    %106 = arith.addf %105, %104 : vector<2x32xf32>
    %107 = arith.divf %105, %106 : vector<2x32xf32>
    %108 = vector.extract_strided_slice %100 {offsets = [0, 32], sizes = [2, 32], strides = [1, 1]} : vector<2x128xf32> to vector<2x32xf32>
    %109 = arith.negf %108 : vector<2x32xf32>
    %110 = math.exp %109 : vector<2x32xf32>
    %cst_79 = arith.constant 1.000000e+00 : f32
    %111 = vector.broadcast %cst_79 : f32 to vector<2x32xf32>
    %112 = arith.addf %111, %110 : vector<2x32xf32>
    %113 = arith.divf %111, %112 : vector<2x32xf32>
    %114 = vector.extract_strided_slice %100 {offsets = [0, 64], sizes = [2, 32], strides = [1, 1]} : vector<2x128xf32> to vector<2x32xf32>
    %115 = math.tanh %114 : vector<2x32xf32>
    %116 = vector.extract_strided_slice %100 {offsets = [0, 96], sizes = [2, 32], strides = [1, 1]} : vector<2x128xf32> to vector<2x32xf32>
    %117 = arith.negf %116 : vector<2x32xf32>
    %118 = math.exp %117 : vector<2x32xf32>
    %cst_80 = arith.constant 1.000000e+00 : f32
    %119 = vector.broadcast %cst_80 : f32 to vector<2x32xf32>
    %120 = arith.addf %119, %118 : vector<2x32xf32>
    %121 = arith.divf %119, %120 : vector<2x32xf32>
    %122 = arith.mulf %113, %101 : vector<2x32xf32>
    %123 = arith.mulf %107, %115 : vector<2x32xf32>
    %124 = arith.addf %122, %123 : vector<2x32xf32>
    %125 = math.tanh %124 : vector<2x32xf32>
    %126 = arith.mulf %121, %125 : vector<2x32xf32>
    %c0_81 = arith.constant 0 : index
    %c0_82 = arith.constant 0 : index
    %127 = vector.load %arg23[%c0_81, %c0_82] : memref<2x32xf32, #tpu.memory_space<vmem>>, vector<2x32xf32>
    tpu.vector_store %arg23[%c0_81, %c0_82], %126 {strides = array<i32>} : memref<2x32xf32, #tpu.memory_space<vmem>>, vector<2x32xf32>,
    %c0_83 = arith.constant 0 : index
    %c0_84 = arith.constant 0 : index
    %128 = vector.load %arg24[%c0_83, %c0_84] : memref<2x32xf32, #tpu.memory_space<vmem>>, vector<2x32xf32>
    tpu.vector_store %arg24[%c0_83, %c0_84], %124 {strides = array<i32>} : memref<2x32xf32, #tpu.memory_space<vmem>>, vector<2x32xf32>,
    %c2_85 = arith.constant 2 : index
    %c0_86 = arith.constant 0 : index
    %129 = vector.load %arg19[%c2_85, %c0_86] : memref<16x32xf32, #tpu.memory_space<vmem>>, vector<2x32xf32>
    tpu.vector_store %arg19[%c2_85, %c0_86], %126 {strides = array<i32>} : memref<16x32xf32, #tpu.memory_space<vmem>>, vector<2x32xf32>,
    %c12 = arith.constant 12 : index
    %c0_87 = arith.constant 0 : index
    %130 = vector.load %arg22[%c12, %c0_87] : memref<16x128xf32, #tpu.memory_space<vmem>>, vector<2x128xf32>
    %c0_88 = arith.constant 0 : index
    %c0_89 = arith.constant 0 : index
    %131 = vector.load %arg25[%c0_88, %c0_89] : memref<2x32xf32, #tpu.memory_space<vmem>>, vector<2x32xf32>
    %c0_90 = arith.constant 0 : index
    %c0_91 = arith.constant 0 : index
    %132 = vector.load %arg7[%c0_90, %c0_91] : memref<32x128xf32, #tpu.memory_space<vmem>>, vector<32x128xf32>
    %cst_92 = arith.constant dense<0.000000e+00> : vector<2x128xf32>
    %133 = tpu.matmul %131, %132, %cst_92 {dimension_numbers = #tpu.dot_dimension_numbers<[1], [0], [0], [1], [0, 0, 1, 1], [], []>} : vector<2x32xf32>, vector<32x128xf32>, vector<2x128xf32> -> vector<2x128xf32>
    %134 = arith.addf %130, %133 : vector<2x128xf32>
    %c0_93 = arith.constant 0 : index
    %c0_94 = arith.constant 0 : index
    %135 = vector.load %arg26[%c0_93, %c0_94] : memref<2x32xf32, #tpu.memory_space<vmem>>, vector<2x32xf32>
    %136 = vector.extract_strided_slice %134 {offsets = [0, 0], sizes = [2, 32], strides = [1, 1]} : vector<2x128xf32> to vector<2x32xf32>
    %137 = arith.negf %136 : vector<2x32xf32>
    %138 = math.exp %137 : vector<2x32xf32>
    %cst_95 = arith.constant 1.000000e+00 : f32
    %139 = vector.broadcast %cst_95 : f32 to vector<2x32xf32>
    %140 = arith.addf %139, %138 : vector<2x32xf32>
    %141 = arith.divf %139, %140 : vector<2x32xf32>
    %142 = vector.extract_strided_slice %134 {offsets = [0, 32], sizes = [2, 32], strides = [1, 1]} : vector<2x128xf32> to vector<2x32xf32>
    %143 = arith.negf %142 : vector<2x32xf32>
    %144 = math.exp %143 : vector<2x32xf32>
    %cst_96 = arith.constant 1.000000e+00 : f32
    %145 = vector.broadcast %cst_96 : f32 to vector<2x32xf32>
    %146 = arith.addf %145, %144 : vector<2x32xf32>
    %147 = arith.divf %145, %146 : vector<2x32xf32>
    %148 = vector.extract_strided_slice %134 {offsets = [0, 64], sizes = [2, 32], strides = [1, 1]} : vector<2x128xf32> to vector<2x32xf32>
    %149 = math.tanh %148 : vector<2x32xf32>
    %150 = vector.extract_strided_slice %134 {offsets = [0, 96], sizes = [2, 32], strides = [1, 1]} : vector<2x128xf32> to vector<2x32xf32>
    %151 = arith.negf %150 : vector<2x32xf32>
    %152 = math.exp %151 : vector<2x32xf32>
    %cst_97 = arith.constant 1.000000e+00 : f32
    %153 = vector.broadcast %cst_97 : f32 to vector<2x32xf32>
    %154 = arith.addf %153, %152 : vector<2x32xf32>
    %155 = arith.divf %153, %154 : vector<2x32xf32>
    %156 = arith.mulf %147, %135 : vector<2x32xf32>
    %157 = arith.mulf %141, %149 : vector<2x32xf32>
    %158 = arith.addf %156, %157 : vector<2x32xf32>
    %159 = math.tanh %158 : vector<2x32xf32>
    %160 = arith.mulf %155, %159 : vector<2x32xf32>
    %c0_98 = arith.constant 0 : index
    %c0_99 = arith.constant 0 : index
    %161 = vector.load %arg25[%c0_98, %c0_99] : memref<2x32xf32, #tpu.memory_space<vmem>>, vector<2x32xf32>
    tpu.vector_store %arg25[%c0_98, %c0_99], %160 {strides = array<i32>} : memref<2x32xf32, #tpu.memory_space<vmem>>, vector<2x32xf32>,
    %c0_100 = arith.constant 0 : index
    %c0_101 = arith.constant 0 : index
    %162 = vector.load %arg26[%c0_100, %c0_101] : memref<2x32xf32, #tpu.memory_space<vmem>>, vector<2x32xf32>
    tpu.vector_store %arg26[%c0_100, %c0_101], %158 {strides = array<i32>} : memref<2x32xf32, #tpu.memory_space<vmem>>, vector<2x32xf32>,
    %c12_102 = arith.constant 12 : index
    %c0_103 = arith.constant 0 : index
    %163 = vector.load %arg20[%c12_102, %c0_103] : memref<16x32xf32, #tpu.memory_space<vmem>>, vector<2x32xf32>
    tpu.vector_store %arg20[%c12_102, %c0_103], %160 {strides = array<i32>} : memref<16x32xf32, #tpu.memory_space<vmem>>, vector<2x32xf32>,
    %c4 = arith.constant 4 : index
    %c0_104 = arith.constant 0 : index
    %164 = vector.load %arg21[%c4, %c0_104] : memref<16x128xf32, #tpu.memory_space<vmem>>, vector<2x128xf32>
    %c0_105 = arith.constant 0 : index
    %c0_106 = arith.constant 0 : index
    %165 = vector.load %arg23[%c0_105, %c0_106] : memref<2x32xf32, #tpu.memory_space<vmem>>, vector<2x32xf32>
    %c0_107 = arith.constant 0 : index
    %c0_108 = arith.constant 0 : index
    %166 = vector.load %arg4[%c0_107, %c0_108] : memref<32x128xf32, #tpu.memory_space<vmem>>, vector<32x128xf32>
    %cst_109 = arith.constant dense<0.000000e+00> : vector<2x128xf32>
    %167 = tpu.matmul %165, %166, %cst_109 {dimension_numbers = #tpu.dot_dimension_numbers<[1], [0], [0], [1], [0, 0, 1, 1], [], []>} : vector<2x32xf32>, vector<32x128xf32>, vector<2x128xf32> -> vector<2x128xf32>
    %168 = arith.addf %164, %167 : vector<2x128xf32>
    %c0_110 = arith.constant 0 : index
    %c0_111 = arith.constant 0 : index
    %169 = vector.load %arg24[%c0_110, %c0_111] : memref<2x32xf32, #tpu.memory_space<vmem>>, vector<2x32xf32>
    %170 = vector.extract_strided_slice %168 {offsets = [0, 0], sizes = [2, 32], strides = [1, 1]} : vector<2x128xf32> to vector<2x32xf32>
    %171 = arith.negf %170 : vector<2x32xf32>
    %172 = math.exp %171 : vector<2x32xf32>
    %cst_112 = arith.constant 1.000000e+00 : f32
    %173 = vector.broadcast %cst_112 : f32 to vector<2x32xf32>
    %174 = arith.addf %173, %172 : vector<2x32xf32>
    %175 = arith.divf %173, %174 : vector<2x32xf32>
    %176 = vector.extract_strided_slice %168 {offsets = [0, 32], sizes = [2, 32], strides = [1, 1]} : vector<2x128xf32> to vector<2x32xf32>
    %177 = arith.negf %176 : vector<2x32xf32>
    %178 = math.exp %177 : vector<2x32xf32>
    %cst_113 = arith.constant 1.000000e+00 : f32
    %179 = vector.broadcast %cst_113 : f32 to vector<2x32xf32>
    %180 = arith.addf %179, %178 : vector<2x32xf32>
    %181 = arith.divf %179, %180 : vector<2x32xf32>
    %182 = vector.extract_strided_slice %168 {offsets = [0, 64], sizes = [2, 32], strides = [1, 1]} : vector<2x128xf32> to vector<2x32xf32>
    %183 = math.tanh %182 : vector<2x32xf32>
    %184 = vector.extract_strided_slice %168 {offsets = [0, 96], sizes = [2, 32], strides = [1, 1]} : vector<2x128xf32> to vector<2x32xf32>
    %185 = arith.negf %184 : vector<2x32xf32>
    %186 = math.exp %185 : vector<2x32xf32>
    %cst_114 = arith.constant 1.000000e+00 : f32
    %187 = vector.broadcast %cst_114 : f32 to vector<2x32xf32>
    %188 = arith.addf %187, %186 : vector<2x32xf32>
    %189 = arith.divf %187, %188 : vector<2x32xf32>
    %190 = arith.mulf %181, %169 : vector<2x32xf32>
    %191 = arith.mulf %175, %183 : vector<2x32xf32>
    %192 = arith.addf %190, %191 : vector<2x32xf32>
    %193 = math.tanh %192 : vector<2x32xf32>
    %194 = arith.mulf %189, %193 : vector<2x32xf32>
    %c0_115 = arith.constant 0 : index
    %c0_116 = arith.constant 0 : index
    %195 = vector.load %arg23[%c0_115, %c0_116] : memref<2x32xf32, #tpu.memory_space<vmem>>, vector<2x32xf32>
    tpu.vector_store %arg23[%c0_115, %c0_116], %194 {strides = array<i32>} : memref<2x32xf32, #tpu.memory_space<vmem>>, vector<2x32xf32>,
    %c0_117 = arith.constant 0 : index
    %c0_118 = arith.constant 0 : index
    %196 = vector.load %arg24[%c0_117, %c0_118] : memref<2x32xf32, #tpu.memory_space<vmem>>, vector<2x32xf32>
    tpu.vector_store %arg24[%c0_117, %c0_118], %192 {strides = array<i32>} : memref<2x32xf32, #tpu.memory_space<vmem>>, vector<2x32xf32>,
    %c4_119 = arith.constant 4 : index
    %c0_120 = arith.constant 0 : index
    %197 = vector.load %arg19[%c4_119, %c0_120] : memref<16x32xf32, #tpu.memory_space<vmem>>, vector<2x32xf32>
    tpu.vector_store %arg19[%c4_119, %c0_120], %194 {strides = array<i32>} : memref<16x32xf32, #tpu.memory_space<vmem>>, vector<2x32xf32>,
    %c10 = arith.constant 10 : index
    %c0_121 = arith.constant 0 : index
    %198 = vector.load %arg22[%c10, %c0_121] : memref<16x128xf32, #tpu.memory_space<vmem>>, vector<2x128xf32>
    %c0_122 = arith.constant 0 : index
    %c0_123 = arith.constant 0 : index
    %199 = vector.load %arg25[%c0_122, %c0_123] : memref<2x32xf32, #tpu.memory_space<vmem>>, vector<2x32xf32>
    %c0_124 = arith.constant 0 : index
    %c0_125 = arith.constant 0 : index
    %200 = vector.load %arg7[%c0_124, %c0_125] : memref<32x128xf32, #tpu.memory_space<vmem>>, vector<32x128xf32>
    %cst_126 = arith.constant dense<0.000000e+00> : vector<2x128xf32>
    %201 = tpu.matmul %199, %200, %cst_126 {dimension_numbers = #tpu.dot_dimension_numbers<[1], [0], [0], [1], [0, 0, 1, 1], [], []>} : vector<2x32xf32>, vector<32x128xf32>, vector<2x128xf32> -> vector<2x128xf32>
    %202 = arith.addf %198, %201 : vector<2x128xf32>
    %c0_127 = arith.constant 0 : index
    %c0_128 = arith.constant 0 : index
    %203 = vector.load %arg26[%c0_127, %c0_128] : memref<2x32xf32, #tpu.memory_space<vmem>>, vector<2x32xf32>
    %204 = vector.extract_strided_slice %202 {offsets = [0, 0], sizes = [2, 32], strides = [1, 1]} : vector<2x128xf32> to vector<2x32xf32>
    %205 = arith.negf %204 : vector<2x32xf32>
    %206 = math.exp %205 : vector<2x32xf32>
    %cst_129 = arith.constant 1.000000e+00 : f32
    %207 = vector.broadcast %cst_129 : f32 to vector<2x32xf32>
    %208 = arith.addf %207, %206 : vector<2x32xf32>
    %209 = arith.divf %207, %208 : vector<2x32xf32>
    %210 = vector.extract_strided_slice %202 {offsets = [0, 32], sizes = [2, 32], strides = [1, 1]} : vector<2x128xf32> to vector<2x32xf32>
    %211 = arith.negf %210 : vector<2x32xf32>
    %212 = math.exp %211 : vector<2x32xf32>
    %cst_130 = arith.constant 1.000000e+00 : f32
    %213 = vector.broadcast %cst_130 : f32 to vector<2x32xf32>
    %214 = arith.addf %213, %212 : vector<2x32xf32>
    %215 = arith.divf %213, %214 : vector<2x32xf32>
    %216 = vector.extract_strided_slice %202 {offsets = [0, 64], sizes = [2, 32], strides = [1, 1]} : vector<2x128xf32> to vector<2x32xf32>
    %217 = math.tanh %216 : vector<2x32xf32>
    %218 = vector.extract_strided_slice %202 {offsets = [0, 96], sizes = [2, 32], strides = [1, 1]} : vector<2x128xf32> to vector<2x32xf32>
    %219 = arith.negf %218 : vector<2x32xf32>
    %220 = math.exp %219 : vector<2x32xf32>
    %cst_131 = arith.constant 1.000000e+00 : f32
    %221 = vector.broadcast %cst_131 : f32 to vector<2x32xf32>
    %222 = arith.addf %221, %220 : vector<2x32xf32>
    %223 = arith.divf %221, %222 : vector<2x32xf32>
    %224 = arith.mulf %215, %203 : vector<2x32xf32>
    %225 = arith.mulf %209, %217 : vector<2x32xf32>
    %226 = arith.addf %224, %225 : vector<2x32xf32>
    %227 = math.tanh %226 : vector<2x32xf32>
    %228 = arith.mulf %223, %227 : vector<2x32xf32>
    %c0_132 = arith.constant 0 : index
    %c0_133 = arith.constant 0 : index
    %229 = vector.load %arg25[%c0_132, %c0_133] : memref<2x32xf32, #tpu.memory_space<vmem>>, vector<2x32xf32>
    tpu.vector_store %arg25[%c0_132, %c0_133], %228 {strides = array<i32>} : memref<2x32xf32, #tpu.memory_space<vmem>>, vector<2x32xf32>,
    %c0_134 = arith.constant 0 : index
    %c0_135 = arith.constant 0 : index
    %230 = vector.load %arg26[%c0_134, %c0_135] : memref<2x32xf32, #tpu.memory_space<vmem>>, vector<2x32xf32>
    tpu.vector_store %arg26[%c0_134, %c0_135], %226 {strides = array<i32>} : memref<2x32xf32, #tpu.memory_space<vmem>>, vector<2x32xf32>,
    %c10_136 = arith.constant 10 : index
    %c0_137 = arith.constant 0 : index
    %231 = vector.load %arg20[%c10_136, %c0_137] : memref<16x32xf32, #tpu.memory_space<vmem>>, vector<2x32xf32>
    tpu.vector_store %arg20[%c10_136, %c0_137], %228 {strides = array<i32>} : memref<16x32xf32, #tpu.memory_space<vmem>>, vector<2x32xf32>,
    %c6 = arith.constant 6 : index
    %c0_138 = arith.constant 0 : index
    %232 = vector.load %arg21[%c6, %c0_138] : memref<16x128xf32, #tpu.memory_space<vmem>>, vector<2x128xf32>
    %c0_139 = arith.constant 0 : index
    %c0_140 = arith.constant 0 : index
    %233 = vector.load %arg23[%c0_139, %c0_140] : memref<2x32xf32, #tpu.memory_space<vmem>>, vector<2x32xf32>
    %c0_141 = arith.constant 0 : index
    %c0_142 = arith.constant 0 : index
    %234 = vector.load %arg4[%c0_141, %c0_142] : memref<32x128xf32, #tpu.memory_space<vmem>>, vector<32x128xf32>
    %cst_143 = arith.constant dense<0.000000e+00> : vector<2x128xf32>
    %235 = tpu.matmul %233, %234, %cst_143 {dimension_numbers = #tpu.dot_dimension_numbers<[1], [0], [0], [1], [0, 0, 1, 1], [], []>} : vector<2x32xf32>, vector<32x128xf32>, vector<2x128xf32> -> vector<2x128xf32>
    %236 = arith.addf %232, %235 : vector<2x128xf32>
    %c0_144 = arith.constant 0 : index
    %c0_145 = arith.constant 0 : index
    %237 = vector.load %arg24[%c0_144, %c0_145] : memref<2x32xf32, #tpu.memory_space<vmem>>, vector<2x32xf32>
    %238 = vector.extract_strided_slice %236 {offsets = [0, 0], sizes = [2, 32], strides = [1, 1]} : vector<2x128xf32> to vector<2x32xf32>
    %239 = arith.negf %238 : vector<2x32xf32>
    %240 = math.exp %239 : vector<2x32xf32>
    %cst_146 = arith.constant 1.000000e+00 : f32
    %241 = vector.broadcast %cst_146 : f32 to vector<2x32xf32>
    %242 = arith.addf %241, %240 : vector<2x32xf32>
    %243 = arith.divf %241, %242 : vector<2x32xf32>
    %244 = vector.extract_strided_slice %236 {offsets = [0, 32], sizes = [2, 32], strides = [1, 1]} : vector<2x128xf32> to vector<2x32xf32>
    %245 = arith.negf %244 : vector<2x32xf32>
    %246 = math.exp %245 : vector<2x32xf32>
    %cst_147 = arith.constant 1.000000e+00 : f32
    %247 = vector.broadcast %cst_147 : f32 to vector<2x32xf32>
    %248 = arith.addf %247, %246 : vector<2x32xf32>
    %249 = arith.divf %247, %248 : vector<2x32xf32>
    %250 = vector.extract_strided_slice %236 {offsets = [0, 64], sizes = [2, 32], strides = [1, 1]} : vector<2x128xf32> to vector<2x32xf32>
    %251 = math.tanh %250 : vector<2x32xf32>
    %252 = vector.extract_strided_slice %236 {offsets = [0, 96], sizes = [2, 32], strides = [1, 1]} : vector<2x128xf32> to vector<2x32xf32>
    %253 = arith.negf %252 : vector<2x32xf32>
    %254 = math.exp %253 : vector<2x32xf32>
    %cst_148 = arith.constant 1.000000e+00 : f32
    %255 = vector.broadcast %cst_148 : f32 to vector<2x32xf32>
    %256 = arith.addf %255, %254 : vector<2x32xf32>
    %257 = arith.divf %255, %256 : vector<2x32xf32>
    %258 = arith.mulf %249, %237 : vector<2x32xf32>
    %259 = arith.mulf %243, %251 : vector<2x32xf32>
    %260 = arith.addf %258, %259 : vector<2x32xf32>
    %261 = math.tanh %260 : vector<2x32xf32>
    %262 = arith.mulf %257, %261 : vector<2x32xf32>
    %c0_149 = arith.constant 0 : index
    %c0_150 = arith.constant 0 : index
    %263 = vector.load %arg23[%c0_149, %c0_150] : memref<2x32xf32, #tpu.memory_space<vmem>>, vector<2x32xf32>
    tpu.vector_store %arg23[%c0_149, %c0_150], %262 {strides = array<i32>} : memref<2x32xf32, #tpu.memory_space<vmem>>, vector<2x32xf32>,
    %c0_151 = arith.constant 0 : index
    %c0_152 = arith.constant 0 : index
    %264 = vector.load %arg24[%c0_151, %c0_152] : memref<2x32xf32, #tpu.memory_space<vmem>>, vector<2x32xf32>
    tpu.vector_store %arg24[%c0_151, %c0_152], %260 {strides = array<i32>} : memref<2x32xf32, #tpu.memory_space<vmem>>, vector<2x32xf32>,
    %c6_153 = arith.constant 6 : index
    %c0_154 = arith.constant 0 : index
    %265 = vector.load %arg19[%c6_153, %c0_154] : memref<16x32xf32, #tpu.memory_space<vmem>>, vector<2x32xf32>
    tpu.vector_store %arg19[%c6_153, %c0_154], %262 {strides = array<i32>} : memref<16x32xf32, #tpu.memory_space<vmem>>, vector<2x32xf32>,
    %c8 = arith.constant 8 : index
    %c0_155 = arith.constant 0 : index
    %266 = vector.load %arg22[%c8, %c0_155] : memref<16x128xf32, #tpu.memory_space<vmem>>, vector<2x128xf32>
    %c0_156 = arith.constant 0 : index
    %c0_157 = arith.constant 0 : index
    %267 = vector.load %arg25[%c0_156, %c0_157] : memref<2x32xf32, #tpu.memory_space<vmem>>, vector<2x32xf32>
    %c0_158 = arith.constant 0 : index
    %c0_159 = arith.constant 0 : index
    %268 = vector.load %arg7[%c0_158, %c0_159] : memref<32x128xf32, #tpu.memory_space<vmem>>, vector<32x128xf32>
    %cst_160 = arith.constant dense<0.000000e+00> : vector<2x128xf32>
    %269 = tpu.matmul %267, %268, %cst_160 {dimension_numbers = #tpu.dot_dimension_numbers<[1], [0], [0], [1], [0, 0, 1, 1], [], []>} : vector<2x32xf32>, vector<32x128xf32>, vector<2x128xf32> -> vector<2x128xf32>
    %270 = arith.addf %266, %269 : vector<2x128xf32>
    %c0_161 = arith.constant 0 : index
    %c0_162 = arith.constant 0 : index
    %271 = vector.load %arg26[%c0_161, %c0_162] : memref<2x32xf32, #tpu.memory_space<vmem>>, vector<2x32xf32>
    %272 = vector.extract_strided_slice %270 {offsets = [0, 0], sizes = [2, 32], strides = [1, 1]} : vector<2x128xf32> to vector<2x32xf32>
    %273 = arith.negf %272 : vector<2x32xf32>
    %274 = math.exp %273 : vector<2x32xf32>
    %cst_163 = arith.constant 1.000000e+00 : f32
    %275 = vector.broadcast %cst_163 : f32 to vector<2x32xf32>
    %276 = arith.addf %275, %274 : vector<2x32xf32>
    %277 = arith.divf %275, %276 : vector<2x32xf32>
    %278 = vector.extract_strided_slice %270 {offsets = [0, 32], sizes = [2, 32], strides = [1, 1]} : vector<2x128xf32> to vector<2x32xf32>
    %279 = arith.negf %278 : vector<2x32xf32>
    %280 = math.exp %279 : vector<2x32xf32>
    %cst_164 = arith.constant 1.000000e+00 : f32
    %281 = vector.broadcast %cst_164 : f32 to vector<2x32xf32>
    %282 = arith.addf %281, %280 : vector<2x32xf32>
    %283 = arith.divf %281, %282 : vector<2x32xf32>
    %284 = vector.extract_strided_slice %270 {offsets = [0, 64], sizes = [2, 32], strides = [1, 1]} : vector<2x128xf32> to vector<2x32xf32>
    %285 = math.tanh %284 : vector<2x32xf32>
    %286 = vector.extract_strided_slice %270 {offsets = [0, 96], sizes = [2, 32], strides = [1, 1]} : vector<2x128xf32> to vector<2x32xf32>
    %287 = arith.negf %286 : vector<2x32xf32>
    %288 = math.exp %287 : vector<2x32xf32>
    %cst_165 = arith.constant 1.000000e+00 : f32
    %289 = vector.broadcast %cst_165 : f32 to vector<2x32xf32>
    %290 = arith.addf %289, %288 : vector<2x32xf32>
    %291 = arith.divf %289, %290 : vector<2x32xf32>
    %292 = arith.mulf %283, %271 : vector<2x32xf32>
    %293 = arith.mulf %277, %285 : vector<2x32xf32>
    %294 = arith.addf %292, %293 : vector<2x32xf32>
    %295 = math.tanh %294 : vector<2x32xf32>
    %296 = arith.mulf %291, %295 : vector<2x32xf32>
    %c0_166 = arith.constant 0 : index
    %c0_167 = arith.constant 0 : index
    %297 = vector.load %arg25[%c0_166, %c0_167] : memref<2x32xf32, #tpu.memory_space<vmem>>, vector<2x32xf32>
    tpu.vector_store %arg25[%c0_166, %c0_167], %296 {strides = array<i32>} : memref<2x32xf32, #tpu.memory_space<vmem>>, vector<2x32xf32>,
    %c0_168 = arith.constant 0 : index
    %c0_169 = arith.constant 0 : index
    %298 = vector.load %arg26[%c0_168, %c0_169] : memref<2x32xf32, #tpu.memory_space<vmem>>, vector<2x32xf32>
    tpu.vector_store %arg26[%c0_168, %c0_169], %294 {strides = array<i32>} : memref<2x32xf32, #tpu.memory_space<vmem>>, vector<2x32xf32>,
    %c8_170 = arith.constant 8 : index
    %c0_171 = arith.constant 0 : index
    %299 = vector.load %arg20[%c8_170, %c0_171] : memref<16x32xf32, #tpu.memory_space<vmem>>, vector<2x32xf32>
    tpu.vector_store %arg20[%c8_170, %c0_171], %296 {strides = array<i32>} : memref<16x32xf32, #tpu.memory_space<vmem>>, vector<2x32xf32>,
    %c8_172 = arith.constant 8 : index
    %c0_173 = arith.constant 0 : index
    %300 = vector.load %arg21[%c8_172, %c0_173] : memref<16x128xf32, #tpu.memory_space<vmem>>, vector<2x128xf32>
    %c0_174 = arith.constant 0 : index
    %c0_175 = arith.constant 0 : index
    %301 = vector.load %arg23[%c0_174, %c0_175] : memref<2x32xf32, #tpu.memory_space<vmem>>, vector<2x32xf32>
    %c0_176 = arith.constant 0 : index
    %c0_177 = arith.constant 0 : index
    %302 = vector.load %arg4[%c0_176, %c0_177] : memref<32x128xf32, #tpu.memory_space<vmem>>, vector<32x128xf32>
    %cst_178 = arith.constant dense<0.000000e+00> : vector<2x128xf32>
    %303 = tpu.matmul %301, %302, %cst_178 {dimension_numbers = #tpu.dot_dimension_numbers<[1], [0], [0], [1], [0, 0, 1, 1], [], []>} : vector<2x32xf32>, vector<32x128xf32>, vector<2x128xf32> -> vector<2x128xf32>
    %304 = arith.addf %300, %303 : vector<2x128xf32>
    %c0_179 = arith.constant 0 : index
    %c0_180 = arith.constant 0 : index
    %305 = vector.load %arg24[%c0_179, %c0_180] : memref<2x32xf32, #tpu.memory_space<vmem>>, vector<2x32xf32>
    %306 = vector.extract_strided_slice %304 {offsets = [0, 0], sizes = [2, 32], strides = [1, 1]} : vector<2x128xf32> to vector<2x32xf32>
    %307 = arith.negf %306 : vector<2x32xf32>
    %308 = math.exp %307 : vector<2x32xf32>
    %cst_181 = arith.constant 1.000000e+00 : f32
    %309 = vector.broadcast %cst_181 : f32 to vector<2x32xf32>
    %310 = arith.addf %309, %308 : vector<2x32xf32>
    %311 = arith.divf %309, %310 : vector<2x32xf32>
    %312 = vector.extract_strided_slice %304 {offsets = [0, 32], sizes = [2, 32], strides = [1, 1]} : vector<2x128xf32> to vector<2x32xf32>
    %313 = arith.negf %312 : vector<2x32xf32>
    %314 = math.exp %313 : vector<2x32xf32>
    %cst_182 = arith.constant 1.000000e+00 : f32
    %315 = vector.broadcast %cst_182 : f32 to vector<2x32xf32>
    %316 = arith.addf %315, %314 : vector<2x32xf32>
    %317 = arith.divf %315, %316 : vector<2x32xf32>
    %318 = vector.extract_strided_slice %304 {offsets = [0, 64], sizes = [2, 32], strides = [1, 1]} : vector<2x128xf32> to vector<2x32xf32>
    %319 = math.tanh %318 : vector<2x32xf32>
    %320 = vector.extract_strided_slice %304 {offsets = [0, 96], sizes = [2, 32], strides = [1, 1]} : vector<2x128xf32> to vector<2x32xf32>
    %321 = arith.negf %320 : vector<2x32xf32>
    %322 = math.exp %321 : vector<2x32xf32>
    %cst_183 = arith.constant 1.000000e+00 : f32
    %323 = vector.broadcast %cst_183 : f32 to vector<2x32xf32>
    %324 = arith.addf %323, %322 : vector<2x32xf32>
    %325 = arith.divf %323, %324 : vector<2x32xf32>
    %326 = arith.mulf %317, %305 : vector<2x32xf32>
    %327 = arith.mulf %311, %319 : vector<2x32xf32>
    %328 = arith.addf %326, %327 : vector<2x32xf32>
    %329 = math.tanh %328 : vector<2x32xf32>
    %330 = arith.mulf %325, %329 : vector<2x32xf32>
    %c0_184 = arith.constant 0 : index
    %c0_185 = arith.constant 0 : index
    %331 = vector.load %arg23[%c0_184, %c0_185] : memref<2x32xf32, #tpu.memory_space<vmem>>, vector<2x32xf32>
    tpu.vector_store %arg23[%c0_184, %c0_185], %330 {strides = array<i32>} : memref<2x32xf32, #tpu.memory_space<vmem>>, vector<2x32xf32>,
    %c0_186 = arith.constant 0 : index
    %c0_187 = arith.constant 0 : index
    %332 = vector.load %arg24[%c0_186, %c0_187] : memref<2x32xf32, #tpu.memory_space<vmem>>, vector<2x32xf32>
    tpu.vector_store %arg24[%c0_186, %c0_187], %328 {strides = array<i32>} : memref<2x32xf32, #tpu.memory_space<vmem>>, vector<2x32xf32>,
    %c8_188 = arith.constant 8 : index
    %c0_189 = arith.constant 0 : index
    %333 = vector.load %arg19[%c8_188, %c0_189] : memref<16x32xf32, #tpu.memory_space<vmem>>, vector<2x32xf32>
    tpu.vector_store %arg19[%c8_188, %c0_189], %330 {strides = array<i32>} : memref<16x32xf32, #tpu.memory_space<vmem>>, vector<2x32xf32>,
    %c6_190 = arith.constant 6 : index
    %c0_191 = arith.constant 0 : index
    %334 = vector.load %arg22[%c6_190, %c0_191] : memref<16x128xf32, #tpu.memory_space<vmem>>, vector<2x128xf32>
    %c0_192 = arith.constant 0 : index
    %c0_193 = arith.constant 0 : index
    %335 = vector.load %arg25[%c0_192, %c0_193] : memref<2x32xf32, #tpu.memory_space<vmem>>, vector<2x32xf32>
    %c0_194 = arith.constant 0 : index
    %c0_195 = arith.constant 0 : index
    %336 = vector.load %arg7[%c0_194, %c0_195] : memref<32x128xf32, #tpu.memory_space<vmem>>, vector<32x128xf32>
    %cst_196 = arith.constant dense<0.000000e+00> : vector<2x128xf32>
    %337 = tpu.matmul %335, %336, %cst_196 {dimension_numbers = #tpu.dot_dimension_numbers<[1], [0], [0], [1], [0, 0, 1, 1], [], []>} : vector<2x32xf32>, vector<32x128xf32>, vector<2x128xf32> -> vector<2x128xf32>
    %338 = arith.addf %334, %337 : vector<2x128xf32>
    %c0_197 = arith.constant 0 : index
    %c0_198 = arith.constant 0 : index
    %339 = vector.load %arg26[%c0_197, %c0_198] : memref<2x32xf32, #tpu.memory_space<vmem>>, vector<2x32xf32>
    %340 = vector.extract_strided_slice %338 {offsets = [0, 0], sizes = [2, 32], strides = [1, 1]} : vector<2x128xf32> to vector<2x32xf32>
    %341 = arith.negf %340 : vector<2x32xf32>
    %342 = math.exp %341 : vector<2x32xf32>
    %cst_199 = arith.constant 1.000000e+00 : f32
    %343 = vector.broadcast %cst_199 : f32 to vector<2x32xf32>
    %344 = arith.addf %343, %342 : vector<2x32xf32>
    %345 = arith.divf %343, %344 : vector<2x32xf32>
    %346 = vector.extract_strided_slice %338 {offsets = [0, 32], sizes = [2, 32], strides = [1, 1]} : vector<2x128xf32> to vector<2x32xf32>
    %347 = arith.negf %346 : vector<2x32xf32>
    %348 = math.exp %347 : vector<2x32xf32>
    %cst_200 = arith.constant 1.000000e+00 : f32
    %349 = vector.broadcast %cst_200 : f32 to vector<2x32xf32>
    %350 = arith.addf %349, %348 : vector<2x32xf32>
    %351 = arith.divf %349, %350 : vector<2x32xf32>
    %352 = vector.extract_strided_slice %338 {offsets = [0, 64], sizes = [2, 32], strides = [1, 1]} : vector<2x128xf32> to vector<2x32xf32>
    %353 = math.tanh %352 : vector<2x32xf32>
    %354 = vector.extract_strided_slice %338 {offsets = [0, 96], sizes = [2, 32], strides = [1, 1]} : vector<2x128xf32> to vector<2x32xf32>
    %355 = arith.negf %354 : vector<2x32xf32>
    %356 = math.exp %355 : vector<2x32xf32>
    %cst_201 = arith.constant 1.000000e+00 : f32
    %357 = vector.broadcast %cst_201 : f32 to vector<2x32xf32>
    %358 = arith.addf %357, %356 : vector<2x32xf32>
    %359 = arith.divf %357, %358 : vector<2x32xf32>
    %360 = arith.mulf %351, %339 : vector<2x32xf32>
    %361 = arith.mulf %345, %353 : vector<2x32xf32>
    %362 = arith.addf %360, %361 : vector<2x32xf32>
    %363 = math.tanh %362 : vector<2x32xf32>
    %364 = arith.mulf %359, %363 : vector<2x32xf32>
    %c0_202 = arith.constant 0 : index
    %c0_203 = arith.constant 0 : index
    %365 = vector.load %arg25[%c0_202, %c0_203] : memref<2x32xf32, #tpu.memory_space<vmem>>, vector<2x32xf32>
    tpu.vector_store %arg25[%c0_202, %c0_203], %364 {strides = array<i32>} : memref<2x32xf32, #tpu.memory_space<vmem>>, vector<2x32xf32>,
    %c0_204 = arith.constant 0 : index
    %c0_205 = arith.constant 0 : index
    %366 = vector.load %arg26[%c0_204, %c0_205] : memref<2x32xf32, #tpu.memory_space<vmem>>, vector<2x32xf32>
    tpu.vector_store %arg26[%c0_204, %c0_205], %362 {strides = array<i32>} : memref<2x32xf32, #tpu.memory_space<vmem>>, vector<2x32xf32>,
    %c6_206 = arith.constant 6 : index
    %c0_207 = arith.constant 0 : index
    %367 = vector.load %arg20[%c6_206, %c0_207] : memref<16x32xf32, #tpu.memory_space<vmem>>, vector<2x32xf32>
    tpu.vector_store %arg20[%c6_206, %c0_207], %364 {strides = array<i32>} : memref<16x32xf32, #tpu.memory_space<vmem>>, vector<2x32xf32>,
    %c10_208 = arith.constant 10 : index
    %c0_209 = arith.constant 0 : index
    %368 = vector.load %arg21[%c10_208, %c0_209] : memref<16x128xf32, #tpu.memory_space<vmem>>, vector<2x128xf32>
    %c0_210 = arith.constant 0 : index
    %c0_211 = arith.constant 0 : index
    %369 = vector.load %arg23[%c0_210, %c0_211] : memref<2x32xf32, #tpu.memory_space<vmem>>, vector<2x32xf32>
    %c0_212 = arith.constant 0 : index
    %c0_213 = arith.constant 0 : index
    %370 = vector.load %arg4[%c0_212, %c0_213] : memref<32x128xf32, #tpu.memory_space<vmem>>, vector<32x128xf32>
    %cst_214 = arith.constant dense<0.000000e+00> : vector<2x128xf32>
    %371 = tpu.matmul %369, %370, %cst_214 {dimension_numbers = #tpu.dot_dimension_numbers<[1], [0], [0], [1], [0, 0, 1, 1], [], []>} : vector<2x32xf32>, vector<32x128xf32>, vector<2x128xf32> -> vector<2x128xf32>
    %372 = arith.addf %368, %371 : vector<2x128xf32>
    %c0_215 = arith.constant 0 : index
    %c0_216 = arith.constant 0 : index
    %373 = vector.load %arg24[%c0_215, %c0_216] : memref<2x32xf32, #tpu.memory_space<vmem>>, vector<2x32xf32>
    %374 = vector.extract_strided_slice %372 {offsets = [0, 0], sizes = [2, 32], strides = [1, 1]} : vector<2x128xf32> to vector<2x32xf32>
    %375 = arith.negf %374 : vector<2x32xf32>
    %376 = math.exp %375 : vector<2x32xf32>
    %cst_217 = arith.constant 1.000000e+00 : f32
    %377 = vector.broadcast %cst_217 : f32 to vector<2x32xf32>
    %378 = arith.addf %377, %376 : vector<2x32xf32>
    %379 = arith.divf %377, %378 : vector<2x32xf32>
    %380 = vector.extract_strided_slice %372 {offsets = [0, 32], sizes = [2, 32], strides = [1, 1]} : vector<2x128xf32> to vector<2x32xf32>
    %381 = arith.negf %380 : vector<2x32xf32>
    %382 = math.exp %381 : vector<2x32xf32>
    %cst_218 = arith.constant 1.000000e+00 : f32
    %383 = vector.broadcast %cst_218 : f32 to vector<2x32xf32>
    %384 = arith.addf %383, %382 : vector<2x32xf32>
    %385 = arith.divf %383, %384 : vector<2x32xf32>
    %386 = vector.extract_strided_slice %372 {offsets = [0, 64], sizes = [2, 32], strides = [1, 1]} : vector<2x128xf32> to vector<2x32xf32>
    %387 = math.tanh %386 : vector<2x32xf32>
    %388 = vector.extract_strided_slice %372 {offsets = [0, 96], sizes = [2, 32], strides = [1, 1]} : vector<2x128xf32> to vector<2x32xf32>
    %389 = arith.negf %388 : vector<2x32xf32>
    %390 = math.exp %389 : vector<2x32xf32>
    %cst_219 = arith.constant 1.000000e+00 : f32
    %391 = vector.broadcast %cst_219 : f32 to vector<2x32xf32>
    %392 = arith.addf %391, %390 : vector<2x32xf32>
    %393 = arith.divf %391, %392 : vector<2x32xf32>
    %394 = arith.mulf %385, %373 : vector<2x32xf32>
    %395 = arith.mulf %379, %387 : vector<2x32xf32>
    %396 = arith.addf %394, %395 : vector<2x32xf32>
    %397 = math.tanh %396 : vector<2x32xf32>
    %398 = arith.mulf %393, %397 : vector<2x32xf32>
    %c0_220 = arith.constant 0 : index
    %c0_221 = arith.constant 0 : index
    %399 = vector.load %arg23[%c0_220, %c0_221] : memref<2x32xf32, #tpu.memory_space<vmem>>, vector<2x32xf32>
    tpu.vector_store %arg23[%c0_220, %c0_221], %398 {strides = array<i32>} : memref<2x32xf32, #tpu.memory_space<vmem>>, vector<2x32xf32>,
    %c0_222 = arith.constant 0 : index
    %c0_223 = arith.constant 0 : index
    %400 = vector.load %arg24[%c0_222, %c0_223] : memref<2x32xf32, #tpu.memory_space<vmem>>, vector<2x32xf32>
    tpu.vector_store %arg24[%c0_222, %c0_223], %396 {strides = array<i32>} : memref<2x32xf32, #tpu.memory_space<vmem>>, vector<2x32xf32>,
    %c10_224 = arith.constant 10 : index
    %c0_225 = arith.constant 0 : index
    %401 = vector.load %arg19[%c10_224, %c0_225] : memref<16x32xf32, #tpu.memory_space<vmem>>, vector<2x32xf32>
    tpu.vector_store %arg19[%c10_224, %c0_225], %398 {strides = array<i32>} : memref<16x32xf32, #tpu.memory_space<vmem>>, vector<2x32xf32>,
    %c4_226 = arith.constant 4 : index
    %c0_227 = arith.constant 0 : index
    %402 = vector.load %arg22[%c4_226, %c0_227] : memref<16x128xf32, #tpu.memory_space<vmem>>, vector<2x128xf32>
    %c0_228 = arith.constant 0 : index
    %c0_229 = arith.constant 0 : index
    %403 = vector.load %arg25[%c0_228, %c0_229] : memref<2x32xf32, #tpu.memory_space<vmem>>, vector<2x32xf32>
    %c0_230 = arith.constant 0 : index
    %c0_231 = arith.constant 0 : index
    %404 = vector.load %arg7[%c0_230, %c0_231] : memref<32x128xf32, #tpu.memory_space<vmem>>, vector<32x128xf32>
    %cst_232 = arith.constant dense<0.000000e+00> : vector<2x128xf32>
    %405 = tpu.matmul %403, %404, %cst_232 {dimension_numbers = #tpu.dot_dimension_numbers<[1], [0], [0], [1], [0, 0, 1, 1], [], []>} : vector<2x32xf32>, vector<32x128xf32>, vector<2x128xf32> -> vector<2x128xf32>
    %406 = arith.addf %402, %405 : vector<2x128xf32>
    %c0_233 = arith.constant 0 : index
    %c0_234 = arith.constant 0 : index
    %407 = vector.load %arg26[%c0_233, %c0_234] : memref<2x32xf32, #tpu.memory_space<vmem>>, vector<2x32xf32>
    %408 = vector.extract_strided_slice %406 {offsets = [0, 0], sizes = [2, 32], strides = [1, 1]} : vector<2x128xf32> to vector<2x32xf32>
    %409 = arith.negf %408 : vector<2x32xf32>
    %410 = math.exp %409 : vector<2x32xf32>
    %cst_235 = arith.constant 1.000000e+00 : f32
    %411 = vector.broadcast %cst_235 : f32 to vector<2x32xf32>
    %412 = arith.addf %411, %410 : vector<2x32xf32>
    %413 = arith.divf %411, %412 : vector<2x32xf32>
    %414 = vector.extract_strided_slice %406 {offsets = [0, 32], sizes = [2, 32], strides = [1, 1]} : vector<2x128xf32> to vector<2x32xf32>
    %415 = arith.negf %414 : vector<2x32xf32>
    %416 = math.exp %415 : vector<2x32xf32>
    %cst_236 = arith.constant 1.000000e+00 : f32
    %417 = vector.broadcast %cst_236 : f32 to vector<2x32xf32>
    %418 = arith.addf %417, %416 : vector<2x32xf32>
    %419 = arith.divf %417, %418 : vector<2x32xf32>
    %420 = vector.extract_strided_slice %406 {offsets = [0, 64], sizes = [2, 32], strides = [1, 1]} : vector<2x128xf32> to vector<2x32xf32>
    %421 = math.tanh %420 : vector<2x32xf32>
    %422 = vector.extract_strided_slice %406 {offsets = [0, 96], sizes = [2, 32], strides = [1, 1]} : vector<2x128xf32> to vector<2x32xf32>
    %423 = arith.negf %422 : vector<2x32xf32>
    %424 = math.exp %423 : vector<2x32xf32>
    %cst_237 = arith.constant 1.000000e+00 : f32
    %425 = vector.broadcast %cst_237 : f32 to vector<2x32xf32>
    %426 = arith.addf %425, %424 : vector<2x32xf32>
    %427 = arith.divf %425, %426 : vector<2x32xf32>
    %428 = arith.mulf %419, %407 : vector<2x32xf32>
    %429 = arith.mulf %413, %421 : vector<2x32xf32>
    %430 = arith.addf %428, %429 : vector<2x32xf32>
    %431 = math.tanh %430 : vector<2x32xf32>
    %432 = arith.mulf %427, %431 : vector<2x32xf32>
    %c0_238 = arith.constant 0 : index
    %c0_239 = arith.constant 0 : index
    %433 = vector.load %arg25[%c0_238, %c0_239] : memref<2x32xf32, #tpu.memory_space<vmem>>, vector<2x32xf32>
    tpu.vector_store %arg25[%c0_238, %c0_239], %432 {strides = array<i32>} : memref<2x32xf32, #tpu.memory_space<vmem>>, vector<2x32xf32>,
    %c0_240 = arith.constant 0 : index
    %c0_241 = arith.constant 0 : index
    %434 = vector.load %arg26[%c0_240, %c0_241] : memref<2x32xf32, #tpu.memory_space<vmem>>, vector<2x32xf32>
    tpu.vector_store %arg26[%c0_240, %c0_241], %430 {strides = array<i32>} : memref<2x32xf32, #tpu.memory_space<vmem>>, vector<2x32xf32>,
    %c4_242 = arith.constant 4 : index
    %c0_243 = arith.constant 0 : index
    %435 = vector.load %arg20[%c4_242, %c0_243] : memref<16x32xf32, #tpu.memory_space<vmem>>, vector<2x32xf32>
    tpu.vector_store %arg20[%c4_242, %c0_243], %432 {strides = array<i32>} : memref<16x32xf32, #tpu.memory_space<vmem>>, vector<2x32xf32>,
    %c12_244 = arith.constant 12 : index
    %c0_245 = arith.constant 0 : index
    %436 = vector.load %arg21[%c12_244, %c0_245] : memref<16x128xf32, #tpu.memory_space<vmem>>, vector<2x128xf32>
    %c0_246 = arith.constant 0 : index
    %c0_247 = arith.constant 0 : index
    %437 = vector.load %arg23[%c0_246, %c0_247] : memref<2x32xf32, #tpu.memory_space<vmem>>, vector<2x32xf32>
    %c0_248 = arith.constant 0 : index
    %c0_249 = arith.constant 0 : index
    %438 = vector.load %arg4[%c0_248, %c0_249] : memref<32x128xf32, #tpu.memory_space<vmem>>, vector<32x128xf32>
    %cst_250 = arith.constant dense<0.000000e+00> : vector<2x128xf32>
    %439 = tpu.matmul %437, %438, %cst_250 {dimension_numbers = #tpu.dot_dimension_numbers<[1], [0], [0], [1], [0, 0, 1, 1], [], []>} : vector<2x32xf32>, vector<32x128xf32>, vector<2x128xf32> -> vector<2x128xf32>
    %440 = arith.addf %436, %439 : vector<2x128xf32>
    %c0_251 = arith.constant 0 : index
    %c0_252 = arith.constant 0 : index
    %441 = vector.load %arg24[%c0_251, %c0_252] : memref<2x32xf32, #tpu.memory_space<vmem>>, vector<2x32xf32>
    %442 = vector.extract_strided_slice %440 {offsets = [0, 0], sizes = [2, 32], strides = [1, 1]} : vector<2x128xf32> to vector<2x32xf32>
    %443 = arith.negf %442 : vector<2x32xf32>
    %444 = math.exp %443 : vector<2x32xf32>
    %cst_253 = arith.constant 1.000000e+00 : f32
    %445 = vector.broadcast %cst_253 : f32 to vector<2x32xf32>
    %446 = arith.addf %445, %444 : vector<2x32xf32>
    %447 = arith.divf %445, %446 : vector<2x32xf32>
    %448 = vector.extract_strided_slice %440 {offsets = [0, 32], sizes = [2, 32], strides = [1, 1]} : vector<2x128xf32> to vector<2x32xf32>
    %449 = arith.negf %448 : vector<2x32xf32>
    %450 = math.exp %449 : vector<2x32xf32>
    %cst_254 = arith.constant 1.000000e+00 : f32
    %451 = vector.broadcast %cst_254 : f32 to vector<2x32xf32>
    %452 = arith.addf %451, %450 : vector<2x32xf32>
    %453 = arith.divf %451, %452 : vector<2x32xf32>
    %454 = vector.extract_strided_slice %440 {offsets = [0, 64], sizes = [2, 32], strides = [1, 1]} : vector<2x128xf32> to vector<2x32xf32>
    %455 = math.tanh %454 : vector<2x32xf32>
    %456 = vector.extract_strided_slice %440 {offsets = [0, 96], sizes = [2, 32], strides = [1, 1]} : vector<2x128xf32> to vector<2x32xf32>
    %457 = arith.negf %456 : vector<2x32xf32>
    %458 = math.exp %457 : vector<2x32xf32>
    %cst_255 = arith.constant 1.000000e+00 : f32
    %459 = vector.broadcast %cst_255 : f32 to vector<2x32xf32>
    %460 = arith.addf %459, %458 : vector<2x32xf32>
    %461 = arith.divf %459, %460 : vector<2x32xf32>
    %462 = arith.mulf %453, %441 : vector<2x32xf32>
    %463 = arith.mulf %447, %455 : vector<2x32xf32>
    %464 = arith.addf %462, %463 : vector<2x32xf32>
    %465 = math.tanh %464 : vector<2x32xf32>
    %466 = arith.mulf %461, %465 : vector<2x32xf32>
    %c0_256 = arith.constant 0 : index
    %c0_257 = arith.constant 0 : index
    %467 = vector.load %arg23[%c0_256, %c0_257] : memref<2x32xf32, #tpu.memory_space<vmem>>, vector<2x32xf32>
    tpu.vector_store %arg23[%c0_256, %c0_257], %466 {strides = array<i32>} : memref<2x32xf32, #tpu.memory_space<vmem>>, vector<2x32xf32>,
    %c0_258 = arith.constant 0 : index
    %c0_259 = arith.constant 0 : index
    %468 = vector.load %arg24[%c0_258, %c0_259] : memref<2x32xf32, #tpu.memory_space<vmem>>, vector<2x32xf32>
    tpu.vector_store %arg24[%c0_258, %c0_259], %464 {strides = array<i32>} : memref<2x32xf32, #tpu.memory_space<vmem>>, vector<2x32xf32>,
    %c12_260 = arith.constant 12 : index
    %c0_261 = arith.constant 0 : index
    %469 = vector.load %arg19[%c12_260, %c0_261] : memref<16x32xf32, #tpu.memory_space<vmem>>, vector<2x32xf32>
    tpu.vector_store %arg19[%c12_260, %c0_261], %466 {strides = array<i32>} : memref<16x32xf32, #tpu.memory_space<vmem>>, vector<2x32xf32>,
    %c2_262 = arith.constant 2 : index
    %c0_263 = arith.constant 0 : index
    %470 = vector.load %arg22[%c2_262, %c0_263] : memref<16x128xf32, #tpu.memory_space<vmem>>, vector<2x128xf32>
    %c0_264 = arith.constant 0 : index
    %c0_265 = arith.constant 0 : index
    %471 = vector.load %arg25[%c0_264, %c0_265] : memref<2x32xf32, #tpu.memory_space<vmem>>, vector<2x32xf32>
    %c0_266 = arith.constant 0 : index
    %c0_267 = arith.constant 0 : index
    %472 = vector.load %arg7[%c0_266, %c0_267] : memref<32x128xf32, #tpu.memory_space<vmem>>, vector<32x128xf32>
    %cst_268 = arith.constant dense<0.000000e+00> : vector<2x128xf32>
    %473 = tpu.matmul %471, %472, %cst_268 {dimension_numbers = #tpu.dot_dimension_numbers<[1], [0], [0], [1], [0, 0, 1, 1], [], []>} : vector<2x32xf32>, vector<32x128xf32>, vector<2x128xf32> -> vector<2x128xf32>
    %474 = arith.addf %470, %473 : vector<2x128xf32>
    %c0_269 = arith.constant 0 : index
    %c0_270 = arith.constant 0 : index
    %475 = vector.load %arg26[%c0_269, %c0_270] : memref<2x32xf32, #tpu.memory_space<vmem>>, vector<2x32xf32>
    %476 = vector.extract_strided_slice %474 {offsets = [0, 0], sizes = [2, 32], strides = [1, 1]} : vector<2x128xf32> to vector<2x32xf32>
    %477 = arith.negf %476 : vector<2x32xf32>
    %478 = math.exp %477 : vector<2x32xf32>
    %cst_271 = arith.constant 1.000000e+00 : f32
    %479 = vector.broadcast %cst_271 : f32 to vector<2x32xf32>
    %480 = arith.addf %479, %478 : vector<2x32xf32>
    %481 = arith.divf %479, %480 : vector<2x32xf32>
    %482 = vector.extract_strided_slice %474 {offsets = [0, 32], sizes = [2, 32], strides = [1, 1]} : vector<2x128xf32> to vector<2x32xf32>
    %483 = arith.negf %482 : vector<2x32xf32>
    %484 = math.exp %483 : vector<2x32xf32>
    %cst_272 = arith.constant 1.000000e+00 : f32
    %485 = vector.broadcast %cst_272 : f32 to vector<2x32xf32>
    %486 = arith.addf %485, %484 : vector<2x32xf32>
    %487 = arith.divf %485, %486 : vector<2x32xf32>
    %488 = vector.extract_strided_slice %474 {offsets = [0, 64], sizes = [2, 32], strides = [1, 1]} : vector<2x128xf32> to vector<2x32xf32>
    %489 = math.tanh %488 : vector<2x32xf32>
    %490 = vector.extract_strided_slice %474 {offsets = [0, 96], sizes = [2, 32], strides = [1, 1]} : vector<2x128xf32> to vector<2x32xf32>
    %491 = arith.negf %490 : vector<2x32xf32>
    %492 = math.exp %491 : vector<2x32xf32>
    %cst_273 = arith.constant 1.000000e+00 : f32
    %493 = vector.broadcast %cst_273 : f32 to vector<2x32xf32>
    %494 = arith.addf %493, %492 : vector<2x32xf32>
    %495 = arith.divf %493, %494 : vector<2x32xf32>
    %496 = arith.mulf %487, %475 : vector<2x32xf32>
    %497 = arith.mulf %481, %489 : vector<2x32xf32>
    %498 = arith.addf %496, %497 : vector<2x32xf32>
    %499 = math.tanh %498 : vector<2x32xf32>
    %500 = arith.mulf %495, %499 : vector<2x32xf32>
    %c0_274 = arith.constant 0 : index
    %c0_275 = arith.constant 0 : index
    %501 = vector.load %arg25[%c0_274, %c0_275] : memref<2x32xf32, #tpu.memory_space<vmem>>, vector<2x32xf32>
    tpu.vector_store %arg25[%c0_274, %c0_275], %500 {strides = array<i32>} : memref<2x32xf32, #tpu.memory_space<vmem>>, vector<2x32xf32>,
    %c0_276 = arith.constant 0 : index
    %c0_277 = arith.constant 0 : index
    %502 = vector.load %arg26[%c0_276, %c0_277] : memref<2x32xf32, #tpu.memory_space<vmem>>, vector<2x32xf32>
    tpu.vector_store %arg26[%c0_276, %c0_277], %498 {strides = array<i32>} : memref<2x32xf32, #tpu.memory_space<vmem>>, vector<2x32xf32>,
    %c2_278 = arith.constant 2 : index
    %c0_279 = arith.constant 0 : index
    %503 = vector.load %arg20[%c2_278, %c0_279] : memref<16x32xf32, #tpu.memory_space<vmem>>, vector<2x32xf32>
    tpu.vector_store %arg20[%c2_278, %c0_279], %500 {strides = array<i32>} : memref<16x32xf32, #tpu.memory_space<vmem>>, vector<2x32xf32>,
    %c14_280 = arith.constant 14 : index
    %c0_281 = arith.constant 0 : index
    %504 = vector.load %arg21[%c14_280, %c0_281] : memref<16x128xf32, #tpu.memory_space<vmem>>, vector<2x128xf32>
    %c0_282 = arith.constant 0 : index
    %c0_283 = arith.constant 0 : index
    %505 = vector.load %arg23[%c0_282, %c0_283] : memref<2x32xf32, #tpu.memory_space<vmem>>, vector<2x32xf32>
    %c0_284 = arith.constant 0 : index
    %c0_285 = arith.constant 0 : index
    %506 = vector.load %arg4[%c0_284, %c0_285] : memref<32x128xf32, #tpu.memory_space<vmem>>, vector<32x128xf32>
    %cst_286 = arith.constant dense<0.000000e+00> : vector<2x128xf32>
    %507 = tpu.matmul %505, %506, %cst_286 {dimension_numbers = #tpu.dot_dimension_numbers<[1], [0], [0], [1], [0, 0, 1, 1], [], []>} : vector<2x32xf32>, vector<32x128xf32>, vector<2x128xf32> -> vector<2x128xf32>
    %508 = arith.addf %504, %507 : vector<2x128xf32>
    %c0_287 = arith.constant 0 : index
    %c0_288 = arith.constant 0 : index
    %509 = vector.load %arg24[%c0_287, %c0_288] : memref<2x32xf32, #tpu.memory_space<vmem>>, vector<2x32xf32>
    %510 = vector.extract_strided_slice %508 {offsets = [0, 0], sizes = [2, 32], strides = [1, 1]} : vector<2x128xf32> to vector<2x32xf32>
    %511 = arith.negf %510 : vector<2x32xf32>
    %512 = math.exp %511 : vector<2x32xf32>
    %cst_289 = arith.constant 1.000000e+00 : f32
    %513 = vector.broadcast %cst_289 : f32 to vector<2x32xf32>
    %514 = arith.addf %513, %512 : vector<2x32xf32>
    %515 = arith.divf %513, %514 : vector<2x32xf32>
    %516 = vector.extract_strided_slice %508 {offsets = [0, 32], sizes = [2, 32], strides = [1, 1]} : vector<2x128xf32> to vector<2x32xf32>
    %517 = arith.negf %516 : vector<2x32xf32>
    %518 = math.exp %517 : vector<2x32xf32>
    %cst_290 = arith.constant 1.000000e+00 : f32
    %519 = vector.broadcast %cst_290 : f32 to vector<2x32xf32>
    %520 = arith.addf %519, %518 : vector<2x32xf32>
    %521 = arith.divf %519, %520 : vector<2x32xf32>
    %522 = vector.extract_strided_slice %508 {offsets = [0, 64], sizes = [2, 32], strides = [1, 1]} : vector<2x128xf32> to vector<2x32xf32>
    %523 = math.tanh %522 : vector<2x32xf32>
    %524 = vector.extract_strided_slice %508 {offsets = [0, 96], sizes = [2, 32], strides = [1, 1]} : vector<2x128xf32> to vector<2x32xf32>
    %525 = arith.negf %524 : vector<2x32xf32>
    %526 = math.exp %525 : vector<2x32xf32>
    %cst_291 = arith.constant 1.000000e+00 : f32
    %527 = vector.broadcast %cst_291 : f32 to vector<2x32xf32>
    %528 = arith.addf %527, %526 : vector<2x32xf32>
    %529 = arith.divf %527, %528 : vector<2x32xf32>
    %530 = arith.mulf %521, %509 : vector<2x32xf32>
    %531 = arith.mulf %515, %523 : vector<2x32xf32>
    %532 = arith.addf %530, %531 : vector<2x32xf32>
    %533 = math.tanh %532 : vector<2x32xf32>
    %534 = arith.mulf %529, %533 : vector<2x32xf32>
    %c0_292 = arith.constant 0 : index
    %c0_293 = arith.constant 0 : index
    %535 = vector.load %arg23[%c0_292, %c0_293] : memref<2x32xf32, #tpu.memory_space<vmem>>, vector<2x32xf32>
    tpu.vector_store %arg23[%c0_292, %c0_293], %534 {strides = array<i32>} : memref<2x32xf32, #tpu.memory_space<vmem>>, vector<2x32xf32>,
    %c0_294 = arith.constant 0 : index
    %c0_295 = arith.constant 0 : index
    %536 = vector.load %arg24[%c0_294, %c0_295] : memref<2x32xf32, #tpu.memory_space<vmem>>, vector<2x32xf32>
    tpu.vector_store %arg24[%c0_294, %c0_295], %532 {strides = array<i32>} : memref<2x32xf32, #tpu.memory_space<vmem>>, vector<2x32xf32>,
    %c14_296 = arith.constant 14 : index
    %c0_297 = arith.constant 0 : index
    %537 = vector.load %arg19[%c14_296, %c0_297] : memref<16x32xf32, #tpu.memory_space<vmem>>, vector<2x32xf32>
    tpu.vector_store %arg19[%c14_296, %c0_297], %534 {strides = array<i32>} : memref<16x32xf32, #tpu.memory_space<vmem>>, vector<2x32xf32>,
    %c0_298 = arith.constant 0 : index
    %c0_299 = arith.constant 0 : index
    %538 = vector.load %arg22[%c0_298, %c0_299] : memref<16x128xf32, #tpu.memory_space<vmem>>, vector<2x128xf32>
    %c0_300 = arith.constant 0 : index
    %c0_301 = arith.constant 0 : index
    %539 = vector.load %arg25[%c0_300, %c0_301] : memref<2x32xf32, #tpu.memory_space<vmem>>, vector<2x32xf32>
    %c0_302 = arith.constant 0 : index
    %c0_303 = arith.constant 0 : index
    %540 = vector.load %arg7[%c0_302, %c0_303] : memref<32x128xf32, #tpu.memory_space<vmem>>, vector<32x128xf32>
    %cst_304 = arith.constant dense<0.000000e+00> : vector<2x128xf32>
    %541 = tpu.matmul %539, %540, %cst_304 {dimension_numbers = #tpu.dot_dimension_numbers<[1], [0], [0], [1], [0, 0, 1, 1], [], []>} : vector<2x32xf32>, vector<32x128xf32>, vector<2x128xf32> -> vector<2x128xf32>
    %542 = arith.addf %538, %541 : vector<2x128xf32>
    %c0_305 = arith.constant 0 : index
    %c0_306 = arith.constant 0 : index
    %543 = vector.load %arg26[%c0_305, %c0_306] : memref<2x32xf32, #tpu.memory_space<vmem>>, vector<2x32xf32>
    %544 = vector.extract_strided_slice %542 {offsets = [0, 0], sizes = [2, 32], strides = [1, 1]} : vector<2x128xf32> to vector<2x32xf32>
    %545 = arith.negf %544 : vector<2x32xf32>
    %546 = math.exp %545 : vector<2x32xf32>
    %cst_307 = arith.constant 1.000000e+00 : f32
    %547 = vector.broadcast %cst_307 : f32 to vector<2x32xf32>
    %548 = arith.addf %547, %546 : vector<2x32xf32>
    %549 = arith.divf %547, %548 : vector<2x32xf32>
    %550 = vector.extract_strided_slice %542 {offsets = [0, 32], sizes = [2, 32], strides = [1, 1]} : vector<2x128xf32> to vector<2x32xf32>
    %551 = arith.negf %550 : vector<2x32xf32>
    %552 = math.exp %551 : vector<2x32xf32>
    %cst_308 = arith.constant 1.000000e+00 : f32
    %553 = vector.broadcast %cst_308 : f32 to vector<2x32xf32>
    %554 = arith.addf %553, %552 : vector<2x32xf32>
    %555 = arith.divf %553, %554 : vector<2x32xf32>
    %556 = vector.extract_strided_slice %542 {offsets = [0, 64], sizes = [2, 32], strides = [1, 1]} : vector<2x128xf32> to vector<2x32xf32>
    %557 = math.tanh %556 : vector<2x32xf32>
    %558 = vector.extract_strided_slice %542 {offsets = [0, 96], sizes = [2, 32], strides = [1, 1]} : vector<2x128xf32> to vector<2x32xf32>
    %559 = arith.negf %558 : vector<2x32xf32>
    %560 = math.exp %559 : vector<2x32xf32>
    %cst_309 = arith.constant 1.000000e+00 : f32
    %561 = vector.broadcast %cst_309 : f32 to vector<2x32xf32>
    %562 = arith.addf %561, %560 : vector<2x32xf32>
    %563 = arith.divf %561, %562 : vector<2x32xf32>
    %564 = arith.mulf %555, %543 : vector<2x32xf32>
    %565 = arith.mulf %549, %557 : vector<2x32xf32>
    %566 = arith.addf %564, %565 : vector<2x32xf32>
    %567 = math.tanh %566 : vector<2x32xf32>
    %568 = arith.mulf %563, %567 : vector<2x32xf32>
    %c0_310 = arith.constant 0 : index
    %c0_311 = arith.constant 0 : index
    %569 = vector.load %arg25[%c0_310, %c0_311] : memref<2x32xf32, #tpu.memory_space<vmem>>, vector<2x32xf32>
    tpu.vector_store %arg25[%c0_310, %c0_311], %568 {strides = array<i32>} : memref<2x32xf32, #tpu.memory_space<vmem>>, vector<2x32xf32>,
    %c0_312 = arith.constant 0 : index
    %c0_313 = arith.constant 0 : index
    %570 = vector.load %arg26[%c0_312, %c0_313] : memref<2x32xf32, #tpu.memory_space<vmem>>, vector<2x32xf32>
    tpu.vector_store %arg26[%c0_312, %c0_313], %566 {strides = array<i32>} : memref<2x32xf32, #tpu.memory_space<vmem>>, vector<2x32xf32>,
    %c0_314 = arith.constant 0 : index
    %c0_315 = arith.constant 0 : index
    %571 = vector.load %arg20[%c0_314, %c0_315] : memref<16x32xf32, #tpu.memory_space<vmem>>, vector<2x32xf32>
    tpu.vector_store %arg20[%c0_314, %c0_315], %568 {strides = array<i32>} : memref<16x32xf32, #tpu.memory_space<vmem>>, vector<2x32xf32>,
    %c0_316 = arith.constant 0 : index
    %c0_317 = arith.constant 0 : index
    %572 = vector.load %arg19[%c0_316, %c0_317] : memref<16x32xf32, #tpu.memory_space<vmem>>, vector<16x32xf32>
    %c0_318 = arith.constant 0 : index
    %c0_319 = arith.constant 0 : index
    %573 = vector.load %arg20[%c0_318, %c0_319] : memref<16x32xf32, #tpu.memory_space<vmem>>, vector<16x32xf32>
    %c0_320 = arith.constant 0 : index
    %c0_321 = arith.constant 0 : index
    %574 = vector.load %arg9[%c0_320, %c0_321] : memref<64x128xf32, #tpu.memory_space<vmem>>, vector<32x128xf32>
    %cst_322 = arith.constant dense<0.000000e+00> : vector<16x128xf32>
    %575 = tpu.matmul %572, %574, %cst_322 {dimension_numbers = #tpu.dot_dimension_numbers<[1], [0], [0], [1], [0, 0, 1, 1], [], []>} : vector<16x32xf32>, vector<32x128xf32>, vector<16x128xf32> -> vector<16x128xf32>
    %c32 = arith.constant 32 : index
    %c0_323 = arith.constant 0 : index
    %576 = vector.load %arg9[%c32, %c0_323] : memref<64x128xf32, #tpu.memory_space<vmem>>, vector<32x128xf32>
    %cst_324 = arith.constant dense<0.000000e+00> : vector<16x128xf32>
    %577 = tpu.matmul %573, %576, %cst_324 {dimension_numbers = #tpu.dot_dimension_numbers<[1], [0], [0], [1], [0, 0, 1, 1], [], []>} : vector<16x32xf32>, vector<32x128xf32>, vector<16x128xf32> -> vector<16x128xf32>
    %578 = arith.addf %575, %577 : vector<16x128xf32>
    %c0_325 = arith.constant 0 : index
    %c0_326 = arith.constant 0 : index
    %579 = vector.load %arg11[%c0_325, %c0_326] : memref<1x128xf32, #tpu.memory_space<vmem>>, vector<1x128xf32>
    %580 = vector.broadcast %579 : vector<1x128xf32> to vector<16x128xf32>
    %581 = arith.addf %578, %580 : vector<16x128xf32>
    %c0_327 = arith.constant 0 : index
    %c0_328 = arith.constant 0 : index
    %582 = vector.load %arg21[%c0_327, %c0_328] : memref<16x128xf32, #tpu.memory_space<vmem>>, vector<16x128xf32>
    tpu.vector_store %arg21[%c0_327, %c0_328], %581 {strides = array<i32>} : memref<16x128xf32, #tpu.memory_space<vmem>>, vector<16x128xf32>,
    %c0_329 = arith.constant 0 : index
    %c0_330 = arith.constant 0 : index
    %583 = vector.load %arg12[%c0_329, %c0_330] : memref<64x128xf32, #tpu.memory_space<vmem>>, vector<32x128xf32>
    %cst_331 = arith.constant dense<0.000000e+00> : vector<16x128xf32>
    %584 = tpu.matmul %572, %583, %cst_331 {dimension_numbers = #tpu.dot_dimension_numbers<[1], [0], [0], [1], [0, 0, 1, 1], [], []>} : vector<16x32xf32>, vector<32x128xf32>, vector<16x128xf32> -> vector<16x128xf32>
    %c32_332 = arith.constant 32 : index
    %c0_333 = arith.constant 0 : index
    %585 = vector.load %arg12[%c32_332, %c0_333] : memref<64x128xf32, #tpu.memory_space<vmem>>, vector<32x128xf32>
    %cst_334 = arith.constant dense<0.000000e+00> : vector<16x128xf32>
    %586 = tpu.matmul %573, %585, %cst_334 {dimension_numbers = #tpu.dot_dimension_numbers<[1], [0], [0], [1], [0, 0, 1, 1], [], []>} : vector<16x32xf32>, vector<32x128xf32>, vector<16x128xf32> -> vector<16x128xf32>
    %587 = arith.addf %584, %586 : vector<16x128xf32>
    %c0_335 = arith.constant 0 : index
    %c0_336 = arith.constant 0 : index
    %588 = vector.load %arg14[%c0_335, %c0_336] : memref<1x128xf32, #tpu.memory_space<vmem>>, vector<1x128xf32>
    %589 = vector.broadcast %588 : vector<1x128xf32> to vector<16x128xf32>
    %590 = arith.addf %587, %589 : vector<16x128xf32>
    %c0_337 = arith.constant 0 : index
    %c0_338 = arith.constant 0 : index
    %591 = vector.load %arg22[%c0_337, %c0_338] : memref<16x128xf32, #tpu.memory_space<vmem>>, vector<16x128xf32>
    tpu.vector_store %arg22[%c0_337, %c0_338], %590 {strides = array<i32>} : memref<16x128xf32, #tpu.memory_space<vmem>>, vector<16x128xf32>,
    %cst_339 = arith.constant 0.000000e+00 : f32
    %592 = vector.broadcast %cst_339 : f32 to vector<2x32xf32>
    %c0_340 = arith.constant 0 : index
    %c0_341 = arith.constant 0 : index
    %593 = vector.load %arg23[%c0_340, %c0_341] : memref<2x32xf32, #tpu.memory_space<vmem>>, vector<2x32xf32>
    tpu.vector_store %arg23[%c0_340, %c0_341], %592 {strides = array<i32>} : memref<2x32xf32, #tpu.memory_space<vmem>>, vector<2x32xf32>,
    %cst_342 = arith.constant 0.000000e+00 : f32
    %594 = vector.broadcast %cst_342 : f32 to vector<2x32xf32>
    %c0_343 = arith.constant 0 : index
    %c0_344 = arith.constant 0 : index
    %595 = vector.load %arg24[%c0_343, %c0_344] : memref<2x32xf32, #tpu.memory_space<vmem>>, vector<2x32xf32>
    tpu.vector_store %arg24[%c0_343, %c0_344], %594 {strides = array<i32>} : memref<2x32xf32, #tpu.memory_space<vmem>>, vector<2x32xf32>,
    %cst_345 = arith.constant 0.000000e+00 : f32
    %596 = vector.broadcast %cst_345 : f32 to vector<2x32xf32>
    %c0_346 = arith.constant 0 : index
    %c0_347 = arith.constant 0 : index
    %597 = vector.load %arg25[%c0_346, %c0_347] : memref<2x32xf32, #tpu.memory_space<vmem>>, vector<2x32xf32>
    tpu.vector_store %arg25[%c0_346, %c0_347], %596 {strides = array<i32>} : memref<2x32xf32, #tpu.memory_space<vmem>>, vector<2x32xf32>,
    %cst_348 = arith.constant 0.000000e+00 : f32
    %598 = vector.broadcast %cst_348 : f32 to vector<2x32xf32>
    %c0_349 = arith.constant 0 : index
    %c0_350 = arith.constant 0 : index
    %599 = vector.load %arg26[%c0_349, %c0_350] : memref<2x32xf32, #tpu.memory_space<vmem>>, vector<2x32xf32>
    tpu.vector_store %arg26[%c0_349, %c0_350], %598 {strides = array<i32>} : memref<2x32xf32, #tpu.memory_space<vmem>>, vector<2x32xf32>,
    %c0_351 = arith.constant 0 : index
    %c0_352 = arith.constant 0 : index
    %600 = vector.load %arg21[%c0_351, %c0_352] : memref<16x128xf32, #tpu.memory_space<vmem>>, vector<2x128xf32>
    %c0_353 = arith.constant 0 : index
    %c0_354 = arith.constant 0 : index
    %601 = vector.load %arg23[%c0_353, %c0_354] : memref<2x32xf32, #tpu.memory_space<vmem>>, vector<2x32xf32>
    %c0_355 = arith.constant 0 : index
    %c0_356 = arith.constant 0 : index
    %602 = vector.load %arg10[%c0_355, %c0_356] : memref<32x128xf32, #tpu.memory_space<vmem>>, vector<32x128xf32>
    %cst_357 = arith.constant dense<0.000000e+00> : vector<2x128xf32>
    %603 = tpu.matmul %601, %602, %cst_357 {dimension_numbers = #tpu.dot_dimension_numbers<[1], [0], [0], [1], [0, 0, 1, 1], [], []>} : vector<2x32xf32>, vector<32x128xf32>, vector<2x128xf32> -> vector<2x128xf32>
    %604 = arith.addf %600, %603 : vector<2x128xf32>
    %c0_358 = arith.constant 0 : index
    %c0_359 = arith.constant 0 : index
    %605 = vector.load %arg24[%c0_358, %c0_359] : memref<2x32xf32, #tpu.memory_space<vmem>>, vector<2x32xf32>
    %606 = vector.extract_strided_slice %604 {offsets = [0, 0], sizes = [2, 32], strides = [1, 1]} : vector<2x128xf32> to vector<2x32xf32>
    %607 = arith.negf %606 : vector<2x32xf32>
    %608 = math.exp %607 : vector<2x32xf32>
    %cst_360 = arith.constant 1.000000e+00 : f32
    %609 = vector.broadcast %cst_360 : f32 to vector<2x32xf32>
    %610 = arith.addf %609, %608 : vector<2x32xf32>
    %611 = arith.divf %609, %610 : vector<2x32xf32>
    %612 = vector.extract_strided_slice %604 {offsets = [0, 32], sizes = [2, 32], strides = [1, 1]} : vector<2x128xf32> to vector<2x32xf32>
    %613 = arith.negf %612 : vector<2x32xf32>
    %614 = math.exp %613 : vector<2x32xf32>
    %cst_361 = arith.constant 1.000000e+00 : f32
    %615 = vector.broadcast %cst_361 : f32 to vector<2x32xf32>
    %616 = arith.addf %615, %614 : vector<2x32xf32>
    %617 = arith.divf %615, %616 : vector<2x32xf32>
    %618 = vector.extract_strided_slice %604 {offsets = [0, 64], sizes = [2, 32], strides = [1, 1]} : vector<2x128xf32> to vector<2x32xf32>
    %619 = math.tanh %618 : vector<2x32xf32>
    %620 = vector.extract_strided_slice %604 {offsets = [0, 96], sizes = [2, 32], strides = [1, 1]} : vector<2x128xf32> to vector<2x32xf32>
    %621 = arith.negf %620 : vector<2x32xf32>
    %622 = math.exp %621 : vector<2x32xf32>
    %cst_362 = arith.constant 1.000000e+00 : f32
    %623 = vector.broadcast %cst_362 : f32 to vector<2x32xf32>
    %624 = arith.addf %623, %622 : vector<2x32xf32>
    %625 = arith.divf %623, %624 : vector<2x32xf32>
    %626 = arith.mulf %617, %605 : vector<2x32xf32>
    %627 = arith.mulf %611, %619 : vector<2x32xf32>
    %628 = arith.addf %626, %627 : vector<2x32xf32>
    %629 = math.tanh %628 : vector<2x32xf32>
    %630 = arith.mulf %625, %629 : vector<2x32xf32>
    %c0_363 = arith.constant 0 : index
    %c0_364 = arith.constant 0 : index
    %631 = vector.load %arg23[%c0_363, %c0_364] : memref<2x32xf32, #tpu.memory_space<vmem>>, vector<2x32xf32>
    tpu.vector_store %arg23[%c0_363, %c0_364], %630 {strides = array<i32>} : memref<2x32xf32, #tpu.memory_space<vmem>>, vector<2x32xf32>,
    %c0_365 = arith.constant 0 : index
    %c0_366 = arith.constant 0 : index
    %632 = vector.load %arg24[%c0_365, %c0_366] : memref<2x32xf32, #tpu.memory_space<vmem>>, vector<2x32xf32>
    tpu.vector_store %arg24[%c0_365, %c0_366], %628 {strides = array<i32>} : memref<2x32xf32, #tpu.memory_space<vmem>>, vector<2x32xf32>,
    %c0_367 = arith.constant 0 : index
    %c0_368 = arith.constant 0 : index
    %633 = vector.load %arg19[%c0_367, %c0_368] : memref<16x32xf32, #tpu.memory_space<vmem>>, vector<2x32xf32>
    tpu.vector_store %arg19[%c0_367, %c0_368], %630 {strides = array<i32>} : memref<16x32xf32, #tpu.memory_space<vmem>>, vector<2x32xf32>,
    %c14_369 = arith.constant 14 : index
    %c0_370 = arith.constant 0 : index
    %634 = vector.load %arg22[%c14_369, %c0_370] : memref<16x128xf32, #tpu.memory_space<vmem>>, vector<2x128xf32>
    %c0_371 = arith.constant 0 : index
    %c0_372 = arith.constant 0 : index
    %635 = vector.load %arg25[%c0_371, %c0_372] : memref<2x32xf32, #tpu.memory_space<vmem>>, vector<2x32xf32>
    %c0_373 = arith.constant 0 : index
    %c0_374 = arith.constant 0 : index
    %636 = vector.load %arg13[%c0_373, %c0_374] : memref<32x128xf32, #tpu.memory_space<vmem>>, vector<32x128xf32>
    %cst_375 = arith.constant dense<0.000000e+00> : vector<2x128xf32>
    %637 = tpu.matmul %635, %636, %cst_375 {dimension_numbers = #tpu.dot_dimension_numbers<[1], [0], [0], [1], [0, 0, 1, 1], [], []>} : vector<2x32xf32>, vector<32x128xf32>, vector<2x128xf32> -> vector<2x128xf32>
    %638 = arith.addf %634, %637 : vector<2x128xf32>
    %c0_376 = arith.constant 0 : index
    %c0_377 = arith.constant 0 : index
    %639 = vector.load %arg26[%c0_376, %c0_377] : memref<2x32xf32, #tpu.memory_space<vmem>>, vector<2x32xf32>
    %640 = vector.extract_strided_slice %638 {offsets = [0, 0], sizes = [2, 32], strides = [1, 1]} : vector<2x128xf32> to vector<2x32xf32>
    %641 = arith.negf %640 : vector<2x32xf32>
    %642 = math.exp %641 : vector<2x32xf32>
    %cst_378 = arith.constant 1.000000e+00 : f32
    %643 = vector.broadcast %cst_378 : f32 to vector<2x32xf32>
    %644 = arith.addf %643, %642 : vector<2x32xf32>
    %645 = arith.divf %643, %644 : vector<2x32xf32>
    %646 = vector.extract_strided_slice %638 {offsets = [0, 32], sizes = [2, 32], strides = [1, 1]} : vector<2x128xf32> to vector<2x32xf32>
    %647 = arith.negf %646 : vector<2x32xf32>
    %648 = math.exp %647 : vector<2x32xf32>
    %cst_379 = arith.constant 1.000000e+00 : f32
    %649 = vector.broadcast %cst_379 : f32 to vector<2x32xf32>
    %650 = arith.addf %649, %648 : vector<2x32xf32>
    %651 = arith.divf %649, %650 : vector<2x32xf32>
    %652 = vector.extract_strided_slice %638 {offsets = [0, 64], sizes = [2, 32], strides = [1, 1]} : vector<2x128xf32> to vector<2x32xf32>
    %653 = math.tanh %652 : vector<2x32xf32>
    %654 = vector.extract_strided_slice %638 {offsets = [0, 96], sizes = [2, 32], strides = [1, 1]} : vector<2x128xf32> to vector<2x32xf32>
    %655 = arith.negf %654 : vector<2x32xf32>
    %656 = math.exp %655 : vector<2x32xf32>
    %cst_380 = arith.constant 1.000000e+00 : f32
    %657 = vector.broadcast %cst_380 : f32 to vector<2x32xf32>
    %658 = arith.addf %657, %656 : vector<2x32xf32>
    %659 = arith.divf %657, %658 : vector<2x32xf32>
    %660 = arith.mulf %651, %639 : vector<2x32xf32>
    %661 = arith.mulf %645, %653 : vector<2x32xf32>
    %662 = arith.addf %660, %661 : vector<2x32xf32>
    %663 = math.tanh %662 : vector<2x32xf32>
    %664 = arith.mulf %659, %663 : vector<2x32xf32>
    %c0_381 = arith.constant 0 : index
    %c0_382 = arith.constant 0 : index
    %665 = vector.load %arg25[%c0_381, %c0_382] : memref<2x32xf32, #tpu.memory_space<vmem>>, vector<2x32xf32>
    tpu.vector_store %arg25[%c0_381, %c0_382], %664 {strides = array<i32>} : memref<2x32xf32, #tpu.memory_space<vmem>>, vector<2x32xf32>,
    %c0_383 = arith.constant 0 : index
    %c0_384 = arith.constant 0 : index
    %666 = vector.load %arg26[%c0_383, %c0_384] : memref<2x32xf32, #tpu.memory_space<vmem>>, vector<2x32xf32>
    tpu.vector_store %arg26[%c0_383, %c0_384], %662 {strides = array<i32>} : memref<2x32xf32, #tpu.memory_space<vmem>>, vector<2x32xf32>,
    %c14_385 = arith.constant 14 : index
    %c0_386 = arith.constant 0 : index
    %667 = vector.load %arg20[%c14_385, %c0_386] : memref<16x32xf32, #tpu.memory_space<vmem>>, vector<2x32xf32>
    tpu.vector_store %arg20[%c14_385, %c0_386], %664 {strides = array<i32>} : memref<16x32xf32, #tpu.memory_space<vmem>>, vector<2x32xf32>,
    %c2_387 = arith.constant 2 : index
    %c0_388 = arith.constant 0 : index
    %668 = vector.load %arg21[%c2_387, %c0_388] : memref<16x128xf32, #tpu.memory_space<vmem>>, vector<2x128xf32>
    %c0_389 = arith.constant 0 : index
    %c0_390 = arith.constant 0 : index
    %669 = vector.load %arg23[%c0_389, %c0_390] : memref<2x32xf32, #tpu.memory_space<vmem>>, vector<2x32xf32>
    %c0_391 = arith.constant 0 : index
    %c0_392 = arith.constant 0 : index
    %670 = vector.load %arg10[%c0_391, %c0_392] : memref<32x128xf32, #tpu.memory_space<vmem>>, vector<32x128xf32>
    %cst_393 = arith.constant dense<0.000000e+00> : vector<2x128xf32>
    %671 = tpu.matmul %669, %670, %cst_393 {dimension_numbers = #tpu.dot_dimension_numbers<[1], [0], [0], [1], [0, 0, 1, 1], [], []>} : vector<2x32xf32>, vector<32x128xf32>, vector<2x128xf32> -> vector<2x128xf32>
    %672 = arith.addf %668, %671 : vector<2x128xf32>
    %c0_394 = arith.constant 0 : index
    %c0_395 = arith.constant 0 : index
    %673 = vector.load %arg24[%c0_394, %c0_395] : memref<2x32xf32, #tpu.memory_space<vmem>>, vector<2x32xf32>
    %674 = vector.extract_strided_slice %672 {offsets = [0, 0], sizes = [2, 32], strides = [1, 1]} : vector<2x128xf32> to vector<2x32xf32>
    %675 = arith.negf %674 : vector<2x32xf32>
    %676 = math.exp %675 : vector<2x32xf32>
    %cst_396 = arith.constant 1.000000e+00 : f32
    %677 = vector.broadcast %cst_396 : f32 to vector<2x32xf32>
    %678 = arith.addf %677, %676 : vector<2x32xf32>
    %679 = arith.divf %677, %678 : vector<2x32xf32>
    %680 = vector.extract_strided_slice %672 {offsets = [0, 32], sizes = [2, 32], strides = [1, 1]} : vector<2x128xf32> to vector<2x32xf32>
    %681 = arith.negf %680 : vector<2x32xf32>
    %682 = math.exp %681 : vector<2x32xf32>
    %cst_397 = arith.constant 1.000000e+00 : f32
    %683 = vector.broadcast %cst_397 : f32 to vector<2x32xf32>
    %684 = arith.addf %683, %682 : vector<2x32xf32>
    %685 = arith.divf %683, %684 : vector<2x32xf32>
    %686 = vector.extract_strided_slice %672 {offsets = [0, 64], sizes = [2, 32], strides = [1, 1]} : vector<2x128xf32> to vector<2x32xf32>
    %687 = math.tanh %686 : vector<2x32xf32>
    %688 = vector.extract_strided_slice %672 {offsets = [0, 96], sizes = [2, 32], strides = [1, 1]} : vector<2x128xf32> to vector<2x32xf32>
    %689 = arith.negf %688 : vector<2x32xf32>
    %690 = math.exp %689 : vector<2x32xf32>
    %cst_398 = arith.constant 1.000000e+00 : f32
    %691 = vector.broadcast %cst_398 : f32 to vector<2x32xf32>
    %692 = arith.addf %691, %690 : vector<2x32xf32>
    %693 = arith.divf %691, %692 : vector<2x32xf32>
    %694 = arith.mulf %685, %673 : vector<2x32xf32>
    %695 = arith.mulf %679, %687 : vector<2x32xf32>
    %696 = arith.addf %694, %695 : vector<2x32xf32>
    %697 = math.tanh %696 : vector<2x32xf32>
    %698 = arith.mulf %693, %697 : vector<2x32xf32>
    %c0_399 = arith.constant 0 : index
    %c0_400 = arith.constant 0 : index
    %699 = vector.load %arg23[%c0_399, %c0_400] : memref<2x32xf32, #tpu.memory_space<vmem>>, vector<2x32xf32>
    tpu.vector_store %arg23[%c0_399, %c0_400], %698 {strides = array<i32>} : memref<2x32xf32, #tpu.memory_space<vmem>>, vector<2x32xf32>,
    %c0_401 = arith.constant 0 : index
    %c0_402 = arith.constant 0 : index
    %700 = vector.load %arg24[%c0_401, %c0_402] : memref<2x32xf32, #tpu.memory_space<vmem>>, vector<2x32xf32>
    tpu.vector_store %arg24[%c0_401, %c0_402], %696 {strides = array<i32>} : memref<2x32xf32, #tpu.memory_space<vmem>>, vector<2x32xf32>,
    %c2_403 = arith.constant 2 : index
    %c0_404 = arith.constant 0 : index
    %701 = vector.load %arg19[%c2_403, %c0_404] : memref<16x32xf32, #tpu.memory_space<vmem>>, vector<2x32xf32>
    tpu.vector_store %arg19[%c2_403, %c0_404], %698 {strides = array<i32>} : memref<16x32xf32, #tpu.memory_space<vmem>>, vector<2x32xf32>,
    %c12_405 = arith.constant 12 : index
    %c0_406 = arith.constant 0 : index
    %702 = vector.load %arg22[%c12_405, %c0_406] : memref<16x128xf32, #tpu.memory_space<vmem>>, vector<2x128xf32>
    %c0_407 = arith.constant 0 : index
    %c0_408 = arith.constant 0 : index
    %703 = vector.load %arg25[%c0_407, %c0_408] : memref<2x32xf32, #tpu.memory_space<vmem>>, vector<2x32xf32>
    %c0_409 = arith.constant 0 : index
    %c0_410 = arith.constant 0 : index
    %704 = vector.load %arg13[%c0_409, %c0_410] : memref<32x128xf32, #tpu.memory_space<vmem>>, vector<32x128xf32>
    %cst_411 = arith.constant dense<0.000000e+00> : vector<2x128xf32>
    %705 = tpu.matmul %703, %704, %cst_411 {dimension_numbers = #tpu.dot_dimension_numbers<[1], [0], [0], [1], [0, 0, 1, 1], [], []>} : vector<2x32xf32>, vector<32x128xf32>, vector<2x128xf32> -> vector<2x128xf32>
    %706 = arith.addf %702, %705 : vector<2x128xf32>
    %c0_412 = arith.constant 0 : index
    %c0_413 = arith.constant 0 : index
    %707 = vector.load %arg26[%c0_412, %c0_413] : memref<2x32xf32, #tpu.memory_space<vmem>>, vector<2x32xf32>
    %708 = vector.extract_strided_slice %706 {offsets = [0, 0], sizes = [2, 32], strides = [1, 1]} : vector<2x128xf32> to vector<2x32xf32>
    %709 = arith.negf %708 : vector<2x32xf32>
    %710 = math.exp %709 : vector<2x32xf32>
    %cst_414 = arith.constant 1.000000e+00 : f32
    %711 = vector.broadcast %cst_414 : f32 to vector<2x32xf32>
    %712 = arith.addf %711, %710 : vector<2x32xf32>
    %713 = arith.divf %711, %712 : vector<2x32xf32>
    %714 = vector.extract_strided_slice %706 {offsets = [0, 32], sizes = [2, 32], strides = [1, 1]} : vector<2x128xf32> to vector<2x32xf32>
    %715 = arith.negf %714 : vector<2x32xf32>
    %716 = math.exp %715 : vector<2x32xf32>
    %cst_415 = arith.constant 1.000000e+00 : f32
    %717 = vector.broadcast %cst_415 : f32 to vector<2x32xf32>
    %718 = arith.addf %717, %716 : vector<2x32xf32>
    %719 = arith.divf %717, %718 : vector<2x32xf32>
    %720 = vector.extract_strided_slice %706 {offsets = [0, 64], sizes = [2, 32], strides = [1, 1]} : vector<2x128xf32> to vector<2x32xf32>
    %721 = math.tanh %720 : vector<2x32xf32>
    %722 = vector.extract_strided_slice %706 {offsets = [0, 96], sizes = [2, 32], strides = [1, 1]} : vector<2x128xf32> to vector<2x32xf32>
    %723 = arith.negf %722 : vector<2x32xf32>
    %724 = math.exp %723 : vector<2x32xf32>
    %cst_416 = arith.constant 1.000000e+00 : f32
    %725 = vector.broadcast %cst_416 : f32 to vector<2x32xf32>
    %726 = arith.addf %725, %724 : vector<2x32xf32>
    %727 = arith.divf %725, %726 : vector<2x32xf32>
    %728 = arith.mulf %719, %707 : vector<2x32xf32>
    %729 = arith.mulf %713, %721 : vector<2x32xf32>
    %730 = arith.addf %728, %729 : vector<2x32xf32>
    %731 = math.tanh %730 : vector<2x32xf32>
    %732 = arith.mulf %727, %731 : vector<2x32xf32>
    %c0_417 = arith.constant 0 : index
    %c0_418 = arith.constant 0 : index
    %733 = vector.load %arg25[%c0_417, %c0_418] : memref<2x32xf32, #tpu.memory_space<vmem>>, vector<2x32xf32>
    tpu.vector_store %arg25[%c0_417, %c0_418], %732 {strides = array<i32>} : memref<2x32xf32, #tpu.memory_space<vmem>>, vector<2x32xf32>,
    %c0_419 = arith.constant 0 : index
    %c0_420 = arith.constant 0 : index
    %734 = vector.load %arg26[%c0_419, %c0_420] : memref<2x32xf32, #tpu.memory_space<vmem>>, vector<2x32xf32>
    tpu.vector_store %arg26[%c0_419, %c0_420], %730 {strides = array<i32>} : memref<2x32xf32, #tpu.memory_space<vmem>>, vector<2x32xf32>,
    %c12_421 = arith.constant 12 : index
    %c0_422 = arith.constant 0 : index
    %735 = vector.load %arg20[%c12_421, %c0_422] : memref<16x32xf32, #tpu.memory_space<vmem>>, vector<2x32xf32>
    tpu.vector_store %arg20[%c12_421, %c0_422], %732 {strides = array<i32>} : memref<16x32xf32, #tpu.memory_space<vmem>>, vector<2x32xf32>,
    %c4_423 = arith.constant 4 : index
    %c0_424 = arith.constant 0 : index
    %736 = vector.load %arg21[%c4_423, %c0_424] : memref<16x128xf32, #tpu.memory_space<vmem>>, vector<2x128xf32>
    %c0_425 = arith.constant 0 : index
    %c0_426 = arith.constant 0 : index
    %737 = vector.load %arg23[%c0_425, %c0_426] : memref<2x32xf32, #tpu.memory_space<vmem>>, vector<2x32xf32>
    %c0_427 = arith.constant 0 : index
    %c0_428 = arith.constant 0 : index
    %738 = vector.load %arg10[%c0_427, %c0_428] : memref<32x128xf32, #tpu.memory_space<vmem>>, vector<32x128xf32>
    %cst_429 = arith.constant dense<0.000000e+00> : vector<2x128xf32>
    %739 = tpu.matmul %737, %738, %cst_429 {dimension_numbers = #tpu.dot_dimension_numbers<[1], [0], [0], [1], [0, 0, 1, 1], [], []>} : vector<2x32xf32>, vector<32x128xf32>, vector<2x128xf32> -> vector<2x128xf32>
    %740 = arith.addf %736, %739 : vector<2x128xf32>
    %c0_430 = arith.constant 0 : index
    %c0_431 = arith.constant 0 : index
    %741 = vector.load %arg24[%c0_430, %c0_431] : memref<2x32xf32, #tpu.memory_space<vmem>>, vector<2x32xf32>
    %742 = vector.extract_strided_slice %740 {offsets = [0, 0], sizes = [2, 32], strides = [1, 1]} : vector<2x128xf32> to vector<2x32xf32>
    %743 = arith.negf %742 : vector<2x32xf32>
    %744 = math.exp %743 : vector<2x32xf32>
    %cst_432 = arith.constant 1.000000e+00 : f32
    %745 = vector.broadcast %cst_432 : f32 to vector<2x32xf32>
    %746 = arith.addf %745, %744 : vector<2x32xf32>
    %747 = arith.divf %745, %746 : vector<2x32xf32>
    %748 = vector.extract_strided_slice %740 {offsets = [0, 32], sizes = [2, 32], strides = [1, 1]} : vector<2x128xf32> to vector<2x32xf32>
    %749 = arith.negf %748 : vector<2x32xf32>
    %750 = math.exp %749 : vector<2x32xf32>
    %cst_433 = arith.constant 1.000000e+00 : f32
    %751 = vector.broadcast %cst_433 : f32 to vector<2x32xf32>
    %752 = arith.addf %751, %750 : vector<2x32xf32>
    %753 = arith.divf %751, %752 : vector<2x32xf32>
    %754 = vector.extract_strided_slice %740 {offsets = [0, 64], sizes = [2, 32], strides = [1, 1]} : vector<2x128xf32> to vector<2x32xf32>
    %755 = math.tanh %754 : vector<2x32xf32>
    %756 = vector.extract_strided_slice %740 {offsets = [0, 96], sizes = [2, 32], strides = [1, 1]} : vector<2x128xf32> to vector<2x32xf32>
    %757 = arith.negf %756 : vector<2x32xf32>
    %758 = math.exp %757 : vector<2x32xf32>
    %cst_434 = arith.constant 1.000000e+00 : f32
    %759 = vector.broadcast %cst_434 : f32 to vector<2x32xf32>
    %760 = arith.addf %759, %758 : vector<2x32xf32>
    %761 = arith.divf %759, %760 : vector<2x32xf32>
    %762 = arith.mulf %753, %741 : vector<2x32xf32>
    %763 = arith.mulf %747, %755 : vector<2x32xf32>
    %764 = arith.addf %762, %763 : vector<2x32xf32>
    %765 = math.tanh %764 : vector<2x32xf32>
    %766 = arith.mulf %761, %765 : vector<2x32xf32>
    %c0_435 = arith.constant 0 : index
    %c0_436 = arith.constant 0 : index
    %767 = vector.load %arg23[%c0_435, %c0_436] : memref<2x32xf32, #tpu.memory_space<vmem>>, vector<2x32xf32>
    tpu.vector_store %arg23[%c0_435, %c0_436], %766 {strides = array<i32>} : memref<2x32xf32, #tpu.memory_space<vmem>>, vector<2x32xf32>,
    %c0_437 = arith.constant 0 : index
    %c0_438 = arith.constant 0 : index
    %768 = vector.load %arg24[%c0_437, %c0_438] : memref<2x32xf32, #tpu.memory_space<vmem>>, vector<2x32xf32>
    tpu.vector_store %arg24[%c0_437, %c0_438], %764 {strides = array<i32>} : memref<2x32xf32, #tpu.memory_space<vmem>>, vector<2x32xf32>,
    %c4_439 = arith.constant 4 : index
    %c0_440 = arith.constant 0 : index
    %769 = vector.load %arg19[%c4_439, %c0_440] : memref<16x32xf32, #tpu.memory_space<vmem>>, vector<2x32xf32>
    tpu.vector_store %arg19[%c4_439, %c0_440], %766 {strides = array<i32>} : memref<16x32xf32, #tpu.memory_space<vmem>>, vector<2x32xf32>,
    %c10_441 = arith.constant 10 : index
    %c0_442 = arith.constant 0 : index
    %770 = vector.load %arg22[%c10_441, %c0_442] : memref<16x128xf32, #tpu.memory_space<vmem>>, vector<2x128xf32>
    %c0_443 = arith.constant 0 : index
    %c0_444 = arith.constant 0 : index
    %771 = vector.load %arg25[%c0_443, %c0_444] : memref<2x32xf32, #tpu.memory_space<vmem>>, vector<2x32xf32>
    %c0_445 = arith.constant 0 : index
    %c0_446 = arith.constant 0 : index
    %772 = vector.load %arg13[%c0_445, %c0_446] : memref<32x128xf32, #tpu.memory_space<vmem>>, vector<32x128xf32>
    %cst_447 = arith.constant dense<0.000000e+00> : vector<2x128xf32>
    %773 = tpu.matmul %771, %772, %cst_447 {dimension_numbers = #tpu.dot_dimension_numbers<[1], [0], [0], [1], [0, 0, 1, 1], [], []>} : vector<2x32xf32>, vector<32x128xf32>, vector<2x128xf32> -> vector<2x128xf32>
    %774 = arith.addf %770, %773 : vector<2x128xf32>
    %c0_448 = arith.constant 0 : index
    %c0_449 = arith.constant 0 : index
    %775 = vector.load %arg26[%c0_448, %c0_449] : memref<2x32xf32, #tpu.memory_space<vmem>>, vector<2x32xf32>
    %776 = vector.extract_strided_slice %774 {offsets = [0, 0], sizes = [2, 32], strides = [1, 1]} : vector<2x128xf32> to vector<2x32xf32>
    %777 = arith.negf %776 : vector<2x32xf32>
    %778 = math.exp %777 : vector<2x32xf32>
    %cst_450 = arith.constant 1.000000e+00 : f32
    %779 = vector.broadcast %cst_450 : f32 to vector<2x32xf32>
    %780 = arith.addf %779, %778 : vector<2x32xf32>
    %781 = arith.divf %779, %780 : vector<2x32xf32>
    %782 = vector.extract_strided_slice %774 {offsets = [0, 32], sizes = [2, 32], strides = [1, 1]} : vector<2x128xf32> to vector<2x32xf32>
    %783 = arith.negf %782 : vector<2x32xf32>
    %784 = math.exp %783 : vector<2x32xf32>
    %cst_451 = arith.constant 1.000000e+00 : f32
    %785 = vector.broadcast %cst_451 : f32 to vector<2x32xf32>
    %786 = arith.addf %785, %784 : vector<2x32xf32>
    %787 = arith.divf %785, %786 : vector<2x32xf32>
    %788 = vector.extract_strided_slice %774 {offsets = [0, 64], sizes = [2, 32], strides = [1, 1]} : vector<2x128xf32> to vector<2x32xf32>
    %789 = math.tanh %788 : vector<2x32xf32>
    %790 = vector.extract_strided_slice %774 {offsets = [0, 96], sizes = [2, 32], strides = [1, 1]} : vector<2x128xf32> to vector<2x32xf32>
    %791 = arith.negf %790 : vector<2x32xf32>
    %792 = math.exp %791 : vector<2x32xf32>
    %cst_452 = arith.constant 1.000000e+00 : f32
    %793 = vector.broadcast %cst_452 : f32 to vector<2x32xf32>
    %794 = arith.addf %793, %792 : vector<2x32xf32>
    %795 = arith.divf %793, %794 : vector<2x32xf32>
    %796 = arith.mulf %787, %775 : vector<2x32xf32>
    %797 = arith.mulf %781, %789 : vector<2x32xf32>
    %798 = arith.addf %796, %797 : vector<2x32xf32>
    %799 = math.tanh %798 : vector<2x32xf32>
    %800 = arith.mulf %795, %799 : vector<2x32xf32>
    %c0_453 = arith.constant 0 : index
    %c0_454 = arith.constant 0 : index
    %801 = vector.load %arg25[%c0_453, %c0_454] : memref<2x32xf32, #tpu.memory_space<vmem>>, vector<2x32xf32>
    tpu.vector_store %arg25[%c0_453, %c0_454], %800 {strides = array<i32>} : memref<2x32xf32, #tpu.memory_space<vmem>>, vector<2x32xf32>,
    %c0_455 = arith.constant 0 : index
    %c0_456 = arith.constant 0 : index
    %802 = vector.load %arg26[%c0_455, %c0_456] : memref<2x32xf32, #tpu.memory_space<vmem>>, vector<2x32xf32>
    tpu.vector_store %arg26[%c0_455, %c0_456], %798 {strides = array<i32>} : memref<2x32xf32, #tpu.memory_space<vmem>>, vector<2x32xf32>,
    %c10_457 = arith.constant 10 : index
    %c0_458 = arith.constant 0 : index
    %803 = vector.load %arg20[%c10_457, %c0_458] : memref<16x32xf32, #tpu.memory_space<vmem>>, vector<2x32xf32>
    tpu.vector_store %arg20[%c10_457, %c0_458], %800 {strides = array<i32>} : memref<16x32xf32, #tpu.memory_space<vmem>>, vector<2x32xf32>,
    %c6_459 = arith.constant 6 : index
    %c0_460 = arith.constant 0 : index
    %804 = vector.load %arg21[%c6_459, %c0_460] : memref<16x128xf32, #tpu.memory_space<vmem>>, vector<2x128xf32>
    %c0_461 = arith.constant 0 : index
    %c0_462 = arith.constant 0 : index
    %805 = vector.load %arg23[%c0_461, %c0_462] : memref<2x32xf32, #tpu.memory_space<vmem>>, vector<2x32xf32>
    %c0_463 = arith.constant 0 : index
    %c0_464 = arith.constant 0 : index
    %806 = vector.load %arg10[%c0_463, %c0_464] : memref<32x128xf32, #tpu.memory_space<vmem>>, vector<32x128xf32>
    %cst_465 = arith.constant dense<0.000000e+00> : vector<2x128xf32>
    %807 = tpu.matmul %805, %806, %cst_465 {dimension_numbers = #tpu.dot_dimension_numbers<[1], [0], [0], [1], [0, 0, 1, 1], [], []>} : vector<2x32xf32>, vector<32x128xf32>, vector<2x128xf32> -> vector<2x128xf32>
    %808 = arith.addf %804, %807 : vector<2x128xf32>
    %c0_466 = arith.constant 0 : index
    %c0_467 = arith.constant 0 : index
    %809 = vector.load %arg24[%c0_466, %c0_467] : memref<2x32xf32, #tpu.memory_space<vmem>>, vector<2x32xf32>
    %810 = vector.extract_strided_slice %808 {offsets = [0, 0], sizes = [2, 32], strides = [1, 1]} : vector<2x128xf32> to vector<2x32xf32>
    %811 = arith.negf %810 : vector<2x32xf32>
    %812 = math.exp %811 : vector<2x32xf32>
    %cst_468 = arith.constant 1.000000e+00 : f32
    %813 = vector.broadcast %cst_468 : f32 to vector<2x32xf32>
    %814 = arith.addf %813, %812 : vector<2x32xf32>
    %815 = arith.divf %813, %814 : vector<2x32xf32>
    %816 = vector.extract_strided_slice %808 {offsets = [0, 32], sizes = [2, 32], strides = [1, 1]} : vector<2x128xf32> to vector<2x32xf32>
    %817 = arith.negf %816 : vector<2x32xf32>
    %818 = math.exp %817 : vector<2x32xf32>
    %cst_469 = arith.constant 1.000000e+00 : f32
    %819 = vector.broadcast %cst_469 : f32 to vector<2x32xf32>
    %820 = arith.addf %819, %818 : vector<2x32xf32>
    %821 = arith.divf %819, %820 : vector<2x32xf32>
    %822 = vector.extract_strided_slice %808 {offsets = [0, 64], sizes = [2, 32], strides = [1, 1]} : vector<2x128xf32> to vector<2x32xf32>
    %823 = math.tanh %822 : vector<2x32xf32>
    %824 = vector.extract_strided_slice %808 {offsets = [0, 96], sizes = [2, 32], strides = [1, 1]} : vector<2x128xf32> to vector<2x32xf32>
    %825 = arith.negf %824 : vector<2x32xf32>
    %826 = math.exp %825 : vector<2x32xf32>
    %cst_470 = arith.constant 1.000000e+00 : f32
    %827 = vector.broadcast %cst_470 : f32 to vector<2x32xf32>
    %828 = arith.addf %827, %826 : vector<2x32xf32>
    %829 = arith.divf %827, %828 : vector<2x32xf32>
    %830 = arith.mulf %821, %809 : vector<2x32xf32>
    %831 = arith.mulf %815, %823 : vector<2x32xf32>
    %832 = arith.addf %830, %831 : vector<2x32xf32>
    %833 = math.tanh %832 : vector<2x32xf32>
    %834 = arith.mulf %829, %833 : vector<2x32xf32>
    %c0_471 = arith.constant 0 : index
    %c0_472 = arith.constant 0 : index
    %835 = vector.load %arg23[%c0_471, %c0_472] : memref<2x32xf32, #tpu.memory_space<vmem>>, vector<2x32xf32>
    tpu.vector_store %arg23[%c0_471, %c0_472], %834 {strides = array<i32>} : memref<2x32xf32, #tpu.memory_space<vmem>>, vector<2x32xf32>,
    %c0_473 = arith.constant 0 : index
    %c0_474 = arith.constant 0 : index
    %836 = vector.load %arg24[%c0_473, %c0_474] : memref<2x32xf32, #tpu.memory_space<vmem>>, vector<2x32xf32>
    tpu.vector_store %arg24[%c0_473, %c0_474], %832 {strides = array<i32>} : memref<2x32xf32, #tpu.memory_space<vmem>>, vector<2x32xf32>,
    %c6_475 = arith.constant 6 : index
    %c0_476 = arith.constant 0 : index
    %837 = vector.load %arg19[%c6_475, %c0_476] : memref<16x32xf32, #tpu.memory_space<vmem>>, vector<2x32xf32>
    tpu.vector_store %arg19[%c6_475, %c0_476], %834 {strides = array<i32>} : memref<16x32xf32, #tpu.memory_space<vmem>>, vector<2x32xf32>,
    %c8_477 = arith.constant 8 : index
    %c0_478 = arith.constant 0 : index
    %838 = vector.load %arg22[%c8_477, %c0_478] : memref<16x128xf32, #tpu.memory_space<vmem>>, vector<2x128xf32>
    %c0_479 = arith.constant 0 : index
    %c0_480 = arith.constant 0 : index
    %839 = vector.load %arg25[%c0_479, %c0_480] : memref<2x32xf32, #tpu.memory_space<vmem>>, vector<2x32xf32>
    %c0_481 = arith.constant 0 : index
    %c0_482 = arith.constant 0 : index
    %840 = vector.load %arg13[%c0_481, %c0_482] : memref<32x128xf32, #tpu.memory_space<vmem>>, vector<32x128xf32>
    %cst_483 = arith.constant dense<0.000000e+00> : vector<2x128xf32>
    %841 = tpu.matmul %839, %840, %cst_483 {dimension_numbers = #tpu.dot_dimension_numbers<[1], [0], [0], [1], [0, 0, 1, 1], [], []>} : vector<2x32xf32>, vector<32x128xf32>, vector<2x128xf32> -> vector<2x128xf32>
    %842 = arith.addf %838, %841 : vector<2x128xf32>
    %c0_484 = arith.constant 0 : index
    %c0_485 = arith.constant 0 : index
    %843 = vector.load %arg26[%c0_484, %c0_485] : memref<2x32xf32, #tpu.memory_space<vmem>>, vector<2x32xf32>
    %844 = vector.extract_strided_slice %842 {offsets = [0, 0], sizes = [2, 32], strides = [1, 1]} : vector<2x128xf32> to vector<2x32xf32>
    %845 = arith.negf %844 : vector<2x32xf32>
    %846 = math.exp %845 : vector<2x32xf32>
    %cst_486 = arith.constant 1.000000e+00 : f32
    %847 = vector.broadcast %cst_486 : f32 to vector<2x32xf32>
    %848 = arith.addf %847, %846 : vector<2x32xf32>
    %849 = arith.divf %847, %848 : vector<2x32xf32>
    %850 = vector.extract_strided_slice %842 {offsets = [0, 32], sizes = [2, 32], strides = [1, 1]} : vector<2x128xf32> to vector<2x32xf32>
    %851 = arith.negf %850 : vector<2x32xf32>
    %852 = math.exp %851 : vector<2x32xf32>
    %cst_487 = arith.constant 1.000000e+00 : f32
    %853 = vector.broadcast %cst_487 : f32 to vector<2x32xf32>
    %854 = arith.addf %853, %852 : vector<2x32xf32>
    %855 = arith.divf %853, %854 : vector<2x32xf32>
    %856 = vector.extract_strided_slice %842 {offsets = [0, 64], sizes = [2, 32], strides = [1, 1]} : vector<2x128xf32> to vector<2x32xf32>
    %857 = math.tanh %856 : vector<2x32xf32>
    %858 = vector.extract_strided_slice %842 {offsets = [0, 96], sizes = [2, 32], strides = [1, 1]} : vector<2x128xf32> to vector<2x32xf32>
    %859 = arith.negf %858 : vector<2x32xf32>
    %860 = math.exp %859 : vector<2x32xf32>
    %cst_488 = arith.constant 1.000000e+00 : f32
    %861 = vector.broadcast %cst_488 : f32 to vector<2x32xf32>
    %862 = arith.addf %861, %860 : vector<2x32xf32>
    %863 = arith.divf %861, %862 : vector<2x32xf32>
    %864 = arith.mulf %855, %843 : vector<2x32xf32>
    %865 = arith.mulf %849, %857 : vector<2x32xf32>
    %866 = arith.addf %864, %865 : vector<2x32xf32>
    %867 = math.tanh %866 : vector<2x32xf32>
    %868 = arith.mulf %863, %867 : vector<2x32xf32>
    %c0_489 = arith.constant 0 : index
    %c0_490 = arith.constant 0 : index
    %869 = vector.load %arg25[%c0_489, %c0_490] : memref<2x32xf32, #tpu.memory_space<vmem>>, vector<2x32xf32>
    tpu.vector_store %arg25[%c0_489, %c0_490], %868 {strides = array<i32>} : memref<2x32xf32, #tpu.memory_space<vmem>>, vector<2x32xf32>,
    %c0_491 = arith.constant 0 : index
    %c0_492 = arith.constant 0 : index
    %870 = vector.load %arg26[%c0_491, %c0_492] : memref<2x32xf32, #tpu.memory_space<vmem>>, vector<2x32xf32>
    tpu.vector_store %arg26[%c0_491, %c0_492], %866 {strides = array<i32>} : memref<2x32xf32, #tpu.memory_space<vmem>>, vector<2x32xf32>,
    %c8_493 = arith.constant 8 : index
    %c0_494 = arith.constant 0 : index
    %871 = vector.load %arg20[%c8_493, %c0_494] : memref<16x32xf32, #tpu.memory_space<vmem>>, vector<2x32xf32>
    tpu.vector_store %arg20[%c8_493, %c0_494], %868 {strides = array<i32>} : memref<16x32xf32, #tpu.memory_space<vmem>>, vector<2x32xf32>,
    %c8_495 = arith.constant 8 : index
    %c0_496 = arith.constant 0 : index
    %872 = vector.load %arg21[%c8_495, %c0_496] : memref<16x128xf32, #tpu.memory_space<vmem>>, vector<2x128xf32>
    %c0_497 = arith.constant 0 : index
    %c0_498 = arith.constant 0 : index
    %873 = vector.load %arg23[%c0_497, %c0_498] : memref<2x32xf32, #tpu.memory_space<vmem>>, vector<2x32xf32>
    %c0_499 = arith.constant 0 : index
    %c0_500 = arith.constant 0 : index
    %874 = vector.load %arg10[%c0_499, %c0_500] : memref<32x128xf32, #tpu.memory_space<vmem>>, vector<32x128xf32>
    %cst_501 = arith.constant dense<0.000000e+00> : vector<2x128xf32>
    %875 = tpu.matmul %873, %874, %cst_501 {dimension_numbers = #tpu.dot_dimension_numbers<[1], [0], [0], [1], [0, 0, 1, 1], [], []>} : vector<2x32xf32>, vector<32x128xf32>, vector<2x128xf32> -> vector<2x128xf32>
    %876 = arith.addf %872, %875 : vector<2x128xf32>
    %c0_502 = arith.constant 0 : index
    %c0_503 = arith.constant 0 : index
    %877 = vector.load %arg24[%c0_502, %c0_503] : memref<2x32xf32, #tpu.memory_space<vmem>>, vector<2x32xf32>
    %878 = vector.extract_strided_slice %876 {offsets = [0, 0], sizes = [2, 32], strides = [1, 1]} : vector<2x128xf32> to vector<2x32xf32>
    %879 = arith.negf %878 : vector<2x32xf32>
    %880 = math.exp %879 : vector<2x32xf32>
    %cst_504 = arith.constant 1.000000e+00 : f32
    %881 = vector.broadcast %cst_504 : f32 to vector<2x32xf32>
    %882 = arith.addf %881, %880 : vector<2x32xf32>
    %883 = arith.divf %881, %882 : vector<2x32xf32>
    %884 = vector.extract_strided_slice %876 {offsets = [0, 32], sizes = [2, 32], strides = [1, 1]} : vector<2x128xf32> to vector<2x32xf32>
    %885 = arith.negf %884 : vector<2x32xf32>
    %886 = math.exp %885 : vector<2x32xf32>
    %cst_505 = arith.constant 1.000000e+00 : f32
    %887 = vector.broadcast %cst_505 : f32 to vector<2x32xf32>
    %888 = arith.addf %887, %886 : vector<2x32xf32>
    %889 = arith.divf %887, %888 : vector<2x32xf32>
    %890 = vector.extract_strided_slice %876 {offsets = [0, 64], sizes = [2, 32], strides = [1, 1]} : vector<2x128xf32> to vector<2x32xf32>
    %891 = math.tanh %890 : vector<2x32xf32>
    %892 = vector.extract_strided_slice %876 {offsets = [0, 96], sizes = [2, 32], strides = [1, 1]} : vector<2x128xf32> to vector<2x32xf32>
    %893 = arith.negf %892 : vector<2x32xf32>
    %894 = math.exp %893 : vector<2x32xf32>
    %cst_506 = arith.constant 1.000000e+00 : f32
    %895 = vector.broadcast %cst_506 : f32 to vector<2x32xf32>
    %896 = arith.addf %895, %894 : vector<2x32xf32>
    %897 = arith.divf %895, %896 : vector<2x32xf32>
    %898 = arith.mulf %889, %877 : vector<2x32xf32>
    %899 = arith.mulf %883, %891 : vector<2x32xf32>
    %900 = arith.addf %898, %899 : vector<2x32xf32>
    %901 = math.tanh %900 : vector<2x32xf32>
    %902 = arith.mulf %897, %901 : vector<2x32xf32>
    %c0_507 = arith.constant 0 : index
    %c0_508 = arith.constant 0 : index
    %903 = vector.load %arg23[%c0_507, %c0_508] : memref<2x32xf32, #tpu.memory_space<vmem>>, vector<2x32xf32>
    tpu.vector_store %arg23[%c0_507, %c0_508], %902 {strides = array<i32>} : memref<2x32xf32, #tpu.memory_space<vmem>>, vector<2x32xf32>,
    %c0_509 = arith.constant 0 : index
    %c0_510 = arith.constant 0 : index
    %904 = vector.load %arg24[%c0_509, %c0_510] : memref<2x32xf32, #tpu.memory_space<vmem>>, vector<2x32xf32>
    tpu.vector_store %arg24[%c0_509, %c0_510], %900 {strides = array<i32>} : memref<2x32xf32, #tpu.memory_space<vmem>>, vector<2x32xf32>,
    %c8_511 = arith.constant 8 : index
    %c0_512 = arith.constant 0 : index
    %905 = vector.load %arg19[%c8_511, %c0_512] : memref<16x32xf32, #tpu.memory_space<vmem>>, vector<2x32xf32>
    tpu.vector_store %arg19[%c8_511, %c0_512], %902 {strides = array<i32>} : memref<16x32xf32, #tpu.memory_space<vmem>>, vector<2x32xf32>,
    %c6_513 = arith.constant 6 : index
    %c0_514 = arith.constant 0 : index
    %906 = vector.load %arg22[%c6_513, %c0_514] : memref<16x128xf32, #tpu.memory_space<vmem>>, vector<2x128xf32>
    %c0_515 = arith.constant 0 : index
    %c0_516 = arith.constant 0 : index
    %907 = vector.load %arg25[%c0_515, %c0_516] : memref<2x32xf32, #tpu.memory_space<vmem>>, vector<2x32xf32>
    %c0_517 = arith.constant 0 : index
    %c0_518 = arith.constant 0 : index
    %908 = vector.load %arg13[%c0_517, %c0_518] : memref<32x128xf32, #tpu.memory_space<vmem>>, vector<32x128xf32>
    %cst_519 = arith.constant dense<0.000000e+00> : vector<2x128xf32>
    %909 = tpu.matmul %907, %908, %cst_519 {dimension_numbers = #tpu.dot_dimension_numbers<[1], [0], [0], [1], [0, 0, 1, 1], [], []>} : vector<2x32xf32>, vector<32x128xf32>, vector<2x128xf32> -> vector<2x128xf32>
    %910 = arith.addf %906, %909 : vector<2x128xf32>
    %c0_520 = arith.constant 0 : index
    %c0_521 = arith.constant 0 : index
    %911 = vector.load %arg26[%c0_520, %c0_521] : memref<2x32xf32, #tpu.memory_space<vmem>>, vector<2x32xf32>
    %912 = vector.extract_strided_slice %910 {offsets = [0, 0], sizes = [2, 32], strides = [1, 1]} : vector<2x128xf32> to vector<2x32xf32>
    %913 = arith.negf %912 : vector<2x32xf32>
    %914 = math.exp %913 : vector<2x32xf32>
    %cst_522 = arith.constant 1.000000e+00 : f32
    %915 = vector.broadcast %cst_522 : f32 to vector<2x32xf32>
    %916 = arith.addf %915, %914 : vector<2x32xf32>
    %917 = arith.divf %915, %916 : vector<2x32xf32>
    %918 = vector.extract_strided_slice %910 {offsets = [0, 32], sizes = [2, 32], strides = [1, 1]} : vector<2x128xf32> to vector<2x32xf32>
    %919 = arith.negf %918 : vector<2x32xf32>
    %920 = math.exp %919 : vector<2x32xf32>
    %cst_523 = arith.constant 1.000000e+00 : f32
    %921 = vector.broadcast %cst_523 : f32 to vector<2x32xf32>
    %922 = arith.addf %921, %920 : vector<2x32xf32>
    %923 = arith.divf %921, %922 : vector<2x32xf32>
    %924 = vector.extract_strided_slice %910 {offsets = [0, 64], sizes = [2, 32], strides = [1, 1]} : vector<2x128xf32> to vector<2x32xf32>
    %925 = math.tanh %924 : vector<2x32xf32>
    %926 = vector.extract_strided_slice %910 {offsets = [0, 96], sizes = [2, 32], strides = [1, 1]} : vector<2x128xf32> to vector<2x32xf32>
    %927 = arith.negf %926 : vector<2x32xf32>
    %928 = math.exp %927 : vector<2x32xf32>
    %cst_524 = arith.constant 1.000000e+00 : f32
    %929 = vector.broadcast %cst_524 : f32 to vector<2x32xf32>
    %930 = arith.addf %929, %928 : vector<2x32xf32>
    %931 = arith.divf %929, %930 : vector<2x32xf32>
    %932 = arith.mulf %923, %911 : vector<2x32xf32>
    %933 = arith.mulf %917, %925 : vector<2x32xf32>
    %934 = arith.addf %932, %933 : vector<2x32xf32>
    %935 = math.tanh %934 : vector<2x32xf32>
    %936 = arith.mulf %931, %935 : vector<2x32xf32>
    %c0_525 = arith.constant 0 : index
    %c0_526 = arith.constant 0 : index
    %937 = vector.load %arg25[%c0_525, %c0_526] : memref<2x32xf32, #tpu.memory_space<vmem>>, vector<2x32xf32>
    tpu.vector_store %arg25[%c0_525, %c0_526], %936 {strides = array<i32>} : memref<2x32xf32, #tpu.memory_space<vmem>>, vector<2x32xf32>,
    %c0_527 = arith.constant 0 : index
    %c0_528 = arith.constant 0 : index
    %938 = vector.load %arg26[%c0_527, %c0_528] : memref<2x32xf32, #tpu.memory_space<vmem>>, vector<2x32xf32>
    tpu.vector_store %arg26[%c0_527, %c0_528], %934 {strides = array<i32>} : memref<2x32xf32, #tpu.memory_space<vmem>>, vector<2x32xf32>,
    %c6_529 = arith.constant 6 : index
    %c0_530 = arith.constant 0 : index
    %939 = vector.load %arg20[%c6_529, %c0_530] : memref<16x32xf32, #tpu.memory_space<vmem>>, vector<2x32xf32>
    tpu.vector_store %arg20[%c6_529, %c0_530], %936 {strides = array<i32>} : memref<16x32xf32, #tpu.memory_space<vmem>>, vector<2x32xf32>,
    %c10_531 = arith.constant 10 : index
    %c0_532 = arith.constant 0 : index
    %940 = vector.load %arg21[%c10_531, %c0_532] : memref<16x128xf32, #tpu.memory_space<vmem>>, vector<2x128xf32>
    %c0_533 = arith.constant 0 : index
    %c0_534 = arith.constant 0 : index
    %941 = vector.load %arg23[%c0_533, %c0_534] : memref<2x32xf32, #tpu.memory_space<vmem>>, vector<2x32xf32>
    %c0_535 = arith.constant 0 : index
    %c0_536 = arith.constant 0 : index
    %942 = vector.load %arg10[%c0_535, %c0_536] : memref<32x128xf32, #tpu.memory_space<vmem>>, vector<32x128xf32>
    %cst_537 = arith.constant dense<0.000000e+00> : vector<2x128xf32>
    %943 = tpu.matmul %941, %942, %cst_537 {dimension_numbers = #tpu.dot_dimension_numbers<[1], [0], [0], [1], [0, 0, 1, 1], [], []>} : vector<2x32xf32>, vector<32x128xf32>, vector<2x128xf32> -> vector<2x128xf32>
    %944 = arith.addf %940, %943 : vector<2x128xf32>
    %c0_538 = arith.constant 0 : index
    %c0_539 = arith.constant 0 : index
    %945 = vector.load %arg24[%c0_538, %c0_539] : memref<2x32xf32, #tpu.memory_space<vmem>>, vector<2x32xf32>
    %946 = vector.extract_strided_slice %944 {offsets = [0, 0], sizes = [2, 32], strides = [1, 1]} : vector<2x128xf32> to vector<2x32xf32>
    %947 = arith.negf %946 : vector<2x32xf32>
    %948 = math.exp %947 : vector<2x32xf32>
    %cst_540 = arith.constant 1.000000e+00 : f32
    %949 = vector.broadcast %cst_540 : f32 to vector<2x32xf32>
    %950 = arith.addf %949, %948 : vector<2x32xf32>
    %951 = arith.divf %949, %950 : vector<2x32xf32>
    %952 = vector.extract_strided_slice %944 {offsets = [0, 32], sizes = [2, 32], strides = [1, 1]} : vector<2x128xf32> to vector<2x32xf32>
    %953 = arith.negf %952 : vector<2x32xf32>
    %954 = math.exp %953 : vector<2x32xf32>
    %cst_541 = arith.constant 1.000000e+00 : f32
    %955 = vector.broadcast %cst_541 : f32 to vector<2x32xf32>
    %956 = arith.addf %955, %954 : vector<2x32xf32>
    %957 = arith.divf %955, %956 : vector<2x32xf32>
    %958 = vector.extract_strided_slice %944 {offsets = [0, 64], sizes = [2, 32], strides = [1, 1]} : vector<2x128xf32> to vector<2x32xf32>
    %959 = math.tanh %958 : vector<2x32xf32>
    %960 = vector.extract_strided_slice %944 {offsets = [0, 96], sizes = [2, 32], strides = [1, 1]} : vector<2x128xf32> to vector<2x32xf32>
    %961 = arith.negf %960 : vector<2x32xf32>
    %962 = math.exp %961 : vector<2x32xf32>
    %cst_542 = arith.constant 1.000000e+00 : f32
    %963 = vector.broadcast %cst_542 : f32 to vector<2x32xf32>
    %964 = arith.addf %963, %962 : vector<2x32xf32>
    %965 = arith.divf %963, %964 : vector<2x32xf32>
    %966 = arith.mulf %957, %945 : vector<2x32xf32>
    %967 = arith.mulf %951, %959 : vector<2x32xf32>
    %968 = arith.addf %966, %967 : vector<2x32xf32>
    %969 = math.tanh %968 : vector<2x32xf32>
    %970 = arith.mulf %965, %969 : vector<2x32xf32>
    %c0_543 = arith.constant 0 : index
    %c0_544 = arith.constant 0 : index
    %971 = vector.load %arg23[%c0_543, %c0_544] : memref<2x32xf32, #tpu.memory_space<vmem>>, vector<2x32xf32>
    tpu.vector_store %arg23[%c0_543, %c0_544], %970 {strides = array<i32>} : memref<2x32xf32, #tpu.memory_space<vmem>>, vector<2x32xf32>,
    %c0_545 = arith.constant 0 : index
    %c0_546 = arith.constant 0 : index
    %972 = vector.load %arg24[%c0_545, %c0_546] : memref<2x32xf32, #tpu.memory_space<vmem>>, vector<2x32xf32>
    tpu.vector_store %arg24[%c0_545, %c0_546], %968 {strides = array<i32>} : memref<2x32xf32, #tpu.memory_space<vmem>>, vector<2x32xf32>,
    %c10_547 = arith.constant 10 : index
    %c0_548 = arith.constant 0 : index
    %973 = vector.load %arg19[%c10_547, %c0_548] : memref<16x32xf32, #tpu.memory_space<vmem>>, vector<2x32xf32>
    tpu.vector_store %arg19[%c10_547, %c0_548], %970 {strides = array<i32>} : memref<16x32xf32, #tpu.memory_space<vmem>>, vector<2x32xf32>,
    %c4_549 = arith.constant 4 : index
    %c0_550 = arith.constant 0 : index
    %974 = vector.load %arg22[%c4_549, %c0_550] : memref<16x128xf32, #tpu.memory_space<vmem>>, vector<2x128xf32>
    %c0_551 = arith.constant 0 : index
    %c0_552 = arith.constant 0 : index
    %975 = vector.load %arg25[%c0_551, %c0_552] : memref<2x32xf32, #tpu.memory_space<vmem>>, vector<2x32xf32>
    %c0_553 = arith.constant 0 : index
    %c0_554 = arith.constant 0 : index
    %976 = vector.load %arg13[%c0_553, %c0_554] : memref<32x128xf32, #tpu.memory_space<vmem>>, vector<32x128xf32>
    %cst_555 = arith.constant dense<0.000000e+00> : vector<2x128xf32>
    %977 = tpu.matmul %975, %976, %cst_555 {dimension_numbers = #tpu.dot_dimension_numbers<[1], [0], [0], [1], [0, 0, 1, 1], [], []>} : vector<2x32xf32>, vector<32x128xf32>, vector<2x128xf32> -> vector<2x128xf32>
    %978 = arith.addf %974, %977 : vector<2x128xf32>
    %c0_556 = arith.constant 0 : index
    %c0_557 = arith.constant 0 : index
    %979 = vector.load %arg26[%c0_556, %c0_557] : memref<2x32xf32, #tpu.memory_space<vmem>>, vector<2x32xf32>
    %980 = vector.extract_strided_slice %978 {offsets = [0, 0], sizes = [2, 32], strides = [1, 1]} : vector<2x128xf32> to vector<2x32xf32>
    %981 = arith.negf %980 : vector<2x32xf32>
    %982 = math.exp %981 : vector<2x32xf32>
    %cst_558 = arith.constant 1.000000e+00 : f32
    %983 = vector.broadcast %cst_558 : f32 to vector<2x32xf32>
    %984 = arith.addf %983, %982 : vector<2x32xf32>
    %985 = arith.divf %983, %984 : vector<2x32xf32>
    %986 = vector.extract_strided_slice %978 {offsets = [0, 32], sizes = [2, 32], strides = [1, 1]} : vector<2x128xf32> to vector<2x32xf32>
    %987 = arith.negf %986 : vector<2x32xf32>
    %988 = math.exp %987 : vector<2x32xf32>
    %cst_559 = arith.constant 1.000000e+00 : f32
    %989 = vector.broadcast %cst_559 : f32 to vector<2x32xf32>
    %990 = arith.addf %989, %988 : vector<2x32xf32>
    %991 = arith.divf %989, %990 : vector<2x32xf32>
    %992 = vector.extract_strided_slice %978 {offsets = [0, 64], sizes = [2, 32], strides = [1, 1]} : vector<2x128xf32> to vector<2x32xf32>
    %993 = math.tanh %992 : vector<2x32xf32>
    %994 = vector.extract_strided_slice %978 {offsets = [0, 96], sizes = [2, 32], strides = [1, 1]} : vector<2x128xf32> to vector<2x32xf32>
    %995 = arith.negf %994 : vector<2x32xf32>
    %996 = math.exp %995 : vector<2x32xf32>
    %cst_560 = arith.constant 1.000000e+00 : f32
    %997 = vector.broadcast %cst_560 : f32 to vector<2x32xf32>
    %998 = arith.addf %997, %996 : vector<2x32xf32>
    %999 = arith.divf %997, %998 : vector<2x32xf32>
    %1000 = arith.mulf %991, %979 : vector<2x32xf32>
    %1001 = arith.mulf %985, %993 : vector<2x32xf32>
    %1002 = arith.addf %1000, %1001 : vector<2x32xf32>
    %1003 = math.tanh %1002 : vector<2x32xf32>
    %1004 = arith.mulf %999, %1003 : vector<2x32xf32>
    %c0_561 = arith.constant 0 : index
    %c0_562 = arith.constant 0 : index
    %1005 = vector.load %arg25[%c0_561, %c0_562] : memref<2x32xf32, #tpu.memory_space<vmem>>, vector<2x32xf32>
    tpu.vector_store %arg25[%c0_561, %c0_562], %1004 {strides = array<i32>} : memref<2x32xf32, #tpu.memory_space<vmem>>, vector<2x32xf32>,
    %c0_563 = arith.constant 0 : index
    %c0_564 = arith.constant 0 : index
    %1006 = vector.load %arg26[%c0_563, %c0_564] : memref<2x32xf32, #tpu.memory_space<vmem>>, vector<2x32xf32>
    tpu.vector_store %arg26[%c0_563, %c0_564], %1002 {strides = array<i32>} : memref<2x32xf32, #tpu.memory_space<vmem>>, vector<2x32xf32>,
    %c4_565 = arith.constant 4 : index
    %c0_566 = arith.constant 0 : index
    %1007 = vector.load %arg20[%c4_565, %c0_566] : memref<16x32xf32, #tpu.memory_space<vmem>>, vector<2x32xf32>
    tpu.vector_store %arg20[%c4_565, %c0_566], %1004 {strides = array<i32>} : memref<16x32xf32, #tpu.memory_space<vmem>>, vector<2x32xf32>,
    %c12_567 = arith.constant 12 : index
    %c0_568 = arith.constant 0 : index
    %1008 = vector.load %arg21[%c12_567, %c0_568] : memref<16x128xf32, #tpu.memory_space<vmem>>, vector<2x128xf32>
    %c0_569 = arith.constant 0 : index
    %c0_570 = arith.constant 0 : index
    %1009 = vector.load %arg23[%c0_569, %c0_570] : memref<2x32xf32, #tpu.memory_space<vmem>>, vector<2x32xf32>
    %c0_571 = arith.constant 0 : index
    %c0_572 = arith.constant 0 : index
    %1010 = vector.load %arg10[%c0_571, %c0_572] : memref<32x128xf32, #tpu.memory_space<vmem>>, vector<32x128xf32>
    %cst_573 = arith.constant dense<0.000000e+00> : vector<2x128xf32>
    %1011 = tpu.matmul %1009, %1010, %cst_573 {dimension_numbers = #tpu.dot_dimension_numbers<[1], [0], [0], [1], [0, 0, 1, 1], [], []>} : vector<2x32xf32>, vector<32x128xf32>, vector<2x128xf32> -> vector<2x128xf32>
    %1012 = arith.addf %1008, %1011 : vector<2x128xf32>
    %c0_574 = arith.constant 0 : index
    %c0_575 = arith.constant 0 : index
    %1013 = vector.load %arg24[%c0_574, %c0_575] : memref<2x32xf32, #tpu.memory_space<vmem>>, vector<2x32xf32>
    %1014 = vector.extract_strided_slice %1012 {offsets = [0, 0], sizes = [2, 32], strides = [1, 1]} : vector<2x128xf32> to vector<2x32xf32>
    %1015 = arith.negf %1014 : vector<2x32xf32>
    %1016 = math.exp %1015 : vector<2x32xf32>
    %cst_576 = arith.constant 1.000000e+00 : f32
    %1017 = vector.broadcast %cst_576 : f32 to vector<2x32xf32>
    %1018 = arith.addf %1017, %1016 : vector<2x32xf32>
    %1019 = arith.divf %1017, %1018 : vector<2x32xf32>
    %1020 = vector.extract_strided_slice %1012 {offsets = [0, 32], sizes = [2, 32], strides = [1, 1]} : vector<2x128xf32> to vector<2x32xf32>
    %1021 = arith.negf %1020 : vector<2x32xf32>
    %1022 = math.exp %1021 : vector<2x32xf32>
    %cst_577 = arith.constant 1.000000e+00 : f32
    %1023 = vector.broadcast %cst_577 : f32 to vector<2x32xf32>
    %1024 = arith.addf %1023, %1022 : vector<2x32xf32>
    %1025 = arith.divf %1023, %1024 : vector<2x32xf32>
    %1026 = vector.extract_strided_slice %1012 {offsets = [0, 64], sizes = [2, 32], strides = [1, 1]} : vector<2x128xf32> to vector<2x32xf32>
    %1027 = math.tanh %1026 : vector<2x32xf32>
    %1028 = vector.extract_strided_slice %1012 {offsets = [0, 96], sizes = [2, 32], strides = [1, 1]} : vector<2x128xf32> to vector<2x32xf32>
    %1029 = arith.negf %1028 : vector<2x32xf32>
    %1030 = math.exp %1029 : vector<2x32xf32>
    %cst_578 = arith.constant 1.000000e+00 : f32
    %1031 = vector.broadcast %cst_578 : f32 to vector<2x32xf32>
    %1032 = arith.addf %1031, %1030 : vector<2x32xf32>
    %1033 = arith.divf %1031, %1032 : vector<2x32xf32>
    %1034 = arith.mulf %1025, %1013 : vector<2x32xf32>
    %1035 = arith.mulf %1019, %1027 : vector<2x32xf32>
    %1036 = arith.addf %1034, %1035 : vector<2x32xf32>
    %1037 = math.tanh %1036 : vector<2x32xf32>
    %1038 = arith.mulf %1033, %1037 : vector<2x32xf32>
    %c0_579 = arith.constant 0 : index
    %c0_580 = arith.constant 0 : index
    %1039 = vector.load %arg23[%c0_579, %c0_580] : memref<2x32xf32, #tpu.memory_space<vmem>>, vector<2x32xf32>
    tpu.vector_store %arg23[%c0_579, %c0_580], %1038 {strides = array<i32>} : memref<2x32xf32, #tpu.memory_space<vmem>>, vector<2x32xf32>,
    %c0_581 = arith.constant 0 : index
    %c0_582 = arith.constant 0 : index
    %1040 = vector.load %arg24[%c0_581, %c0_582] : memref<2x32xf32, #tpu.memory_space<vmem>>, vector<2x32xf32>
    tpu.vector_store %arg24[%c0_581, %c0_582], %1036 {strides = array<i32>} : memref<2x32xf32, #tpu.memory_space<vmem>>, vector<2x32xf32>,
    %c12_583 = arith.constant 12 : index
    %c0_584 = arith.constant 0 : index
    %1041 = vector.load %arg19[%c12_583, %c0_584] : memref<16x32xf32, #tpu.memory_space<vmem>>, vector<2x32xf32>
    tpu.vector_store %arg19[%c12_583, %c0_584], %1038 {strides = array<i32>} : memref<16x32xf32, #tpu.memory_space<vmem>>, vector<2x32xf32>,
    %c2_585 = arith.constant 2 : index
    %c0_586 = arith.constant 0 : index
    %1042 = vector.load %arg22[%c2_585, %c0_586] : memref<16x128xf32, #tpu.memory_space<vmem>>, vector<2x128xf32>
    %c0_587 = arith.constant 0 : index
    %c0_588 = arith.constant 0 : index
    %1043 = vector.load %arg25[%c0_587, %c0_588] : memref<2x32xf32, #tpu.memory_space<vmem>>, vector<2x32xf32>
    %c0_589 = arith.constant 0 : index
    %c0_590 = arith.constant 0 : index
    %1044 = vector.load %arg13[%c0_589, %c0_590] : memref<32x128xf32, #tpu.memory_space<vmem>>, vector<32x128xf32>
    %cst_591 = arith.constant dense<0.000000e+00> : vector<2x128xf32>
    %1045 = tpu.matmul %1043, %1044, %cst_591 {dimension_numbers = #tpu.dot_dimension_numbers<[1], [0], [0], [1], [0, 0, 1, 1], [], []>} : vector<2x32xf32>, vector<32x128xf32>, vector<2x128xf32> -> vector<2x128xf32>
    %1046 = arith.addf %1042, %1045 : vector<2x128xf32>
    %c0_592 = arith.constant 0 : index
    %c0_593 = arith.constant 0 : index
    %1047 = vector.load %arg26[%c0_592, %c0_593] : memref<2x32xf32, #tpu.memory_space<vmem>>, vector<2x32xf32>
    %1048 = vector.extract_strided_slice %1046 {offsets = [0, 0], sizes = [2, 32], strides = [1, 1]} : vector<2x128xf32> to vector<2x32xf32>
    %1049 = arith.negf %1048 : vector<2x32xf32>
    %1050 = math.exp %1049 : vector<2x32xf32>
    %cst_594 = arith.constant 1.000000e+00 : f32
    %1051 = vector.broadcast %cst_594 : f32 to vector<2x32xf32>
    %1052 = arith.addf %1051, %1050 : vector<2x32xf32>
    %1053 = arith.divf %1051, %1052 : vector<2x32xf32>
    %1054 = vector.extract_strided_slice %1046 {offsets = [0, 32], sizes = [2, 32], strides = [1, 1]} : vector<2x128xf32> to vector<2x32xf32>
    %1055 = arith.negf %1054 : vector<2x32xf32>
    %1056 = math.exp %1055 : vector<2x32xf32>
    %cst_595 = arith.constant 1.000000e+00 : f32
    %1057 = vector.broadcast %cst_595 : f32 to vector<2x32xf32>
    %1058 = arith.addf %1057, %1056 : vector<2x32xf32>
    %1059 = arith.divf %1057, %1058 : vector<2x32xf32>
    %1060 = vector.extract_strided_slice %1046 {offsets = [0, 64], sizes = [2, 32], strides = [1, 1]} : vector<2x128xf32> to vector<2x32xf32>
    %1061 = math.tanh %1060 : vector<2x32xf32>
    %1062 = vector.extract_strided_slice %1046 {offsets = [0, 96], sizes = [2, 32], strides = [1, 1]} : vector<2x128xf32> to vector<2x32xf32>
    %1063 = arith.negf %1062 : vector<2x32xf32>
    %1064 = math.exp %1063 : vector<2x32xf32>
    %cst_596 = arith.constant 1.000000e+00 : f32
    %1065 = vector.broadcast %cst_596 : f32 to vector<2x32xf32>
    %1066 = arith.addf %1065, %1064 : vector<2x32xf32>
    %1067 = arith.divf %1065, %1066 : vector<2x32xf32>
    %1068 = arith.mulf %1059, %1047 : vector<2x32xf32>
    %1069 = arith.mulf %1053, %1061 : vector<2x32xf32>
    %1070 = arith.addf %1068, %1069 : vector<2x32xf32>
    %1071 = math.tanh %1070 : vector<2x32xf32>
    %1072 = arith.mulf %1067, %1071 : vector<2x32xf32>
    %c0_597 = arith.constant 0 : index
    %c0_598 = arith.constant 0 : index
    %1073 = vector.load %arg25[%c0_597, %c0_598] : memref<2x32xf32, #tpu.memory_space<vmem>>, vector<2x32xf32>
    tpu.vector_store %arg25[%c0_597, %c0_598], %1072 {strides = array<i32>} : memref<2x32xf32, #tpu.memory_space<vmem>>, vector<2x32xf32>,
    %c0_599 = arith.constant 0 : index
    %c0_600 = arith.constant 0 : index
    %1074 = vector.load %arg26[%c0_599, %c0_600] : memref<2x32xf32, #tpu.memory_space<vmem>>, vector<2x32xf32>
    tpu.vector_store %arg26[%c0_599, %c0_600], %1070 {strides = array<i32>} : memref<2x32xf32, #tpu.memory_space<vmem>>, vector<2x32xf32>,
    %c2_601 = arith.constant 2 : index
    %c0_602 = arith.constant 0 : index
    %1075 = vector.load %arg20[%c2_601, %c0_602] : memref<16x32xf32, #tpu.memory_space<vmem>>, vector<2x32xf32>
    tpu.vector_store %arg20[%c2_601, %c0_602], %1072 {strides = array<i32>} : memref<16x32xf32, #tpu.memory_space<vmem>>, vector<2x32xf32>,
    %c14_603 = arith.constant 14 : index
    %c0_604 = arith.constant 0 : index
    %1076 = vector.load %arg21[%c14_603, %c0_604] : memref<16x128xf32, #tpu.memory_space<vmem>>, vector<2x128xf32>
    %c0_605 = arith.constant 0 : index
    %c0_606 = arith.constant 0 : index
    %1077 = vector.load %arg23[%c0_605, %c0_606] : memref<2x32xf32, #tpu.memory_space<vmem>>, vector<2x32xf32>
    %c0_607 = arith.constant 0 : index
    %c0_608 = arith.constant 0 : index
    %1078 = vector.load %arg10[%c0_607, %c0_608] : memref<32x128xf32, #tpu.memory_space<vmem>>, vector<32x128xf32>
    %cst_609 = arith.constant dense<0.000000e+00> : vector<2x128xf32>
    %1079 = tpu.matmul %1077, %1078, %cst_609 {dimension_numbers = #tpu.dot_dimension_numbers<[1], [0], [0], [1], [0, 0, 1, 1], [], []>} : vector<2x32xf32>, vector<32x128xf32>, vector<2x128xf32> -> vector<2x128xf32>
    %1080 = arith.addf %1076, %1079 : vector<2x128xf32>
    %c0_610 = arith.constant 0 : index
    %c0_611 = arith.constant 0 : index
    %1081 = vector.load %arg24[%c0_610, %c0_611] : memref<2x32xf32, #tpu.memory_space<vmem>>, vector<2x32xf32>
    %1082 = vector.extract_strided_slice %1080 {offsets = [0, 0], sizes = [2, 32], strides = [1, 1]} : vector<2x128xf32> to vector<2x32xf32>
    %1083 = arith.negf %1082 : vector<2x32xf32>
    %1084 = math.exp %1083 : vector<2x32xf32>
    %cst_612 = arith.constant 1.000000e+00 : f32
    %1085 = vector.broadcast %cst_612 : f32 to vector<2x32xf32>
    %1086 = arith.addf %1085, %1084 : vector<2x32xf32>
    %1087 = arith.divf %1085, %1086 : vector<2x32xf32>
    %1088 = vector.extract_strided_slice %1080 {offsets = [0, 32], sizes = [2, 32], strides = [1, 1]} : vector<2x128xf32> to vector<2x32xf32>
    %1089 = arith.negf %1088 : vector<2x32xf32>
    %1090 = math.exp %1089 : vector<2x32xf32>
    %cst_613 = arith.constant 1.000000e+00 : f32
    %1091 = vector.broadcast %cst_613 : f32 to vector<2x32xf32>
    %1092 = arith.addf %1091, %1090 : vector<2x32xf32>
    %1093 = arith.divf %1091, %1092 : vector<2x32xf32>
    %1094 = vector.extract_strided_slice %1080 {offsets = [0, 64], sizes = [2, 32], strides = [1, 1]} : vector<2x128xf32> to vector<2x32xf32>
    %1095 = math.tanh %1094 : vector<2x32xf32>
    %1096 = vector.extract_strided_slice %1080 {offsets = [0, 96], sizes = [2, 32], strides = [1, 1]} : vector<2x128xf32> to vector<2x32xf32>
    %1097 = arith.negf %1096 : vector<2x32xf32>
    %1098 = math.exp %1097 : vector<2x32xf32>
    %cst_614 = arith.constant 1.000000e+00 : f32
    %1099 = vector.broadcast %cst_614 : f32 to vector<2x32xf32>
    %1100 = arith.addf %1099, %1098 : vector<2x32xf32>
    %1101 = arith.divf %1099, %1100 : vector<2x32xf32>
    %1102 = arith.mulf %1093, %1081 : vector<2x32xf32>
    %1103 = arith.mulf %1087, %1095 : vector<2x32xf32>
    %1104 = arith.addf %1102, %1103 : vector<2x32xf32>
    %1105 = math.tanh %1104 : vector<2x32xf32>
    %1106 = arith.mulf %1101, %1105 : vector<2x32xf32>
    %c0_615 = arith.constant 0 : index
    %c0_616 = arith.constant 0 : index
    %1107 = vector.load %arg23[%c0_615, %c0_616] : memref<2x32xf32, #tpu.memory_space<vmem>>, vector<2x32xf32>
    tpu.vector_store %arg23[%c0_615, %c0_616], %1106 {strides = array<i32>} : memref<2x32xf32, #tpu.memory_space<vmem>>, vector<2x32xf32>,
    %c0_617 = arith.constant 0 : index
    %c0_618 = arith.constant 0 : index
    %1108 = vector.load %arg24[%c0_617, %c0_618] : memref<2x32xf32, #tpu.memory_space<vmem>>, vector<2x32xf32>
    tpu.vector_store %arg24[%c0_617, %c0_618], %1104 {strides = array<i32>} : memref<2x32xf32, #tpu.memory_space<vmem>>, vector<2x32xf32>,
    %c14_619 = arith.constant 14 : index
    %c0_620 = arith.constant 0 : index
    %1109 = vector.load %arg19[%c14_619, %c0_620] : memref<16x32xf32, #tpu.memory_space<vmem>>, vector<2x32xf32>
    tpu.vector_store %arg19[%c14_619, %c0_620], %1106 {strides = array<i32>} : memref<16x32xf32, #tpu.memory_space<vmem>>, vector<2x32xf32>,
    %c0_621 = arith.constant 0 : index
    %c0_622 = arith.constant 0 : index
    %1110 = vector.load %arg22[%c0_621, %c0_622] : memref<16x128xf32, #tpu.memory_space<vmem>>, vector<2x128xf32>
    %c0_623 = arith.constant 0 : index
    %c0_624 = arith.constant 0 : index
    %1111 = vector.load %arg25[%c0_623, %c0_624] : memref<2x32xf32, #tpu.memory_space<vmem>>, vector<2x32xf32>
    %c0_625 = arith.constant 0 : index
    %c0_626 = arith.constant 0 : index
    %1112 = vector.load %arg13[%c0_625, %c0_626] : memref<32x128xf32, #tpu.memory_space<vmem>>, vector<32x128xf32>
    %cst_627 = arith.constant dense<0.000000e+00> : vector<2x128xf32>
    %1113 = tpu.matmul %1111, %1112, %cst_627 {dimension_numbers = #tpu.dot_dimension_numbers<[1], [0], [0], [1], [0, 0, 1, 1], [], []>} : vector<2x32xf32>, vector<32x128xf32>, vector<2x128xf32> -> vector<2x128xf32>
    %1114 = arith.addf %1110, %1113 : vector<2x128xf32>
    %c0_628 = arith.constant 0 : index
    %c0_629 = arith.constant 0 : index
    %1115 = vector.load %arg26[%c0_628, %c0_629] : memref<2x32xf32, #tpu.memory_space<vmem>>, vector<2x32xf32>
    %1116 = vector.extract_strided_slice %1114 {offsets = [0, 0], sizes = [2, 32], strides = [1, 1]} : vector<2x128xf32> to vector<2x32xf32>
    %1117 = arith.negf %1116 : vector<2x32xf32>
    %1118 = math.exp %1117 : vector<2x32xf32>
    %cst_630 = arith.constant 1.000000e+00 : f32
    %1119 = vector.broadcast %cst_630 : f32 to vector<2x32xf32>
    %1120 = arith.addf %1119, %1118 : vector<2x32xf32>
    %1121 = arith.divf %1119, %1120 : vector<2x32xf32>
    %1122 = vector.extract_strided_slice %1114 {offsets = [0, 32], sizes = [2, 32], strides = [1, 1]} : vector<2x128xf32> to vector<2x32xf32>
    %1123 = arith.negf %1122 : vector<2x32xf32>
    %1124 = math.exp %1123 : vector<2x32xf32>
    %cst_631 = arith.constant 1.000000e+00 : f32
    %1125 = vector.broadcast %cst_631 : f32 to vector<2x32xf32>
    %1126 = arith.addf %1125, %1124 : vector<2x32xf32>
    %1127 = arith.divf %1125, %1126 : vector<2x32xf32>
    %1128 = vector.extract_strided_slice %1114 {offsets = [0, 64], sizes = [2, 32], strides = [1, 1]} : vector<2x128xf32> to vector<2x32xf32>
    %1129 = math.tanh %1128 : vector<2x32xf32>
    %1130 = vector.extract_strided_slice %1114 {offsets = [0, 96], sizes = [2, 32], strides = [1, 1]} : vector<2x128xf32> to vector<2x32xf32>
    %1131 = arith.negf %1130 : vector<2x32xf32>
    %1132 = math.exp %1131 : vector<2x32xf32>
    %cst_632 = arith.constant 1.000000e+00 : f32
    %1133 = vector.broadcast %cst_632 : f32 to vector<2x32xf32>
    %1134 = arith.addf %1133, %1132 : vector<2x32xf32>
    %1135 = arith.divf %1133, %1134 : vector<2x32xf32>
    %1136 = arith.mulf %1127, %1115 : vector<2x32xf32>
    %1137 = arith.mulf %1121, %1129 : vector<2x32xf32>
    %1138 = arith.addf %1136, %1137 : vector<2x32xf32>
    %1139 = math.tanh %1138 : vector<2x32xf32>
    %1140 = arith.mulf %1135, %1139 : vector<2x32xf32>
    %c0_633 = arith.constant 0 : index
    %c0_634 = arith.constant 0 : index
    %1141 = vector.load %arg25[%c0_633, %c0_634] : memref<2x32xf32, #tpu.memory_space<vmem>>, vector<2x32xf32>
    tpu.vector_store %arg25[%c0_633, %c0_634], %1140 {strides = array<i32>} : memref<2x32xf32, #tpu.memory_space<vmem>>, vector<2x32xf32>,
    %c0_635 = arith.constant 0 : index
    %c0_636 = arith.constant 0 : index
    %1142 = vector.load %arg26[%c0_635, %c0_636] : memref<2x32xf32, #tpu.memory_space<vmem>>, vector<2x32xf32>
    tpu.vector_store %arg26[%c0_635, %c0_636], %1138 {strides = array<i32>} : memref<2x32xf32, #tpu.memory_space<vmem>>, vector<2x32xf32>,
    %c0_637 = arith.constant 0 : index
    %c0_638 = arith.constant 0 : index
    %1143 = vector.load %arg20[%c0_637, %c0_638] : memref<16x32xf32, #tpu.memory_space<vmem>>, vector<2x32xf32>
    tpu.vector_store %arg20[%c0_637, %c0_638], %1140 {strides = array<i32>} : memref<16x32xf32, #tpu.memory_space<vmem>>, vector<2x32xf32>,
    %c0_639 = arith.constant 0 : index
    %c0_640 = arith.constant 0 : index
    %1144 = vector.load %arg19[%c0_639, %c0_640] : memref<16x32xf32, #tpu.memory_space<vmem>>, vector<16x32xf32>
    %c0_641 = arith.constant 0 : index
    %c0_642 = arith.constant 0 : index
    %1145 = vector.load %arg15[%c0_641, %c0_642] : memref<64x1xf32, #tpu.memory_space<vmem>>, vector<32x1xf32>
    %cst_643 = arith.constant dense<0.000000e+00> : vector<16x1xf32>
    %1146 = tpu.matmul %1144, %1145, %cst_643 {dimension_numbers = #tpu.dot_dimension_numbers<[1], [0], [0], [1], [0, 0, 1, 1], [], []>} : vector<16x32xf32>, vector<32x1xf32>, vector<16x1xf32> -> vector<16x1xf32>
    %c0_644 = arith.constant 0 : index
    %c0_645 = arith.constant 0 : index
    %1147 = vector.load %arg20[%c0_644, %c0_645] : memref<16x32xf32, #tpu.memory_space<vmem>>, vector<16x32xf32>
    %c32_646 = arith.constant 32 : index
    %c0_647 = arith.constant 0 : index
    %1148 = vector.load %arg15[%c32_646, %c0_647] : memref<64x1xf32, #tpu.memory_space<vmem>>, vector<32x1xf32>
    %cst_648 = arith.constant dense<0.000000e+00> : vector<16x1xf32>
    %1149 = tpu.matmul %1147, %1148, %cst_648 {dimension_numbers = #tpu.dot_dimension_numbers<[1], [0], [0], [1], [0, 0, 1, 1], [], []>} : vector<16x32xf32>, vector<32x1xf32>, vector<16x1xf32> -> vector<16x1xf32>
    %1150 = arith.addf %1146, %1149 : vector<16x1xf32>
    %c0_649 = arith.constant 0 : index
    %c0_650 = arith.constant 0 : index
    %1151 = vector.load %arg16[%c0_649, %c0_650] : memref<1x1xf32, #tpu.memory_space<vmem>>, vector<1x1xf32>
    %1152 = vector.broadcast %1151 : vector<1x1xf32> to vector<16x1xf32>
    %1153 = arith.addf %1150, %1152 : vector<16x1xf32>
    %c0_651 = arith.constant 0 : index
    %c0_652 = arith.constant 0 : index
    %1154 = vector.load %arg17[%c0_651, %c0_652] : memref<16x1xf32, #tpu.memory_space<vmem>>, vector<16x1xf32>
    tpu.vector_store %arg17[%c0_651, %c0_652], %1153 {strides = array<i32>} : memref<16x1xf32, #tpu.memory_space<vmem>>, vector<16x1xf32>,
    return
  }
}

</mosaic_0001>

<bundles_post_ra>
// kernel: _lambda_.1
= control target key start
LH: loop header
LB: loop body
LE: loop exit
PB: predicated region body
PF: predicated region fallthrough
CT: control target
= control target key end

     0   :  { %s7192_s0 = inlined_call_operand.vmem [shape: f32[16,3], index: 0, kind: input, shape index: {}]   ;;  %s7193_s1 = inlined_call_operand.vmem [shape: f32[3,32], index: 1, kind: input, shape index: {}]   ;;  %s7194_s2 = inlined_call_operand.vmem [shape: f32[1,32], index: 2, kind: input, shape index: {}]   ;;  %s7195_s3 = inlined_call_operand.vmem [shape: f32[32,128], index: 3, kind: input, shape index: {}]   ;;  %s7196_s4 = inlined_call_operand.vmem [shape: f32[32,128], index: 4, kind: input, shape index: {}]   ;;  %s7197_s5 = inlined_call_operand.vmem [shape: f32[1,128], index: 5, kind: input, shape index: {}]   ;;  %s7198_s6 = inlined_call_operand.hbm [shape: f32[32,128], index: 6, kind: input, shape index: {}]   ;;  %s7199_s7 = inlined_call_operand.hbm [shape: f32[32,128], index: 7, kind: input, shape index: {}]   ;;  %s7200_s8 = inlined_call_operand.hbm [shape: f32[1,128], index: 8, kind: input, shape index: {}]   ;;  %s7201_s9 = inlined_call_operand.vmem [shape: f32[64,128], index: 9, kind: input, shape index: {}]   ;;  %s7202_s10 = inlined_call_operand.hbm [shape: f32[32,128], index: 10, kind: input, shape index: {}]   ;;  %s7203_s11 = inlined_call_operand.hbm [shape: f32[1,128], index: 11, kind: input, shape index: {}]   ;;  %s7204_s12 = inlined_call_operand.hbm [shape: f32[64,128], index: 12, kind: input, shape index: {}]   ;;  %s7205_s13 = inlined_call_operand.hbm [shape: f32[32,128], index: 13, kind: input, shape index: {}]   ;;  %s7206_s14 = inlined_call_operand.hbm [shape: f32[1,128], index: 14, kind: input, shape index: {}]   ;;  %s7207_s15 = inlined_call_operand.vmem [shape: f32[64,1], index: 15, kind: input, shape index: {}]   ;;  %s7208_s16 = inlined_call_operand.<no memory space> [shape: f32[1,1], index: 16, kind: input, shape index: {}]   ;;  %s7209_s17 = inlined_call_operand.vmem [shape: f32[16,1], index: 17, kind: output, shape index: {}]  }
   0x1   :  { %7211 = sst [smem:[#allocation30_spill]] %s7192_s0  ;;  %v22_v0 = vstv %s7208_s16 }
   0x2   :  { %7212 = sst [smem:[#allocation31_spill]] %s7193_s1  ;;  %23 = vst [vmem:[#allocation11] sm:$0x1] %v22_v0 }
   0x3   :  { %24 = vsyncpa [#allocation13], 0 }
   0x4   :  { %25 = vsyncpa [#allocation15], 0 }
   0x5   :  { %26 = vsyncpa [#allocation18], 0 }
   0x6   :  { %27 = vsyncpa [#allocation21], 0 }
   0x7   :  { %28 = vsyncpa [#allocation24], 0  ;;  %s6307_s26 = smov [#allocation14]   ;;  %s6308_s28 = smov [#allocation17]  }
   0x8   :  { %s58_s27 = sshll.u32 %s6307_s26, 4  ;;  %s82_s29 = sshll.u32 %s6308_s28, 4  ;;  %s59_s27 = int_to_ptr.vmem [resolvable:$true] %s58_s27  ;;  %s6416_s29 = int_to_ptr.vmem [resolvable:$true] %s82_s29 }
   0x9   :  { %s6121_s18 = scalar_lea.hbm %s7199_s7, 512 }
   0xa   :  { %p6122_p0 = scmp.ne.s32.totalorder %s7199_s7, %s6121_s18  ;;  %p6125_p1 = scmp.lt.u32.totalorder %s6121_s18, %s7199_s7 }
   0xc   :  { %p6127_p2 = pnand %p6125_p1, %p6122_p0 }
   0xe   :  { %6130 = shalt.err (!%p6127_p2)
}
   0xf   :  { %s6131_s21 = scalar_lea.vmem %s59_s27, 512  ;;  %p6136_p4 = scmp.lt.s32.totalorder %s59_s27, %s59_s27 }
  0x10   :  { %p6132_p3 = scmp.ne.s32.totalorder %s59_s27, %s6131_s21  ;;  %p6137_p5 = scmp.lt.s32.totalorder %s6131_s21, %s6131_s21 }
  0x12   :  { %p6138_p6 = por %p6137_p5, %p6136_p4 }
  0x14   :  { %p6139_p7 = pnand %p6138_p6, %p6132_p3 }
  0x16   :  { %6142 = shalt.err (!%p6139_p7)
}
  0x17   :  { %s6309_s22 = smov 128   ;;  %s6310_s23 = smov 8  }
  0x18   :  { %64 = dma.hbm_to_vmem [thread:$0]  %s7199_s7, 512, %s59_s27, [#allocation15], %s6309_s22, %s6309_s22, %s6310_s23  }
  0x19   :  { %s6143_s0 = scalar_lea.hbm %s7202_s10, 512 }
  0x1a   :  { %p6144_p8 = scmp.ne.s32.totalorder %s7202_s10, %s6143_s0  ;;  %p6147_p9 = scmp.lt.u32.totalorder %s6143_s0, %s7202_s10 }
  0x1c   :  { %p6149_p10 = pnand %p6147_p9, %p6144_p8 }
  0x1e   :  { %6152 = shalt.err (!%p6149_p10)
}
  0x1f   :  { %s6153_s16 = scalar_lea.vmem %s6416_s29, 512  ;;  %p6158_p12 = scmp.lt.s32.totalorder %s6416_s29, %s6416_s29 }
  0x20   :  { %p6154_p11 = scmp.ne.s32.totalorder %s6416_s29, %s6153_s16  ;;  %p6159_p13 = scmp.lt.s32.totalorder %s6153_s16, %s6153_s16 }
  0x22   :  { %p6160_p0 = por %p6159_p13, %p6158_p12 }
  0x24   :  { %p6161_p1 = pnand %p6160_p0, %p6154_p11 }
  0x26   :  { %6164 = shalt.err (!%p6161_p1)
}
  0x27   :  { %88 = dma.hbm_to_vmem [thread:$0]  %s7202_s10, 512, %s6416_s29, [#allocation18], %s6309_s22, %s6309_s22, %s6310_s23  }
  0x28   :  { %s6311_s20 = smov [#allocation20]   ;;  %s6312_s24 = smov [#allocation12]  }
  0x29   :  { %s104_s21 = sshll.u32 %s6311_s20, 4  ;;  %s46_s25 = sshll.u32 %s6312_s24, 4  ;;  %s105_s21 = int_to_ptr.vmem [resolvable:$true] %s104_s21  ;;  %s6453_s25 = int_to_ptr.vmem [resolvable:$true] %s46_s25 }
  0x2a   :  { %s6165_s0 = scalar_lea.hbm %s7204_s12, 1024 }
  0x2b   :  { %p6166_p2 = scmp.ne.s32.totalorder %s7204_s12, %s6165_s0  ;;  %p6169_p3 = scmp.lt.u32.totalorder %s6165_s0, %s7204_s12 }
  0x2d   :  { %p6171_p4 = pnand %p6169_p3, %p6166_p2 }
  0x2f   :  { %6174 = shalt.err (!%p6171_p4)
}
  0x30   :  { %s6175_s10 = scalar_lea.vmem %s105_s21, 1024  ;;  %p6180_p6 = scmp.lt.s32.totalorder %s105_s21, %s105_s21 }
  0x31   :  { %p6176_p5 = scmp.ne.s32.totalorder %s105_s21, %s6175_s10  ;;  %p6181_p7 = scmp.lt.s32.totalorder %s6175_s10, %s6175_s10 }
  0x33   :  { %p6182_p8 = por %p6181_p7, %p6180_p6 }
  0x35   :  { %p6183_p9 = pnand %p6182_p8, %p6176_p5 }
  0x37   :  { %6186 = shalt.err (!%p6183_p9)
}
  0x38   :  { %110 = dma.hbm_to_vmem [thread:$0]  %s7204_s12, 1024, %s105_s21, [#allocation21], %s6309_s22, %s6309_s22, %s6310_s23  }
  0x39   :  { %s6187_s20 = scalar_lea.hbm %s7198_s6, 512 }
  0x3a   :  { %p6188_p10 = scmp.ne.s32.totalorder %s7198_s6, %s6187_s20  ;;  %p6191_p11 = scmp.lt.u32.totalorder %s6187_s20, %s7198_s6 }
  0x3c   :  { %p6193_p12 = pnand %p6191_p11, %p6188_p10 }
  0x3e   :  { %6196 = shalt.err (!%p6193_p12)
}
  0x3f   :  { %s6197_s30 = scalar_lea.vmem %s6453_s25, 512  ;;  %p6202_p0 = scmp.lt.s32.totalorder %s6453_s25, %s6453_s25 }
  0x40   :  { %p6198_p13 = scmp.ne.s32.totalorder %s6453_s25, %s6197_s30  ;;  %p6203_p1 = scmp.lt.s32.totalorder %s6197_s30, %s6197_s30 }
  0x42   :  { %p6204_p2 = por %p6203_p1, %p6202_p0 }
  0x44   :  { %p6205_p3 = pnand %p6204_p2, %p6198_p13 }
  0x46   :  { %6208 = shalt.err (!%p6205_p3)
}
  0x47   :  { %52 = dma.hbm_to_vmem [thread:$0]  %s7198_s6, 512, %s6453_s25, [#allocation13], %s6309_s22, %s6309_s22, %s6310_s23  }
  0x48   :  { %s6313_s18 = smov [#allocation16]   ;;  %s6314_s1 = smov [#allocation19]  }
  0x49   :  { %s71_s19 = sshll.u32 %s6313_s18, 4  ;;  %s95_s10 = sshll.u32 %s6314_s1, 4  ;;  %s72_s19 = int_to_ptr.vmem [resolvable:$true] %s71_s19  ;;  %s96_s10 = int_to_ptr.vmem [resolvable:$true] %s95_s10 }
  0x4a   :  { %s6209_s7 = scalar_lea.hbm %s7200_s8, 16 }
  0x4b   :  { %p6210_p4 = scmp.ne.s32.totalorder %s7200_s8, %s6209_s7  ;;  %p6213_p5 = scmp.lt.u32.totalorder %s6209_s7, %s7200_s8 }
  0x4d   :  { %p6215_p6 = pnand %p6213_p5, %p6210_p4 }
  0x4f   :  { %6218 = shalt.err (!%p6215_p6)
}
  0x50   :  { %s6219_s6 = scalar_lea.vmem %s72_s19, 16  ;;  %s6223_s25 = scalar_lea.vmem %s72_s19, 32 }
  0x51   :  { %p6220_p7 = scmp.ne.s32.totalorder %s72_s19, %s6219_s6  ;;  %p6224_p8 = scmp.lt.s32.totalorder %s72_s19, %s72_s19 }
  0x52   :  { %p6225_p9 = scmp.lt.s32.totalorder %s6223_s25, %s6219_s6 }
  0x54   :  { %p6226_p10 = por %p6225_p9, %p6224_p8 }
  0x56   :  { %p6227_p11 = pnand %p6226_p10, %p6220_p7 }
  0x58   :  { %6230 = shalt.err (!%p6227_p11)
}
  0x59   :  { %74 = dma.hbm_to_vmem [thread:$0]  %s7200_s8, 16, %s72_s19, [#allocation15]  }
  0x5a   :  { %s6231_s21 = scalar_lea.hbm %s7203_s11, 16 }
  0x5b   :  { %p6232_p12 = scmp.ne.s32.totalorder %s7203_s11, %s6231_s21  ;;  %p6235_p13 = scmp.lt.u32.totalorder %s6231_s21, %s7203_s11 }
  0x5d   :  { %p6237_p0 = pnand %p6235_p13, %p6232_p12 }
  0x5f   :  { %6240 = shalt.err (!%p6237_p0)
}
  0x60   :  { %s6241_s7 = scalar_lea.vmem %s96_s10, 16  ;;  %s6245_s27 = scalar_lea.vmem %s96_s10, 32 }
  0x61   :  { %p6242_p1 = scmp.ne.s32.totalorder %s96_s10, %s6241_s7  ;;  %p6246_p2 = scmp.lt.s32.totalorder %s96_s10, %s96_s10 }
  0x62   :  { %p6247_p3 = scmp.lt.s32.totalorder %s6245_s27, %s6241_s7 }
  0x64   :  { %p6248_p4 = por %p6247_p3, %p6246_p2 }
  0x66   :  { %p6249_p5 = pnand %p6248_p4, %p6242_p1 }
  0x68   :  { %6252 = shalt.err (!%p6249_p5)
}
  0x69   :  { %98 = dma.hbm_to_vmem [thread:$0]  %s7203_s11, 16, %s96_s10, [#allocation18]  }
  0x6a   :  { %s6315_s20 = smov [#allocation22]   ;;  %s6316_s26 = smov [#allocation23]  }
  0x6b   :  { %s116_s24 = sshll.u32 %s6315_s20, 4  ;;  %s129_s6 = sshll.u32 %s6316_s26, 4  ;;  %s117_s24 = int_to_ptr.vmem [resolvable:$true] %s116_s24  ;;  %s130_s6 = int_to_ptr.vmem [resolvable:$true] %s129_s6 }
  0x6c   :  { %s6253_s0 = scalar_lea.hbm %s7205_s13, 512 }
  0x6d   :  { %p6254_p6 = scmp.ne.s32.totalorder %s7205_s13, %s6253_s0  ;;  %p6257_p7 = scmp.lt.u32.totalorder %s6253_s0, %s7205_s13 }
  0x6f   :  { %p6259_p8 = pnand %p6257_p7, %p6254_p6 }
  0x71   :  { %6262 = shalt.err (!%p6259_p8)
}
  0x72   :  { %s6263_s11 = scalar_lea.vmem %s117_s24, 512  ;;  %p6268_p10 = scmp.lt.s32.totalorder %s117_s24, %s117_s24 }
  0x73   :  { %p6264_p9 = scmp.ne.s32.totalorder %s117_s24, %s6263_s11  ;;  %p6269_p11 = scmp.lt.s32.totalorder %s6263_s11, %s6263_s11 }
  0x75   :  { %p6270_p12 = por %p6269_p11, %p6268_p10 }
  0x77   :  { %p6271_p13 = pnand %p6270_p12, %p6264_p9 }
  0x79   :  { %6274 = shalt.err (!%p6271_p13)
}
  0x7a   :  { %122 = dma.hbm_to_vmem [thread:$0]  %s7205_s13, 512, %s117_s24, [#allocation21], %s6309_s22, %s6309_s22, %s6310_s23  }
  0x7b   :  { %s6275_s7 = scalar_lea.hbm %s7206_s14, 16 }
  0x7c   :  { %p6276_p0 = scmp.ne.s32.totalorder %s7206_s14, %s6275_s7  ;;  %p6279_p1 = scmp.lt.u32.totalorder %s6275_s7, %s7206_s14 }
  0x7e   :  { %p6281_p2 = pnand %p6279_p1, %p6276_p0 }
  0x80   :  { %6284 = shalt.err (!%p6281_p2)
}
  0x81   :  { %s6285_s26 = scalar_lea.vmem %s130_s6, 16  ;;  %s6289_s25 = scalar_lea.vmem %s130_s6, 32 }
  0x82   :  { %p6286_p3 = scmp.ne.s32.totalorder %s130_s6, %s6285_s26  ;;  %p6290_p4 = scmp.lt.s32.totalorder %s130_s6, %s130_s6 }
  0x83   :  { %p6291_p5 = scmp.lt.s32.totalorder %s6289_s25, %s6285_s26 }
  0x85   :  { %p6292_p6 = por %p6291_p5, %p6290_p4 }
  0x87   :  { %p6293_p7 = pnand %p6292_p6, %p6286_p3 }
  0x89   :  { %6296 = shalt.err (!%p6293_p7)
}
  0x8a   :  { %132 = dma.hbm_to_vmem [thread:$0]  %s7206_s14, 16, %s130_s6, [#allocation24]  }
  0x8b   :  { %6297 = dma.done.wait [#allocation13], 512  }
  0x8c   :  { %6298 = vsyncadd [#allocation13], 4294966784 }
  0x8d   :  { %6299 = dma.done.wait [#allocation15], 528  }
  0x8e   :  { %6300 = vsyncadd [#allocation15], 4294966768 }
  0x8f   :  { %6301 = dma.done.wait [#allocation18], 528  }
  0x90   :  { %6302 = vsyncadd [#allocation18], 4294966768 }
  0x91   :  { %6303 = dma.done.wait [#allocation21], 1536  }
  0x92   :  { %6304 = vsyncadd [#allocation21], 4294965760 }
  0x93   :  { %6305 = dma.done.wait [#allocation24], 16  }
  0x94   :  { %6306 = vsyncadd [#allocation24], 4294967280  ;;  %vm178_vm0 = vcmask 1042432   ;;  %vm171_vm1 = vcmask 23552   ;;  %s7213_s28 = sld [smem:[#allocation31_spill]]  ;;  %s7214_s12 = sld [smem:[#allocation30_spill]] }
  0x95   :  { %v262_v4 = vld [vmem:[%s7195_s3] sm:$0xff]  ;;  %v263_v5 = vld [vmem:[%s7195_s3 + $0x8] sm:$0xff]  ;;  %v264_v7 = vld [vmem:[%s7195_s3 + $0x10] sm:$0xff]  ;;  %v6317_v15 = vmov 0.0|0.0   ;;  %vm444_vm2 = vcmask 254976   ;;  %v6318_v17 = vmov 0.0  }
  0x96   :  { %v5587_v6 = vpack.c.bf16 %v263_v5, %v262_v4  ;;  %v265_v8 = vld [vmem:[%s7195_s3 + $0x18] sm:$0xff]  ;;  %v357_v11 = vld [vmem:[#allocation12 + $0x8] sm:$0xff]  ;;  %5603 = vmatprep.subr.bf16.mxu1 %v6317_v15  ;;  %445 = vst.msk [vmem:[#allocation7] sm:$0x3] %vm444_vm2, %v6318_v17  ;;  %446 = vst.msk [vmem:[#allocation8] sm:$0x3] %vm444_vm2, %v6318_v17 }
  0x97   :  { %v5591_v9 = vpack.c.bf16 %v265_v8, %v264_v7  ;;  %v356_v10 = vld [vmem:[#allocation12] sm:$0xff]  ;;  %v452_v14 = vld [vmem:[%s7196_s4 + $0x8] sm:$0xff]  ;;  %447 = vst.msk [vmem:[#allocation9] sm:$0x3] %vm444_vm2, %v6318_v17  ;;  %448 = vst.msk [vmem:[#allocation10] sm:$0x3] %vm444_vm2, %v6318_v17 }
  0x98   :  { %v5595_v12 = vpack.c.bf16 %v357_v11, %v356_v10  ;;  %v451_v13 = vld [vmem:[%s7196_s4] sm:$0xff]  ;;  %v453_v18 = vld [vmem:[%s7196_s4 + $0x10] sm:$0xff]  ;;  %v454_v19 = vld [vmem:[%s7196_s4 + $0x18] sm:$0xff]  ;;  %vm6319_vm3 = vmmov 0   ;;  %vm257_vm4 = vcmask 261120   ;;  %s6320_s22 = smov 32  }
  0x99   :  { %v6569_v16 = vpack.c.bf16 %v452_v14, %v451_v13  ;;  %v6587_v20 = vpack.c.bf16 %v454_v19, %v453_v18  ;;  %5177 = vmatprep.mubr.msk.f32.mxu1 %vm6319_vm3, %v6318_v17  ;;  %v4842_v23 = vld [vmem:[%s7194_s2] ss:$0 sm:$0xff]  ;;  %v358_v28 = vld [vmem:[#allocation12 + $0x10] sm:$0xff]  ;;  %v359_v29 = vld [vmem:[#allocation12 + $0x18] sm:$0xff]  ;;  %s6322_s0 = smov 96   ;;  %vm4830_vm5 = vcmask 7168  }
  0x9a   :  { %v163_v1 = vld [vmem:[%s7213_s28] sm:$0x7]  ;;  %v162_v3 = vld [vmem:[%s7214_s12 + $0x8] sm:$0xff]  ;;  %v5599_v31 = vpack.c.bf16 %v359_v29, %v358_v28  ;;  %v574_v37 = vld [vmem:[#allocation14 + $0x18] sm:$0xff] }
  0x9b   :  { %v161_v2 = vld [vmem:[%s7214_s12] sm:$0xff]  ;;  %5142 = vmatprep.subr.msk.mxu0 %vm178_vm0, %v163_v1  ;;  %5605 = vmatpush3.bf16.msra.mxu1 %v6569_v16  ;;  %v573_v36 = vld [vmem:[#allocation14 + $0x10] sm:$0xff]  ;;  %v4849_v47 = vld [vmem:[#allocation16] ss:$0 sm:$0xff] }
  0x9c   :  { %5144 = vmatprep.mubr.msk.f32.mxu0 %vm171_vm1, %v161_v2  ;;  %5143 = vmatpush3.msk.msra.mxu0 %vm178_vm0, %v163_v1  ;;  %v571_v33 = vld [vmem:[#allocation14] sm:$0xff]  ;;  %v572_v34 = vld [vmem:[#allocation14 + $0x8] sm:$0xff]  ;;  %v6614_v38 = vpack.c.bf16 %v574_v37, %v573_v36 }
  0x9d   :  { %5145 = vmatmul.mubr.msk.f32.vlgmr.msra.gmra.mrb[0].mxu0 %vm171_vm1, %v162_v3  ;;  %5588 = vmatprep.subr.bf16.mxu0 %v5587_v6  ;;  %v450_v21 = vld [vmem:[#allocation7] sm:$0x3]  ;;  %v6609_v35 = vpack.c.bf16 %v572_v34, %v571_v33  ;;  %v4846_v42 = vld [vmem:[%s7197_s5] ss:$0 sm:$0xff]  ;;  %s6321_s5 = smov 64  }
  0x9e   :  { %5590 = vmatpush3.bf16.msra.mxu0 %v5587_v6  ;;  %5606 = vmatprep.subr.bf16.mxu1 %v6317_v15  ;;  %v649_v22 = vld [vmem:[#allocation10] sm:$0x3]  ;;  %v570_v39 = vld [vmem:[#allocation9] sm:$0x3]  ;;  %v529_v60 = vld [vmem:[#allocation8] sm:$0x3] }
  0x9f   :  { %5592 = vmatprep.subr.bf16.mxu0 %v5591_v9  ;;  %5608 = vmatpush3.bf16.msra.mxu1 %v6587_v20 }
  0xa0   :  { %5615 = vmatprep.subr.bf16.mxu1 %v6317_v15  ;;  %658 = vrot.lane.b32.xlu1 %v649_v22, %s6320_s22 }
  0xa2   :  { %5594 = vmatpush3.bf16.msra.mxu0 %v5591_v9  ;;  %5178 = vmatmul.mubr.msk.f32.vlgmr.msra.gmra.mrb[0].mxu1 %vm257_vm4, %v450_v21 }
  0xa3   :  { %5596 = vmatprep.subr.bf16.mxu0 %v5595_v12  ;;  %5617 = vmatpush3.bf16.msra.mxu1 %v6569_v16 }
  0xa4   :  { %5199 = vmatprep.mubr.msk.f32.mxu1 %vm6319_vm3, %v6318_v17  ;;  %5618 = vmatprep.subr.bf16.mxu1 %v6317_v15 }
  0xa7   :  { %5620 = vmatpush3.bf16.msra.mxu1 %v6587_v20 }
  0xa8   :  { %5627 = vmatprep.subr.bf16.mxu1 %v6317_v15 }
 0x112   :  { %v659_v9 = vpop.permute.xlu1 %658 }
 0x170   :  { %v5146_v24 = vpop.f32.mrb[0].mxu0 }
 0x171   :  { %v254_v25 = vadd.f32 %v5146_v24, %v4842_v23  ;;  %v248_v26 = vpop.f32.mrb[1].mxu0 }
 0x172   :  { %v249_v27 = vadd.f32 %v4842_v23, %v248_v26 }
 0x173   :  { %259 = vst.msk [vmem:[#allocation2 + $0x8] sm:$0xff] %vm257_vm4, %v254_v25 }
 0x174   :  { %258 = vst.msk [vmem:[#allocation2] sm:$0xff] %vm257_vm4, %v249_v27 }
 0x175   :  { %v524_v40 = vpop.f32.mrb[0].mxu1 }
 0x176   :  { %v5179_v41 = vpop.f32.mrb[1].mxu1 }
 0x17a   :  { %v261_v32 = vld [vmem:[#allocation2 + $0x8] sm:$0xff] }
 0x17b   :  { %v260_v30 = vld [vmem:[#allocation2] sm:$0xff] }
 0x17c   :  { %5155 = vmatprep.mubr.msk.f32.mxu0 %vm257_vm4, %v260_v30 }
 0x17d   :  { %5156 = vmatmul.mubr.msk.f32.vlgmr.msra.gmra.mrb[2].mxu0 %vm257_vm4, %v261_v32 }
 0x17e   :  { %5598 = vmatpush3.bf16.msra.mxu0 %v5595_v12  ;;  %5166 = vmatprep.mubr.msk.f32.mxu0 %vm257_vm4, %v260_v30 }
 0x17f   :  { %5600 = vmatprep.subr.bf16.mxu0 %v5599_v31 }
 0x182   :  { %5602 = vmatpush3.bf16.msra.mxu0 %v5599_v31 }
 0x183   :  { %5609 = vmatprep.subr.bf16.mxu0 %v6317_v15 }
 0x185   :  { %5167 = vmatmul.mubr.msk.f32.vlgmr.msra.gmra.mrb[4].mxu0 %vm257_vm4, %v261_v32 }
 0x186   :  { %5611 = vmatpush3.bf16.msra.mxu0 %v6609_v35  ;;  %5188 = vmatprep.mubr.msk.f32.mxu0 %vm6319_vm3, %v6318_v17 }
 0x187   :  { %5612 = vmatprep.subr.bf16.mxu0 %v6317_v15 }
 0x18a   :  { %5614 = vmatpush3.bf16.msra.mxu0 %v6614_v38 }
 0x18b   :  { %5621 = vmatprep.subr.bf16.mxu0 %v6317_v15 }
 0x18d   :  { %5189 = vmatmul.mubr.msk.f32.vlgmr.msra.gmra.mrb[6].mxu0 %vm257_vm4, %v570_v39 }
 0x18e   :  { %5623 = vmatpush3.bf16.msra.mxu0 %v6609_v35  ;;  %5210 = vmatprep.mubr.msk.f32.mxu0 %vm6319_vm3, %v6318_v17 }
 0x18f   :  { %5624 = vmatprep.subr.bf16.mxu0 %v6317_v15 }
 0x192   :  { %5626 = vmatpush3.bf16.msra.mxu0 %v6614_v38 }
 0x193   :  { %5633 = vmatprep.subr.bf16.mxu0 %v6317_v15 }
 0x250   :  { %v5157_v43 = vpop.f32.mrb[2].mxu0 }
 0x251   :  { %v351_v44 = vadd.f32 %v5157_v43, %v4846_v42  ;;  %v345_v45 = vpop.f32.mrb[3].mxu0 }
 0x252   :  { %v346_v46 = vadd.f32 %v4846_v42, %v345_v45 }
 0x253   :  { %355 = vst [vmem:[#allocation5 + $0x8] sm:$0xff] %v351_v44 }
 0x254   :  { %354 = vst [vmem:[#allocation5] sm:$0xff] %v346_v46 }
 0x258   :  { %v5168_v48 = vpop.f32.mrb[4].mxu0 }
 0x259   :  { %v439_v49 = vadd.f32 %v5168_v48, %v4849_v47  ;;  %v433_v50 = vpop.f32.mrb[5].mxu0 }
 0x25a   :  { %v434_v51 = vadd.f32 %v4849_v47, %v433_v50 }
 0x25b   :  { %443 = vst [vmem:[#allocation6 + $0x8] sm:$0xff] %v439_v49  ;;  %v449_v54 = vld [vmem:[#allocation5] sm:$0x3]  ;;  %v689_v41 = vld [vmem:[#allocation5 + $0x2] sm:$0x3] }
 0x25c   :  { %442 = vst [vmem:[#allocation6] sm:$0xff] %v434_v51  ;;  %v528_v57 = vadd.f32 %v524_v40, %v449_v54 }
 0x25e   :  { %v4853_v62 = vmul.f32 -1.442695, %v528_v57 }
 0x260   :  { %v644_v52 = vpop.f32.mrb[6].mxu0 }
 0x261   :  { %v5190_v53 = vpop.f32.mrb[7].mxu0 }
 0x262   :  { %v569_v55 = vld [vmem:[#allocation6 + $0xe] sm:$0x3]  ;;  %v809_v36 = vld [vmem:[#allocation6 + $0xc] sm:$0x3] }
 0x263   :  { %v648_v56 = vadd.f32 %v644_v52, %v569_v55 }
 0x265   :  { %5865 = vtanh.f32 %v648_v56  ;;  %v4855_v61 = vmul.f32 -1.442695, %v648_v56 }
 0x266   :  { %5867 = vtanh.f32 %v528_v57 }
 0x267   :  { %5869 = vpow2.f32 %v4855_v61 }
 0x268   :  { %5871 = vpow2.f32 %v4853_v62 }
 0x26f   :  { %v5866_v58 = vpop.eup %5865 }
 0x270   :  { %663 = vrot.lane.b32.xlu0 %v5866_v58, %s6321_s5  ;;  %v5868_v59 = vpop.eup %5867 }
 0x271   :  { %v5870_v63 = vpop.eup %5869 }
 0x272   :  { %v653_v0 = vadd.f32 1.0, %v5870_v63  ;;  %v5872_v1 = vpop.eup %5871 }
 0x273   :  { %v533_v2 = vadd.f32 1.0, %v5872_v1 }
 0x274   :  { %543 = vrot.lane.b32.xlu0 %v5868_v59, %s6321_s5  ;;  %5873 = vrcp.f32 %v653_v0 }
 0x275   :  { %5875 = vrcp.f32 %v533_v2 }
 0x278   :  { %538 = vrot.lane.b32.xlu0 %v529_v60, %s6320_s22 }
 0x27e   :  { %v5874_v3 = vpop.eup %5873 }
 0x27f   :  { %v5876_v6 = vpop.eup %5875  ;;  %v661_v10 = vmul.f32 %v5874_v3, %v659_v9 }
 0x2e2   :  { %v664_v4 = vpop.permute.xlu0 %663 }
 0x2e3   :  { %v666_v5 = vmul.f32 %v5874_v3, %v664_v4 }
 0x2e5   :  { %668 = vrot.lane.b32.xlu1 %v666_v5, %s6320_s22 }
 0x2e6   :  { %v544_v7 = vpop.permute.xlu0 %543 }
 0x2e7   :  { %v546_v8 = vmul.f32 %v5876_v6, %v544_v7 }
 0x2e9   :  { %548 = vrot.lane.b32.xlu1 %v546_v8, %s6320_s22 }
 0x2ea   :  { %v539_v11 = vpop.permute.xlu0 %538 }
 0x2eb   :  { %v541_v14 = vmul.f32 %v5876_v6, %v539_v11 }
 0x357   :  { %v669_v12 = vpop.permute.xlu1 %668 }
 0x358   :  { %v671_v13 = vadd.f32 %v669_v12, %v661_v10 }
 0x35a   :  { %5877 = vtanh.f32 %v671_v13 }
 0x35b   :  { %v549_v18 = vpop.permute.xlu1 %548 }
 0x35c   :  { %v551_v19 = vadd.f32 %v549_v18, %v541_v14 }
 0x35e   :  { %5879 = vtanh.f32 %v551_v19 }
 0x364   :  { %v5878_v21 = vpop.eup %5877 }
 0x365   :  { %674 = vrot.lane.b32.xlu0 %v5878_v21, %s6321_s5  ;;  %v1049_v21 = vld [vmem:[#allocation6 + $0xa] sm:$0x3] }
 0x368   :  { %v5880_v22 = vpop.eup %5879 }
 0x369   :  { %554 = vrot.lane.b32.xlu1 %v5880_v22, %s6321_s5 }
 0x3d7   :  { %v675_v23 = vpop.permute.xlu0 %674 }
 0x3d8   :  { %v677_v24 = vmul.f32 %v5874_v3, %v675_v23 }
 0x3da   :  { %679 = vrot.lane.b32.xlu0 %v677_v24, %s6320_s22 }
 0x3db   :  { %v555_v25 = vpop.permute.xlu1 %554 }
 0x3dc   :  { %v557_v26 = vmul.f32 %v5876_v6, %v555_v25  ;;  %v929_v25 = vld [vmem:[#allocation5 + $0x4] sm:$0x3] }
 0x3de   :  { %684 = vrot.lane.b32.xlu0 %v671_v13, %s6322_s0  ;;  %559 = vrot.lane.b32.xlu1 %v557_v26, %s6320_s22 }
 0x3e2   :  { %564 = vrot.lane.b32.xlu0 %v551_v19, %s6322_s0 }
 0x44c   :  { %v680_v27 = vpop.permute.xlu0 %679 }
 0x44d   :  { %682 = vst.msk [vmem:[#allocation9] sm:$0x3] %vm444_vm2, %v680_v27  ;;  %688 = vst.msk [vmem:[#allocation4 + $0xe] sm:$0x3] %vm444_vm2, %v680_v27 }
 0x450   :  { %v685_v28 = vpop.permute.xlu0 %684  ;;  %v560_v29 = vpop.permute.xlu1 %559 }
 0x451   :  { %687 = vst.msk [vmem:[#allocation10] sm:$0x3] %vm444_vm2, %v685_v28  ;;  %562 = vst.msk [vmem:[#allocation7] sm:$0x3] %vm444_vm2, %v560_v29 }
 0x452   :  { %568 = vst.msk [vmem:[#allocation3] sm:$0x3] %vm444_vm2, %v560_v29 }
 0x454   :  { %v810_v30 = vld [vmem:[#allocation9] sm:$0x3]  ;;  %v565_v31 = vpop.permute.xlu0 %564 }
 0x455   :  { %567 = vst.msk [vmem:[#allocation8] sm:$0x3] %vm444_vm2, %v565_v31  ;;  %5211 = vmatmul.mubr.msk.f32.vlgmr.msra.gmra.mrb[8].mxu0 %vm257_vm4, %v810_v30 }
 0x456   :  { %5635 = vmatpush3.bf16.msra.mxu0 %v6609_v35  ;;  %5232 = vmatprep.mubr.msk.f32.mxu0 %vm6319_vm3, %v6318_v17 }
 0x457   :  { %5636 = vmatprep.subr.bf16.mxu0 %v6317_v15 }
 0x458   :  { %v889_v32 = vld [vmem:[#allocation10] sm:$0x3]  ;;  %v690_v33 = vld [vmem:[#allocation7] sm:$0x3] }
 0x459   :  { %898 = vrot.lane.b32.xlu0 %v889_v32, %s6320_s22  ;;  %5200 = vmatmul.mubr.msk.f32.vlgmr.msra.gmra.mrb[2].mxu1 %vm257_vm4, %v690_v33 }
 0x45a   :  { %5629 = vmatpush3.bf16.msra.mxu1 %v6569_v16  ;;  %5638 = vmatpush3.bf16.msra.mxu0 %v6614_v38 }
 0x45b   :  { %5630 = vmatprep.subr.bf16.mxu1 %v6317_v15  ;;  %5221 = vmatprep.mubr.msk.f32.mxu1 %vm6319_vm3, %v6318_v17 }
 0x45c   :  { %v769_v34 = vld [vmem:[#allocation8] sm:$0x3]  ;;  %5645 = vmatprep.subr.bf16.mxu0 %v6317_v15 }
 0x45d   :  { %778 = vrot.lane.b32.xlu0 %v769_v34, %s6320_s22 }
 0x45e   :  { %5632 = vmatpush3.bf16.msra.mxu1 %v6587_v20 }
 0x45f   :  { %5639 = vmatprep.subr.bf16.mxu1 %v6317_v15 }
 0x4cb   :  { %v899_v59 = vpop.permute.xlu0 %898 }
 0x4cf   :  { %v779_v63 = vpop.permute.xlu0 %778 }
 0x528   :  { %v884_v37 = vpop.f32.mrb[8].mxu0 }
 0x529   :  { %v888_v39 = vadd.f32 %v884_v37, %v809_v36  ;;  %v5212_v40 = vpop.f32.mrb[9].mxu0 }
 0x52b   :  { %5881 = vtanh.f32 %v888_v39  ;;  %v4859_v47 = vmul.f32 -1.442695, %v888_v39 }
 0x52c   :  { %v764_v42 = vpop.f32.mrb[2].mxu1 }
 0x52d   :  { %v768_v43 = vadd.f32 %v764_v42, %v689_v41  ;;  %v5201_v44 = vpop.f32.mrb[3].mxu1 }
 0x52f   :  { %5883 = vtanh.f32 %v768_v43  ;;  %v4857_v48 = vmul.f32 -1.442695, %v768_v43 }
 0x530   :  { %5885 = vpow2.f32 %v4859_v47 }
 0x531   :  { %5887 = vpow2.f32 %v4857_v48 }
 0x535   :  { %v5882_v45 = vpop.eup %5881 }
 0x536   :  { %903 = vrot.lane.b32.xlu1 %v5882_v45, %s6321_s5 }
 0x539   :  { %v5884_v46 = vpop.eup %5883 }
 0x53a   :  { %783 = vrot.lane.b32.xlu1 %v5884_v46, %s6321_s5  ;;  %v5886_v49 = vpop.eup %5885 }
 0x53b   :  { %v893_v50 = vadd.f32 1.0, %v5886_v49  ;;  %v5888_v51 = vpop.eup %5887 }
 0x53c   :  { %v773_v52 = vadd.f32 1.0, %v5888_v51 }
 0x53d   :  { %5889 = vrcp.f32 %v893_v50 }
 0x53e   :  { %5891 = vrcp.f32 %v773_v52 }
 0x547   :  { %v5890_v53 = vpop.eup %5889 }
 0x548   :  { %v5892_v56 = vpop.eup %5891  ;;  %v901_v60 = vmul.f32 %v5890_v53, %v899_v59 }
 0x549   :  { %v781_v0 = vmul.f32 %v5892_v56, %v779_v63 }
 0x5a8   :  { %v904_v54 = vpop.permute.xlu1 %903 }
 0x5a9   :  { %v906_v55 = vmul.f32 %v5890_v53, %v904_v54 }
 0x5ab   :  { %908 = vrot.lane.b32.xlu1 %v906_v55, %s6320_s22 }
 0x5ac   :  { %v784_v57 = vpop.permute.xlu1 %783 }
 0x5ad   :  { %v786_v58 = vmul.f32 %v5892_v56, %v784_v57 }
 0x5af   :  { %788 = vrot.lane.b32.xlu1 %v786_v58, %s6320_s22 }
 0x61d   :  { %v909_v61 = vpop.permute.xlu1 %908 }
 0x61e   :  { %v911_v62 = vadd.f32 %v909_v61, %v901_v60 }
 0x620   :  { %5893 = vtanh.f32 %v911_v62 }
 0x621   :  { %v789_v1 = vpop.permute.xlu1 %788 }
 0x622   :  { %v791_v2 = vadd.f32 %v789_v1, %v781_v0 }
 0x624   :  { %5895 = vtanh.f32 %v791_v2 }
 0x62a   :  { %v5894_v3 = vpop.eup %5893 }
 0x62b   :  { %914 = vrot.lane.b32.xlu0 %v5894_v3, %s6321_s5  ;;  %v1289_v3 = vld [vmem:[#allocation6 + $0x8] sm:$0x3] }
 0x62e   :  { %v5896_v4 = vpop.eup %5895 }
 0x62f   :  { %794 = vrot.lane.b32.xlu1 %v5896_v4, %s6321_s5 }
 0x69d   :  { %v915_v5 = vpop.permute.xlu0 %914 }
 0x69e   :  { %v917_v6 = vmul.f32 %v5890_v53, %v915_v5 }
 0x6a0   :  { %919 = vrot.lane.b32.xlu0 %v917_v6, %s6320_s22 }
 0x6a1   :  { %v795_v7 = vpop.permute.xlu1 %794 }
 0x6a2   :  { %v797_v8 = vmul.f32 %v5892_v56, %v795_v7  ;;  %v1169_v7 = vld [vmem:[#allocation5 + $0x6] sm:$0x3] }
 0x6a4   :  { %924 = vrot.lane.b32.xlu0 %v911_v62, %s6322_s0  ;;  %799 = vrot.lane.b32.xlu1 %v797_v8, %s6320_s22 }
 0x6a8   :  { %804 = vrot.lane.b32.xlu0 %v791_v2, %s6322_s0 }
 0x712   :  { %v920_v9 = vpop.permute.xlu0 %919 }
 0x713   :  { %922 = vst.msk [vmem:[#allocation9] sm:$0x3] %vm444_vm2, %v920_v9  ;;  %928 = vst.msk [vmem:[#allocation4 + $0xc] sm:$0x3] %vm444_vm2, %v920_v9 }
 0x716   :  { %v925_v10 = vpop.permute.xlu0 %924  ;;  %v800_v11 = vpop.permute.xlu1 %799 }
 0x717   :  { %927 = vst.msk [vmem:[#allocation10] sm:$0x3] %vm444_vm2, %v925_v10  ;;  %802 = vst.msk [vmem:[#allocation7] sm:$0x3] %vm444_vm2, %v800_v11 }
 0x718   :  { %808 = vst.msk [vmem:[#allocation3 + $0x2] sm:$0x3] %vm444_vm2, %v800_v11 }
 0x71a   :  { %v1050_v12 = vld [vmem:[#allocation9] sm:$0x3]  ;;  %v805_v13 = vpop.permute.xlu0 %804 }
 0x71b   :  { %807 = vst.msk [vmem:[#allocation8] sm:$0x3] %vm444_vm2, %v805_v13  ;;  %5233 = vmatmul.mubr.msk.f32.vlgmr.msra.gmra.mrb[10].mxu0 %vm257_vm4, %v1050_v12 }
 0x71c   :  { %5647 = vmatpush3.bf16.msra.mxu0 %v6609_v35  ;;  %5254 = vmatprep.mubr.msk.f32.mxu0 %vm6319_vm3, %v6318_v17 }
 0x71d   :  { %5648 = vmatprep.subr.bf16.mxu0 %v6317_v15 }
 0x71e   :  { %v1129_v14 = vld [vmem:[#allocation10] sm:$0x3]  ;;  %v930_v18 = vld [vmem:[#allocation7] sm:$0x3] }
 0x71f   :  { %1138 = vrot.lane.b32.xlu0 %v1129_v14, %s6320_s22  ;;  %5222 = vmatmul.mubr.msk.f32.vlgmr.msra.gmra.mrb[4].mxu1 %vm257_vm4, %v930_v18 }
 0x720   :  { %5641 = vmatpush3.bf16.msra.mxu1 %v6569_v16  ;;  %5650 = vmatpush3.bf16.msra.mxu0 %v6614_v38 }
 0x721   :  { %5642 = vmatprep.subr.bf16.mxu1 %v6317_v15  ;;  %5243 = vmatprep.mubr.msk.f32.mxu1 %vm6319_vm3, %v6318_v17 }
 0x722   :  { %v1009_v19 = vld [vmem:[#allocation8] sm:$0x3]  ;;  %5657 = vmatprep.subr.bf16.mxu0 %v6317_v15 }
 0x723   :  { %1018 = vrot.lane.b32.xlu0 %v1009_v19, %s6320_s22 }
 0x724   :  { %5644 = vmatpush3.bf16.msra.mxu1 %v6587_v20 }
 0x725   :  { %5651 = vmatprep.subr.bf16.mxu1 %v6317_v15 }
 0x791   :  { %v1139_v45 = vpop.permute.xlu0 %1138 }
 0x795   :  { %v1019_v49 = vpop.permute.xlu0 %1018 }
 0x7ee   :  { %v1124_v22 = vpop.f32.mrb[10].mxu0 }
 0x7ef   :  { %v1128_v23 = vadd.f32 %v1124_v22, %v1049_v21  ;;  %v5234_v24 = vpop.f32.mrb[11].mxu0 }
 0x7f1   :  { %5897 = vtanh.f32 %v1128_v23  ;;  %v4863_v31 = vmul.f32 -1.442695, %v1128_v23 }
 0x7f2   :  { %v1004_v26 = vpop.f32.mrb[4].mxu1 }
 0x7f3   :  { %v1008_v27 = vadd.f32 %v1004_v26, %v929_v25  ;;  %v5223_v28 = vpop.f32.mrb[5].mxu1 }
 0x7f5   :  { %5899 = vtanh.f32 %v1008_v27  ;;  %v4861_v32 = vmul.f32 -1.442695, %v1008_v27 }
 0x7f6   :  { %5901 = vpow2.f32 %v4863_v31 }
 0x7f7   :  { %5903 = vpow2.f32 %v4861_v32 }
 0x7fb   :  { %v5898_v29 = vpop.eup %5897 }
 0x7fc   :  { %1143 = vrot.lane.b32.xlu1 %v5898_v29, %s6321_s5 }
 0x7ff   :  { %v5900_v30 = vpop.eup %5899 }
 0x800   :  { %1023 = vrot.lane.b32.xlu1 %v5900_v30, %s6321_s5  ;;  %v5902_v33 = vpop.eup %5901 }
 0x801   :  { %v1133_v34 = vadd.f32 1.0, %v5902_v33  ;;  %v5904_v36 = vpop.eup %5903 }
 0x802   :  { %v1013_v37 = vadd.f32 1.0, %v5904_v36 }
 0x803   :  { %5905 = vrcp.f32 %v1133_v34 }
 0x804   :  { %5907 = vrcp.f32 %v1013_v37 }
 0x80d   :  { %v5906_v39 = vpop.eup %5905 }
 0x80e   :  { %v5908_v42 = vpop.eup %5907  ;;  %v1141_v46 = vmul.f32 %v5906_v39, %v1139_v45 }
 0x80f   :  { %v1021_v50 = vmul.f32 %v5908_v42, %v1019_v49 }
 0x86e   :  { %v1144_v40 = vpop.permute.xlu1 %1143 }
 0x86f   :  { %v1146_v41 = vmul.f32 %v5906_v39, %v1144_v40 }
 0x871   :  { %1148 = vrot.lane.b32.xlu1 %v1146_v41, %s6320_s22 }
 0x872   :  { %v1024_v43 = vpop.permute.xlu1 %1023 }
 0x873   :  { %v1026_v44 = vmul.f32 %v5908_v42, %v1024_v43 }
 0x875   :  { %1028 = vrot.lane.b32.xlu1 %v1026_v44, %s6320_s22 }
 0x8e3   :  { %v1149_v47 = vpop.permute.xlu1 %1148 }
 0x8e4   :  { %v1151_v48 = vadd.f32 %v1149_v47, %v1141_v46 }
 0x8e6   :  { %5909 = vtanh.f32 %v1151_v48 }
 0x8e7   :  { %v1029_v51 = vpop.permute.xlu1 %1028 }
 0x8e8   :  { %v1031_v52 = vadd.f32 %v1029_v51, %v1021_v50 }
 0x8ea   :  { %5911 = vtanh.f32 %v1031_v52 }
 0x8f0   :  { %v5910_v53 = vpop.eup %5909 }
 0x8f1   :  { %1154 = vrot.lane.b32.xlu0 %v5910_v53, %s6321_s5 }
 0x8f4   :  { %v5912_v54 = vpop.eup %5911 }
 0x8f5   :  { %1034 = vrot.lane.b32.xlu1 %v5912_v54, %s6321_s5 }
 0x963   :  { %v1155_v55 = vpop.permute.xlu0 %1154 }
 0x964   :  { %v1157_v56 = vmul.f32 %v5906_v39, %v1155_v55 }
 0x966   :  { %1159 = vrot.lane.b32.xlu0 %v1157_v56, %s6320_s22 }
 0x967   :  { %v1035_v57 = vpop.permute.xlu1 %1034 }
 0x968   :  { %v1037_v58 = vmul.f32 %v5908_v42, %v1035_v57 }
 0x96a   :  { %1164 = vrot.lane.b32.xlu0 %v1151_v48, %s6322_s0  ;;  %1039 = vrot.lane.b32.xlu1 %v1037_v58, %s6320_s22 }
 0x96e   :  { %1044 = vrot.lane.b32.xlu0 %v1031_v52, %s6322_s0  ;;  %v1529_v52 = vld [vmem:[#allocation6 + $0x6] sm:$0x3] }
 0x9d8   :  { %v1160_v59 = vpop.permute.xlu0 %1159 }
 0x9d9   :  { %1162 = vst.msk [vmem:[#allocation9] sm:$0x3] %vm444_vm2, %v1160_v59  ;;  %1168 = vst.msk [vmem:[#allocation4 + $0xa] sm:$0x3] %vm444_vm2, %v1160_v59 }
 0x9dc   :  { %v1165_v60 = vpop.permute.xlu0 %1164  ;;  %v1040_v61 = vpop.permute.xlu1 %1039 }
 0x9dd   :  { %1167 = vst.msk [vmem:[#allocation10] sm:$0x3] %vm444_vm2, %v1165_v60  ;;  %1042 = vst.msk [vmem:[#allocation7] sm:$0x3] %vm444_vm2, %v1040_v61 }
 0x9de   :  { %1048 = vst.msk [vmem:[#allocation3 + $0x4] sm:$0x3] %vm444_vm2, %v1040_v61 }
 0x9e0   :  { %v1290_v62 = vld [vmem:[#allocation9] sm:$0x3]  ;;  %v1045_v63 = vpop.permute.xlu0 %1044 }
 0x9e1   :  { %1047 = vst.msk [vmem:[#allocation8] sm:$0x3] %vm444_vm2, %v1045_v63  ;;  %5255 = vmatmul.mubr.msk.f32.vlgmr.msra.gmra.mrb[12].mxu0 %vm257_vm4, %v1290_v62 }
 0x9e2   :  { %5659 = vmatpush3.bf16.msra.mxu0 %v6609_v35  ;;  %5276 = vmatprep.mubr.msk.f32.mxu0 %vm6319_vm3, %v6318_v17 }
 0x9e3   :  { %5660 = vmatprep.subr.bf16.mxu0 %v6317_v15 }
 0x9e4   :  { %v1369_v0 = vld [vmem:[#allocation10] sm:$0x3]  ;;  %v1170_v1 = vld [vmem:[#allocation7] sm:$0x3] }
 0x9e5   :  { %1378 = vrot.lane.b32.xlu0 %v1369_v0, %s6320_s22  ;;  %5244 = vmatmul.mubr.msk.f32.vlgmr.msra.gmra.mrb[6].mxu1 %vm257_vm4, %v1170_v1 }
 0x9e6   :  { %5653 = vmatpush3.bf16.msra.mxu1 %v6569_v16  ;;  %5662 = vmatpush3.bf16.msra.mxu0 %v6614_v38 }
 0x9e7   :  { %5654 = vmatprep.subr.bf16.mxu1 %v6317_v15  ;;  %5265 = vmatprep.mubr.msk.f32.mxu1 %vm6319_vm3, %v6318_v17 }
 0x9e8   :  { %v1249_v2 = vld [vmem:[#allocation8] sm:$0x3]  ;;  %5669 = vmatprep.subr.bf16.mxu0 %v6317_v15 }
 0x9e9   :  { %1258 = vrot.lane.b32.xlu0 %v1249_v2, %s6320_s22 }
 0x9ea   :  { %5656 = vmatpush3.bf16.msra.mxu1 %v6587_v20 }
 0x9eb   :  { %5663 = vmatprep.subr.bf16.mxu1 %v6317_v15 }
 0xa57   :  { %v1379_v29 = vpop.permute.xlu0 %1378 }
 0xa5b   :  { %v1259_v33 = vpop.permute.xlu0 %1258 }
 0xab4   :  { %v1364_v4 = vpop.f32.mrb[12].mxu0 }
 0xab5   :  { %v1368_v5 = vadd.f32 %v1364_v4, %v1289_v3  ;;  %v5256_v6 = vpop.f32.mrb[13].mxu0 }
 0xab7   :  { %5913 = vtanh.f32 %v1368_v5  ;;  %v4867_v13 = vmul.f32 -1.442695, %v1368_v5 }
 0xab8   :  { %v1244_v8 = vpop.f32.mrb[6].mxu1 }
 0xab9   :  { %v1248_v9 = vadd.f32 %v1244_v8, %v1169_v7  ;;  %v5245_v10 = vpop.f32.mrb[7].mxu1 }
 0xabb   :  { %5915 = vtanh.f32 %v1248_v9  ;;  %v4865_v14 = vmul.f32 -1.442695, %v1248_v9 }
 0xabc   :  { %5917 = vpow2.f32 %v4867_v13 }
 0xabd   :  { %5919 = vpow2.f32 %v4865_v14 }
 0xac1   :  { %v5914_v11 = vpop.eup %5913 }
 0xac2   :  { %1383 = vrot.lane.b32.xlu1 %v5914_v11, %s6321_s5 }
 0xac5   :  { %v5916_v12 = vpop.eup %5915 }
 0xac6   :  { %1263 = vrot.lane.b32.xlu1 %v5916_v12, %s6321_s5  ;;  %v5918_v18 = vpop.eup %5917 }
 0xac7   :  { %v1373_v19 = vadd.f32 1.0, %v5918_v18  ;;  %v5920_v21 = vpop.eup %5919 }
 0xac8   :  { %v1253_v22 = vadd.f32 1.0, %v5920_v21 }
 0xac9   :  { %5921 = vrcp.f32 %v1373_v19 }
 0xaca   :  { %5923 = vrcp.f32 %v1253_v22 }
 0xad3   :  { %v5922_v23 = vpop.eup %5921 }
 0xad4   :  { %v5924_v26 = vpop.eup %5923  ;;  %v1381_v30 = vmul.f32 %v5922_v23, %v1379_v29 }
 0xad5   :  { %v1261_v34 = vmul.f32 %v5924_v26, %v1259_v33  ;;  %v1769_v33 = vld [vmem:[#allocation6 + $0x4] sm:$0x3] }
 0xb34   :  { %v1384_v24 = vpop.permute.xlu1 %1383 }
 0xb35   :  { %v1386_v25 = vmul.f32 %v5922_v23, %v1384_v24 }
 0xb37   :  { %1388 = vrot.lane.b32.xlu1 %v1386_v25, %s6320_s22 }
 0xb38   :  { %v1264_v27 = vpop.permute.xlu1 %1263 }
 0xb39   :  { %v1266_v28 = vmul.f32 %v5924_v26, %v1264_v27 }
 0xb3b   :  { %1268 = vrot.lane.b32.xlu1 %v1266_v28, %s6320_s22 }
 0xba9   :  { %v1389_v31 = vpop.permute.xlu1 %1388 }
 0xbaa   :  { %v1391_v32 = vadd.f32 %v1389_v31, %v1381_v30 }
 0xbac   :  { %5925 = vtanh.f32 %v1391_v32 }
 0xbad   :  { %v1269_v36 = vpop.permute.xlu1 %1268 }
 0xbae   :  { %v1271_v37 = vadd.f32 %v1269_v36, %v1261_v34 }
 0xbb0   :  { %5927 = vtanh.f32 %v1271_v37 }
 0xbb6   :  { %v5926_v39 = vpop.eup %5925 }
 0xbb7   :  { %1394 = vrot.lane.b32.xlu0 %v5926_v39, %s6321_s5  ;;  %v1649_v39 = vld [vmem:[#allocation5 + $0xa] sm:$0x3] }
 0xbba   :  { %v5928_v40 = vpop.eup %5927 }
 0xbbb   :  { %1274 = vrot.lane.b32.xlu1 %v5928_v40, %s6321_s5 }
 0xc29   :  { %v1395_v41 = vpop.permute.xlu0 %1394 }
 0xc2a   :  { %v1397_v42 = vmul.f32 %v5922_v23, %v1395_v41 }
 0xc2c   :  { %1399 = vrot.lane.b32.xlu0 %v1397_v42, %s6320_s22 }
 0xc2d   :  { %v1275_v43 = vpop.permute.xlu1 %1274 }
 0xc2e   :  { %v1277_v44 = vmul.f32 %v5924_v26, %v1275_v43 }
 0xc30   :  { %1404 = vrot.lane.b32.xlu0 %v1391_v32, %s6322_s0  ;;  %1279 = vrot.lane.b32.xlu1 %v1277_v44, %s6320_s22 }
 0xc34   :  { %1284 = vrot.lane.b32.xlu0 %v1271_v37, %s6322_s0 }
 0xc9e   :  { %v1400_v45 = vpop.permute.xlu0 %1399 }
 0xc9f   :  { %1402 = vst.msk [vmem:[#allocation9] sm:$0x3] %vm444_vm2, %v1400_v45  ;;  %1408 = vst.msk [vmem:[#allocation4 + $0x8] sm:$0x3] %vm444_vm2, %v1400_v45 }
 0xca2   :  { %v1405_v46 = vpop.permute.xlu0 %1404  ;;  %v1280_v47 = vpop.permute.xlu1 %1279 }
 0xca3   :  { %1407 = vst.msk [vmem:[#allocation10] sm:$0x3] %vm444_vm2, %v1405_v46  ;;  %1282 = vst.msk [vmem:[#allocation7] sm:$0x3] %vm444_vm2, %v1280_v47 }
 0xca4   :  { %1288 = vst.msk [vmem:[#allocation3 + $0x6] sm:$0x3] %vm444_vm2, %v1280_v47 }
 0xca6   :  { %v1530_v48 = vld [vmem:[#allocation9] sm:$0x3]  ;;  %v1285_v49 = vpop.permute.xlu0 %1284 }
 0xca7   :  { %1287 = vst.msk [vmem:[#allocation8] sm:$0x3] %vm444_vm2, %v1285_v49  ;;  %5277 = vmatmul.mubr.msk.f32.vlgmr.msra.gmra.mrb[14].mxu0 %vm257_vm4, %v1530_v48 }
 0xca8   :  { %5671 = vmatpush3.bf16.msra.mxu0 %v6609_v35  ;;  %5298 = vmatprep.mubr.msk.f32.mxu0 %vm6319_vm3, %v6318_v17 }
 0xca9   :  { %5672 = vmatprep.subr.bf16.mxu0 %v6317_v15 }
 0xcaa   :  { %v1609_v50 = vld [vmem:[#allocation10] sm:$0x3]  ;;  %v1410_v51 = vld [vmem:[#allocation7] sm:$0x3] }
 0xcab   :  { %1618 = vrot.lane.b32.xlu0 %v1609_v50, %s6320_s22  ;;  %5266 = vmatmul.mubr.msk.f32.vlgmr.msra.gmra.mrb[8].mxu1 %vm257_vm4, %v1410_v51 }
 0xcac   :  { %5665 = vmatpush3.bf16.msra.mxu1 %v6569_v16  ;;  %5674 = vmatpush3.bf16.msra.mxu0 %v6614_v38  ;;  %v1409_v38 = vld [vmem:[#allocation5 + $0x8] sm:$0x3] }
 0xcad   :  { %5666 = vmatprep.subr.bf16.mxu1 %v6317_v15  ;;  %5287 = vmatprep.mubr.msk.f32.mxu1 %vm6319_vm3, %v6318_v17 }
 0xcae   :  { %v1489_v35 = vld [vmem:[#allocation8] sm:$0x3]  ;;  %5681 = vmatprep.subr.bf16.mxu0 %v6317_v15 }
 0xcaf   :  { %1498 = vrot.lane.b32.xlu0 %v1489_v35, %s6320_s22 }
 0xcb0   :  { %5668 = vmatpush3.bf16.msra.mxu1 %v6587_v20 }
 0xcb1   :  { %5675 = vmatprep.subr.bf16.mxu1 %v6317_v15 }
 0xd1d   :  { %v1619_v7 = vpop.permute.xlu0 %1618 }
 0xd21   :  { %v1499_v11 = vpop.permute.xlu0 %1498 }
 0xd7a   :  { %v1604_v53 = vpop.f32.mrb[14].mxu0 }
 0xd7b   :  { %v1608_v54 = vadd.f32 %v1604_v53, %v1529_v52  ;;  %v5278_v16 = vpop.f32.mrb[15].mxu0 }
 0xd7d   :  { %5929 = vtanh.f32 %v1608_v54  ;;  %v4871_v60 = vmul.f32 -1.442695, %v1608_v54 }
 0xd7e   :  { %v1484_v55 = vpop.f32.mrb[8].mxu1 }
 0xd7f   :  { %v1488_v56 = vadd.f32 %v1484_v55, %v1409_v38  ;;  %v5267_v57 = vpop.f32.mrb[9].mxu1 }
 0xd81   :  { %5931 = vtanh.f32 %v1488_v56  ;;  %v4869_v20 = vmul.f32 -1.442695, %v1488_v56 }
 0xd82   :  { %5933 = vpow2.f32 %v4871_v60 }
 0xd83   :  { %5935 = vpow2.f32 %v4869_v20 }
 0xd87   :  { %v5930_v58 = vpop.eup %5929 }
 0xd88   :  { %1623 = vrot.lane.b32.xlu1 %v5930_v58, %s6321_s5 }
 0xd8b   :  { %v5932_v59 = vpop.eup %5931 }
 0xd8c   :  { %1503 = vrot.lane.b32.xlu1 %v5932_v59, %s6321_s5  ;;  %v5934_v61 = vpop.eup %5933 }
 0xd8d   :  { %v1613_v62 = vadd.f32 1.0, %v5934_v61  ;;  %v5936_v63 = vpop.eup %5935 }
 0xd8e   :  { %v1493_v0 = vadd.f32 1.0, %v5936_v63  ;;  %v2011_v63 = vld [vmem:[#allocation14] sm:$0xff] }
 0xd8f   :  { %5937 = vrcp.f32 %v1613_v62 }
 0xd90   :  { %5939 = vrcp.f32 %v1493_v0  ;;  %v2012_v0 = vld [vmem:[#allocation14 + $0x8] sm:$0xff] }
 0xd99   :  { %v5938_v1 = vpop.eup %5937 }
 0xd9a   :  { %v5940_v4 = vpop.eup %5939  ;;  %v1621_v8 = vmul.f32 %v5938_v1, %v1619_v7 }
 0xd9b   :  { %v1501_v12 = vmul.f32 %v5940_v4, %v1499_v11 }
 0xdfa   :  { %v1624_v2 = vpop.permute.xlu1 %1623 }
 0xdfb   :  { %v1626_v3 = vmul.f32 %v5938_v1, %v1624_v2  ;;  %v1891_v2 = vld [vmem:[%s7196_s4] sm:$0xff] }
 0xdfd   :  { %1628 = vrot.lane.b32.xlu1 %v1626_v3, %s6320_s22  ;;  %v1892_v3 = vld [vmem:[%s7196_s4 + $0x8] sm:$0xff] }
 0xdfe   :  { %v1504_v5 = vpop.permute.xlu1 %1503 }
 0xdff   :  { %v1506_v6 = vmul.f32 %v5940_v4, %v1504_v5  ;;  %v5676_v5 = vpack.c.bf16 %v1892_v3, %v1891_v2 }
 0xe01   :  { %1508 = vrot.lane.b32.xlu1 %v1506_v6, %s6320_s22  ;;  %v2014_v6 = vld [vmem:[#allocation14 + $0x18] sm:$0xff] }
 0xe6f   :  { %v1629_v9 = vpop.permute.xlu1 %1628 }
 0xe70   :  { %v1631_v10 = vadd.f32 %v1629_v9, %v1621_v8  ;;  %v1893_v8 = vld [vmem:[%s7196_s4 + $0x10] sm:$0xff]  ;;  %v1894_v9 = vld [vmem:[%s7196_s4 + $0x18] sm:$0xff] }
 0xe72   :  { %5941 = vtanh.f32 %v1631_v10 }
 0xe73   :  { %v1509_v13 = vpop.permute.xlu1 %1508 }
 0xe74   :  { %v1511_v14 = vadd.f32 %v1509_v13, %v1501_v12 }
 0xe76   :  { %5943 = vtanh.f32 %v1511_v14 }
 0xe7c   :  { %v5942_v18 = vpop.eup %5941 }
 0xe7d   :  { %1634 = vrot.lane.b32.xlu0 %v5942_v18, %s6321_s5 }
 0xe80   :  { %v5944_v19 = vpop.eup %5943 }
 0xe81   :  { %1514 = vrot.lane.b32.xlu1 %v5944_v19, %s6321_s5 }
 0xeef   :  { %v1635_v21 = vpop.permute.xlu0 %1634 }
 0xef0   :  { %v1637_v22 = vmul.f32 %v5938_v1, %v1635_v21  ;;  %v5682_v1 = vpack.c.bf16 %v2012_v0, %v2011_v63 }
 0xef2   :  { %1639 = vrot.lane.b32.xlu0 %v1637_v22, %s6320_s22 }
 0xef3   :  { %v1515_v23 = vpop.permute.xlu1 %1514 }
 0xef4   :  { %v1517_v24 = vmul.f32 %v5940_v4, %v1515_v23  ;;  %v2013_v4 = vld [vmem:[#allocation14 + $0x10] sm:$0xff] }
 0xef5   :  { %v5685_v7 = vpack.c.bf16 %v2014_v6, %v2013_v4 }
 0xef6   :  { %1644 = vrot.lane.b32.xlu0 %v1631_v10, %s6322_s0  ;;  %1519 = vrot.lane.b32.xlu1 %v1517_v24, %s6320_s22  ;;  %v5679_v10 = vpack.c.bf16 %v1894_v9, %v1893_v8  ;;  %v2129_v9 = vld [vmem:[#allocation5 + $0xe] sm:$0x3] }
 0xefa   :  { %1524 = vrot.lane.b32.xlu0 %v1511_v14, %s6322_s0 }
 0xf64   :  { %v1640_v25 = vpop.permute.xlu0 %1639 }
 0xf65   :  { %1642 = vst.msk [vmem:[#allocation9] sm:$0x3] %vm444_vm2, %v1640_v25  ;;  %1648 = vst.msk [vmem:[#allocation4 + $0x6] sm:$0x3] %vm444_vm2, %v1640_v25 }
 0xf68   :  { %v1645_v26 = vpop.permute.xlu0 %1644  ;;  %v1520_v27 = vpop.permute.xlu1 %1519 }
 0xf69   :  { %1647 = vst.msk [vmem:[#allocation10] sm:$0x3] %vm444_vm2, %v1645_v26  ;;  %1522 = vst.msk [vmem:[#allocation7] sm:$0x3] %vm444_vm2, %v1520_v27 }
 0xf6a   :  { %1528 = vst.msk [vmem:[#allocation3 + $0x8] sm:$0x3] %vm444_vm2, %v1520_v27  ;;  %v2009_v27 = vld [vmem:[#allocation6 + $0x2] sm:$0x3] }
 0xf6c   :  { %v1525_v28 = vpop.permute.xlu0 %1524  ;;  %v1770_v29 = vld [vmem:[#allocation9] sm:$0x3] }
 0xf6d   :  { %1527 = vst.msk [vmem:[#allocation8] sm:$0x3] %vm444_vm2, %v1525_v28  ;;  %5299 = vmatmul.mubr.msk.f32.vlgmr.msra.gmra.mrb[16].mxu0 %vm257_vm4, %v1770_v29 }
 0xf6e   :  { %5320 = vmatprep.mubr.msk.f32.mxu0 %vm6319_vm3, %v6318_v17  ;;  %5683 = vmatpush3.bf16.msra.mxu0 %v5682_v1 }
 0xf6f   :  { %5684 = vmatprep.subr.bf16.mxu0 %v6317_v15 }
 0xf70   :  { %v1849_v30 = vld [vmem:[#allocation10] sm:$0x3]  ;;  %v1650_v31 = vld [vmem:[#allocation7] sm:$0x3] }
 0xf71   :  { %1858 = vrot.lane.b32.xlu0 %v1849_v30, %s6320_s22  ;;  %5288 = vmatmul.mubr.msk.f32.vlgmr.msra.gmra.mrb[10].mxu1 %vm257_vm4, %v1650_v31  ;;  %v1889_v31 = vld [vmem:[#allocation5 + $0xc] sm:$0x3] }
 0xf72   :  { %5309 = vmatprep.mubr.msk.f32.mxu1 %vm6319_vm3, %v6318_v17  ;;  %5677 = vmatpush3.bf16.msra.mxu1 %v5676_v5 }
 0xf73   :  { %5686 = vmatpush3.bf16.msra.mxu0 %v5685_v7  ;;  %5678 = vmatprep.subr.bf16.mxu1 %v6317_v15 }
 0xf74   :  { %v1729_v32 = vld [vmem:[#allocation8] sm:$0x3]  ;;  %5693 = vmatprep.subr.bf16.mxu0 %v6317_v15 }
 0xf75   :  { %1738 = vrot.lane.b32.xlu0 %v1729_v32, %s6320_s22 }
 0xf76   :  { %5680 = vmatpush3.bf16.msra.mxu1 %v5679_v10 }
 0xf77   :  { %5687 = vmatprep.subr.bf16.mxu1 %v6317_v15 }
 0xfe3   :  { %v1859_v38 = vpop.permute.xlu0 %1858 }
 0xfe7   :  { %v1739_v58 = vpop.permute.xlu0 %1738 }
0x1040   :  { %v1844_v34 = vpop.f32.mrb[16].mxu0 }
0x1041   :  { %v1848_v36 = vadd.f32 %v1844_v34, %v1769_v33  ;;  %v5300_v37 = vpop.f32.mrb[17].mxu0 }
0x1043   :  { %5945 = vtanh.f32 %v1848_v36  ;;  %v4875_v45 = vmul.f32 -1.442695, %v1848_v36 }
0x1044   :  { %v1724_v40 = vpop.f32.mrb[10].mxu1 }
0x1045   :  { %v1728_v41 = vadd.f32 %v1724_v40, %v1649_v39  ;;  %v5289_v42 = vpop.f32.mrb[11].mxu1 }
0x1047   :  { %5947 = vtanh.f32 %v1728_v41  ;;  %v4873_v46 = vmul.f32 -1.442695, %v1728_v41 }
0x1048   :  { %5949 = vpow2.f32 %v4875_v45 }
0x1049   :  { %5951 = vpow2.f32 %v4873_v46 }
0x104d   :  { %v5946_v43 = vpop.eup %5945 }
0x104e   :  { %1863 = vrot.lane.b32.xlu1 %v5946_v43, %s6321_s5 }
0x1051   :  { %v5948_v44 = vpop.eup %5947 }
0x1052   :  { %1743 = vrot.lane.b32.xlu1 %v5948_v44, %s6321_s5  ;;  %v5950_v47 = vpop.eup %5949 }
0x1053   :  { %v1853_v48 = vadd.f32 1.0, %v5950_v47  ;;  %v5952_v49 = vpop.eup %5951 }
0x1054   :  { %v1733_v50 = vadd.f32 1.0, %v5952_v49 }
0x1055   :  { %5953 = vrcp.f32 %v1853_v48 }
0x1056   :  { %5955 = vrcp.f32 %v1733_v50 }
0x105f   :  { %v5954_v51 = vpop.eup %5953 }
0x1060   :  { %v5956_v53 = vpop.eup %5955  ;;  %v1861_v55 = vmul.f32 %v5954_v51, %v1859_v38 }
0x1061   :  { %v1741_v59 = vmul.f32 %v5956_v53, %v1739_v58 }
0x10c0   :  { %v1864_v35 = vpop.permute.xlu1 %1863 }
0x10c1   :  { %v1866_v52 = vmul.f32 %v5954_v51, %v1864_v35 }
0x10c3   :  { %1868 = vrot.lane.b32.xlu1 %v1866_v52, %s6320_s22 }
0x10c4   :  { %v1744_v54 = vpop.permute.xlu1 %1743 }
0x10c5   :  { %v1746_v16 = vmul.f32 %v5956_v53, %v1744_v54 }
0x10c7   :  { %1748 = vrot.lane.b32.xlu1 %v1746_v16, %s6320_s22 }
0x1135   :  { %v1869_v56 = vpop.permute.xlu1 %1868 }
0x1136   :  { %v1871_v57 = vadd.f32 %v1869_v56, %v1861_v55 }
0x1138   :  { %5957 = vtanh.f32 %v1871_v57 }
0x1139   :  { %v1749_v60 = vpop.permute.xlu1 %1748 }
0x113a   :  { %v1751_v20 = vadd.f32 %v1749_v60, %v1741_v59 }
0x113c   :  { %5959 = vtanh.f32 %v1751_v20 }
0x1142   :  { %v5958_v61 = vpop.eup %5957 }
0x1143   :  { %1874 = vrot.lane.b32.xlu0 %v5958_v61, %s6321_s5 }
0x1146   :  { %v5960_v62 = vpop.eup %5959 }
0x1147   :  { %1754 = vrot.lane.b32.xlu1 %v5960_v62, %s6321_s5 }
0x11b5   :  { %v1875_v11 = vpop.permute.xlu0 %1874 }
0x11b6   :  { %v1877_v12 = vmul.f32 %v5954_v51, %v1875_v11 }
0x11b8   :  { %1879 = vrot.lane.b32.xlu0 %v1877_v12, %s6320_s22 }
0x11b9   :  { %v1755_v13 = vpop.permute.xlu1 %1754 }
0x11ba   :  { %v1757_v14 = vmul.f32 %v5956_v53, %v1755_v13 }
0x11bc   :  { %1884 = vrot.lane.b32.xlu0 %v1871_v57, %s6322_s0  ;;  %1759 = vrot.lane.b32.xlu1 %v1757_v14, %s6320_s22 }
0x11c0   :  { %1764 = vrot.lane.b32.xlu0 %v1751_v20, %s6322_s0 }
0x122a   :  { %v1880_v18 = vpop.permute.xlu0 %1879 }
0x122b   :  { %1882 = vst.msk [vmem:[#allocation9] sm:$0x3] %vm444_vm2, %v1880_v18  ;;  %1888 = vst.msk [vmem:[#allocation4 + $0x4] sm:$0x3] %vm444_vm2, %v1880_v18 }
0x122e   :  { %v1885_v19 = vpop.permute.xlu0 %1884  ;;  %v1760_v21 = vpop.permute.xlu1 %1759 }
0x122f   :  { %1887 = vst.msk [vmem:[#allocation10] sm:$0x3] %vm444_vm2, %v1885_v19  ;;  %1762 = vst.msk [vmem:[#allocation7] sm:$0x3] %vm444_vm2, %v1760_v21 }
0x1230   :  { %1768 = vst.msk [vmem:[#allocation3 + $0xa] sm:$0x3] %vm444_vm2, %v1760_v21 }
0x1232   :  { %v1765_v22 = vpop.permute.xlu0 %1764  ;;  %v2010_v23 = vld [vmem:[#allocation9] sm:$0x3] }
0x1233   :  { %1767 = vst.msk [vmem:[#allocation8] sm:$0x3] %vm444_vm2, %v1765_v22  ;;  %5321 = vmatmul.mubr.msk.f32.vlgmr.msra.gmra.mrb[18].mxu0 %vm257_vm4, %v2010_v23 }
0x1234   :  { %5695 = vmatpush3.bf16.msra.mxu0 %v5682_v1  ;;  %5342 = vmatprep.mubr.msk.f32.mxu0 %vm6319_vm3, %v6318_v17 }
0x1235   :  { %5696 = vmatprep.subr.bf16.mxu0 %v6317_v15 }
0x1236   :  { %v2089_v24 = vld [vmem:[#allocation10] sm:$0x3]  ;;  %v1890_v25 = vld [vmem:[#allocation7] sm:$0x3] }
0x1237   :  { %2098 = vrot.lane.b32.xlu0 %v2089_v24, %s6320_s22  ;;  %5310 = vmatmul.mubr.msk.f32.vlgmr.msra.gmra.mrb[12].mxu1 %vm257_vm4, %v1890_v25 }
0x1238   :  { %5689 = vmatpush3.bf16.msra.mxu1 %v5676_v5  ;;  %5698 = vmatpush3.bf16.msra.mxu0 %v5685_v7  ;;  %v2249_v5 = vld [vmem:[#allocation6] sm:$0x3] }
0x1239   :  { %5690 = vmatprep.subr.bf16.mxu1 %v6317_v15  ;;  %5331 = vmatprep.mubr.msk.f32.mxu1 %vm6319_vm3, %v6318_v17 }
0x123a   :  { %v1969_v26 = vld [vmem:[#allocation8] sm:$0x3] }
0x123b   :  { %1978 = vrot.lane.b32.xlu0 %v1969_v26, %s6320_s22 }
0x123c   :  { %5692 = vmatpush3.bf16.msra.mxu1 %v5679_v10 }
0x12a9   :  { %v2099_v51 = vpop.permute.xlu0 %2098 }
0x12ad   :  { %v1979_v54 = vpop.permute.xlu0 %1978 }
0x1306   :  { %v2084_v28 = vpop.f32.mrb[18].mxu0 }
0x1307   :  { %v2088_v29 = vadd.f32 %v2084_v28, %v2009_v27  ;;  %v5322_v30 = vpop.f32.mrb[19].mxu0 }
0x1309   :  { %5961 = vtanh.f32 %v2088_v29  ;;  %v4879_v39 = vmul.f32 -1.442695, %v2088_v29 }
0x130a   :  { %v1964_v32 = vpop.f32.mrb[12].mxu1 }
0x130b   :  { %v1968_v33 = vadd.f32 %v1964_v32, %v1889_v31  ;;  %v5311_v34 = vpop.f32.mrb[13].mxu1 }
0x130d   :  { %5963 = vtanh.f32 %v1968_v33  ;;  %v4877_v40 = vmul.f32 -1.442695, %v1968_v33 }
0x130e   :  { %5965 = vpow2.f32 %v4879_v39 }
0x130f   :  { %5967 = vpow2.f32 %v4877_v40 }
0x1313   :  { %v5962_v36 = vpop.eup %5961 }
0x1314   :  { %2103 = vrot.lane.b32.xlu1 %v5962_v36, %s6321_s5 }
0x1317   :  { %v5964_v37 = vpop.eup %5963 }
0x1318   :  { %1983 = vrot.lane.b32.xlu1 %v5964_v37, %s6321_s5  ;;  %v5966_v41 = vpop.eup %5965 }
0x1319   :  { %v2093_v42 = vadd.f32 1.0, %v5966_v41  ;;  %v5968_v43 = vpop.eup %5967 }
0x131a   :  { %v1973_v44 = vadd.f32 1.0, %v5968_v43  ;;  %v2558_v43 = vld [vmem:[#allocation20 + $0x20] sm:$0xff] }
0x131b   :  { %5969 = vrcp.f32 %v2093_v42 }
0x131c   :  { %5971 = vrcp.f32 %v1973_v44  ;;  %v2559_v44 = vld [vmem:[#allocation20 + $0x28] sm:$0xff] }
0x1325   :  { %v5970_v45 = vpop.eup %5969 }
0x1326   :  { %v5972_v48 = vpop.eup %5971  ;;  %v2101_v35 = vmul.f32 %v5970_v45, %v2099_v51  ;;  %v2379_v51 = vld [vmem:[%s7201_s9 + $0x30] sm:$0xff] }
0x1327   :  { %v1981_v16 = vmul.f32 %v5972_v48, %v1979_v54  ;;  %v2554_v54 = vld [vmem:[#allocation20] sm:$0xff] }
0x1386   :  { %v2104_v46 = vpop.permute.xlu1 %2103 }
0x1387   :  { %v2106_v47 = vmul.f32 %v5970_v45, %v2104_v46  ;;  %v5715_v46 = vpack.c.bf16 %v2559_v44, %v2558_v43 }
0x1389   :  { %2108 = vrot.lane.b32.xlu1 %v2106_v47, %s6320_s22  ;;  %v2378_v47 = vld [vmem:[%s7201_s9 + $0x28] sm:$0xff]  ;;  %5716 = vmatprep.subr.bf16.mxu0 %v5715_v46 }
0x138a   :  { %v1984_v49 = vpop.permute.xlu1 %1983 }
0x138b   :  { %v1986_v50 = vmul.f32 %v5972_v48, %v1984_v49  ;;  %v2560_v49 = vld [vmem:[#allocation20 + $0x30] sm:$0xff] }
0x138d   :  { %1988 = vrot.lane.b32.xlu1 %v1986_v50, %s6320_s22  ;;  %v2561_v50 = vld [vmem:[#allocation20 + $0x38] sm:$0xff] }
0x13fb   :  { %v2109_v52 = vpop.permute.xlu1 %2108 }
0x13fc   :  { %v2111_v53 = vadd.f32 %v2109_v52, %v2101_v35  ;;  %v5719_v35 = vpack.c.bf16 %v2561_v50, %v2560_v49  ;;  %v2380_v52 = vld [vmem:[%s7201_s9 + $0x38] sm:$0xff] }
0x13fe   :  { %5973 = vtanh.f32 %v2111_v53 }
0x13ff   :  { %v1989_v38 = vpop.permute.xlu1 %1988 }
0x1400   :  { %v1991_v55 = vadd.f32 %v1989_v38, %v1981_v16  ;;  %v2555_v16 = vld [vmem:[#allocation20 + $0x8] sm:$0xff] }
0x1401   :  { %v2373_v38 = vld [vmem:[%s7201_s9] sm:$0xff] }
0x1402   :  { %5975 = vtanh.f32 %v1991_v55 }
0x1408   :  { %v5974_v56 = vpop.eup %5973 }
0x1409   :  { %2114 = vrot.lane.b32.xlu0 %v5974_v56, %s6321_s5  ;;  %v2374_v56 = vld [vmem:[%s7201_s9 + $0x8] sm:$0xff] }
0x140c   :  { %v5976_v57 = vpop.eup %5975 }
0x140d   :  { %1994 = vrot.lane.b32.xlu1 %v5976_v57, %s6321_s5  ;;  %v5707_v57 = vpack.c.bf16 %v2374_v56, %v2373_v38 }
0x147b   :  { %v2115_v58 = vpop.permute.xlu0 %2114 }
0x147c   :  { %v2117_v59 = vmul.f32 %v5970_v45, %v2115_v58  ;;  %v2377_v45 = vld [vmem:[%s7201_s9 + $0x20] sm:$0xff] }
0x147e   :  { %2119 = vrot.lane.b32.xlu0 %v2117_v59, %s6320_s22 }
0x147f   :  { %v1995_v60 = vpop.permute.xlu1 %1994 }
0x1480   :  { %v1997_v20 = vmul.f32 %v5972_v48, %v1995_v60  ;;  %v5699_v48 = vpack.c.bf16 %v2378_v47, %v2377_v45 }
0x1482   :  { %2124 = vrot.lane.b32.xlu0 %v2111_v53, %s6322_s0  ;;  %1999 = vrot.lane.b32.xlu1 %v1997_v20, %s6320_s22  ;;  %v5703_v53 = vpack.c.bf16 %v2380_v52, %v2379_v51 }
0x1483   :  { %5700 = vmatprep.subr.bf16.mxu1 %v5699_v48 }
0x1486   :  { %2004 = vrot.lane.b32.xlu0 %v1991_v55, %s6322_s0  ;;  %v5723_v55 = vpack.c.bf16 %v2555_v16, %v2554_v54 }
0x14f0   :  { %v2120_v61 = vpop.permute.xlu0 %2119 }
0x14f1   :  { %2122 = vst.msk [vmem:[#allocation9] sm:$0x3] %vm444_vm2, %v2120_v61  ;;  %2128 = vst.msk [vmem:[#allocation4 + $0x2] sm:$0x3] %vm444_vm2, %v2120_v61 }
0x14f4   :  { %v2125_v62 = vpop.permute.xlu0 %2124  ;;  %v2000_v63 = vpop.permute.xlu1 %1999 }
0x14f5   :  { %2127 = vst.msk [vmem:[#allocation10] sm:$0x3] %vm444_vm2, %v2125_v62  ;;  %2002 = vst.msk [vmem:[#allocation7] sm:$0x3] %vm444_vm2, %v2000_v63 }
0x14f6   :  { %2008 = vst.msk [vmem:[#allocation3 + $0xc] sm:$0x3] %vm444_vm2, %v2000_v63 }
0x14f8   :  { %v2005_v0 = vpop.permute.xlu0 %2004  ;;  %v2250_v1 = vld [vmem:[#allocation9] sm:$0x3] }
0x14f9   :  { %2007 = vst.msk [vmem:[#allocation8] sm:$0x3] %vm444_vm2, %v2005_v0  ;;  %5343 = vmatmul.mubr.msk.f32.vlgmr.msra.gmra.mrb[20].mxu0 %vm257_vm4, %v2250_v1  ;;  %v2556_v0 = vld [vmem:[#allocation20 + $0x10] sm:$0xff]  ;;  %v2557_v1 = vld [vmem:[#allocation20 + $0x18] sm:$0xff] }
0x14fa   :  { %5718 = vmatpush3.bf16.msra.mxu0 %v5715_v46 }
0x14fb   :  { %5720 = vmatprep.subr.bf16.mxu0 %v5719_v35 }
0x14fc   :  { %v2329_v2 = vld [vmem:[#allocation10] sm:$0x3]  ;;  %v2130_v3 = vld [vmem:[#allocation7] sm:$0x3] }
0x14fd   :  { %2338 = vrot.lane.b32.xlu0 %v2329_v2, %s6320_s22  ;;  %5332 = vmatmul.mubr.msk.f32.vlgmr.msra.gmra.mrb[14].mxu1 %vm257_vm4, %v2130_v3  ;;  %v2375_v2 = vld [vmem:[%s7201_s9 + $0x10] sm:$0xff]  ;;  %v2376_v3 = vld [vmem:[%s7201_s9 + $0x18] sm:$0xff] }
0x14fe   :  { %5702 = vmatpush3.bf16.msra.mxu1 %v5699_v48  ;;  %5722 = vmatpush3.bf16.msra.mxu0 %v5719_v35 }
0x14ff   :  { %5704 = vmatprep.subr.bf16.mxu1 %v5703_v53  ;;  %5724 = vmatprep.subr.bf16.mxu0 %v5723_v55 }
0x1500   :  { %v2209_v4 = vld [vmem:[#allocation8] sm:$0x3] }
0x1501   :  { %2218 = vrot.lane.b32.xlu0 %v2209_v4, %s6320_s22 }
0x1502   :  { %5706 = vmatpush3.bf16.msra.mxu1 %v5703_v53 }
0x1503   :  { %5708 = vmatprep.subr.bf16.mxu1 %v5707_v57 }
0x156f   :  { %v2339_v31 = vpop.permute.xlu0 %2338 }
0x1573   :  { %v2219_v36 = vpop.permute.xlu0 %2218 }
0x15cc   :  { %v2324_v6 = vpop.f32.mrb[20].mxu0 }
0x15cd   :  { %v2328_v7 = vadd.f32 %v2324_v6, %v2249_v5  ;;  %v5344_v8 = vpop.f32.mrb[21].mxu0  ;;  %v2372_v6 = vld [vmem:[#allocation4 + $0x8] sm:$0xff] }
0x15ce   :  { %v5711_v8 = vpack.c.bf16 %v2376_v3, %v2375_v2 }
0x15cf   :  { %5977 = vtanh.f32 %v2328_v7  ;;  %v4883_v18 = vmul.f32 -1.442695, %v2328_v7  ;;  %v5727_v7 = vpack.c.bf16 %v2557_v1, %v2556_v0 }
0x15d0   :  { %v2204_v10 = vpop.f32.mrb[14].mxu1 }
0x15d1   :  { %v2208_v11 = vadd.f32 %v2204_v10, %v2129_v9  ;;  %v5333_v12 = vpop.f32.mrb[15].mxu1  ;;  %v2369_v9 = vld [vmem:[#allocation3] sm:$0xff]  ;;  %v2849_v10 = vld [vmem:[#allocation22] sm:$0xff] }
0x15d2   :  { %v2729_v12 = vld [vmem:[#allocation17] sm:$0xff] }
0x15d3   :  { %5979 = vtanh.f32 %v2208_v11  ;;  %v4881_v19 = vmul.f32 -1.442695, %v2208_v11  ;;  %v2850_v11 = vld [vmem:[#allocation22 + $0x8] sm:$0xff] }
0x15d4   :  { %5981 = vpow2.f32 %v4883_v18 }
0x15d5   :  { %5983 = vpow2.f32 %v4881_v19  ;;  %v2851_v19 = vld [vmem:[#allocation22 + $0x10] sm:$0xff] }
0x15d9   :  { %v5978_v13 = vpop.eup %5977 }
0x15da   :  { %2343 = vrot.lane.b32.xlu1 %v5978_v13, %s6321_s5  ;;  %v2730_v13 = vld [vmem:[#allocation17 + $0x8] sm:$0xff] }
0x15db   :  { %v6902_v18 = vpack.c.bf16 %v2730_v13, %v2729_v12 }
0x15dd   :  { %v5980_v14 = vpop.eup %5979 }
0x15de   :  { %2223 = vrot.lane.b32.xlu1 %v5980_v14, %s6321_s5  ;;  %v5982_v21 = vpop.eup %5981  ;;  %v6900_v14 = vpack.c.bf16 %v2850_v11, %v2849_v10 }
0x15df   :  { %v2333_v22 = vadd.f32 1.0, %v5982_v21  ;;  %v5984_v23 = vpop.eup %5983  ;;  %v2852_v21 = vld [vmem:[#allocation22 + $0x18] sm:$0xff] }
0x15e0   :  { %v2213_v24 = vadd.f32 1.0, %v5984_v23  ;;  %v2732_v23 = vld [vmem:[#allocation17 + $0x18] sm:$0xff] }
0x15e1   :  { %5985 = vrcp.f32 %v2333_v22  ;;  %v2731_v22 = vld [vmem:[#allocation17 + $0x10] sm:$0xff] }
0x15e2   :  { %5987 = vrcp.f32 %v2213_v24 }
0x15eb   :  { %v5986_v25 = vpop.eup %5985 }
0x15ec   :  { %v5988_v28 = vpop.eup %5987  ;;  %v2341_v32 = vmul.f32 %v5986_v25, %v2339_v31 }
0x15ed   :  { %v2221_v37 = vmul.f32 %v5988_v28, %v2219_v36 }
0x164c   :  { %v2344_v26 = vpop.permute.xlu1 %2343 }
0x164d   :  { %v2346_v27 = vmul.f32 %v5986_v25, %v2344_v26  ;;  %v6912_v26 = vpack.c.bf16 %v2732_v23, %v2731_v22 }
0x164f   :  { %2348 = vrot.lane.b32.xlu1 %v2346_v27, %s6320_s22 }
0x1650   :  { %v2224_v29 = vpop.permute.xlu1 %2223 }
0x1651   :  { %v2226_v30 = vmul.f32 %v5988_v28, %v2224_v29  ;;  %v4888_v29 = vld [vmem:[#allocation19] ss:$0 sm:$0xff] }
0x1653   :  { %2228 = vrot.lane.b32.xlu1 %v2226_v30, %s6320_s22  ;;  %v4893_v30 = vld [vmem:[#allocation23] ss:$0 sm:$0xff] }
0x16c1   :  { %v2349_v33 = vpop.permute.xlu1 %2348 }
0x16c2   :  { %v2351_v34 = vadd.f32 %v2349_v33, %v2341_v32 }
0x16c4   :  { %5989 = vtanh.f32 %v2351_v34 }
0x16c5   :  { %v2229_v39 = vpop.permute.xlu1 %2228 }
0x16c6   :  { %v2231_v40 = vadd.f32 %v2229_v39, %v2221_v37 }
0x16c8   :  { %5991 = vtanh.f32 %v2231_v40 }
0x16ce   :  { %v5990_v41 = vpop.eup %5989 }
0x16cf   :  { %2354 = vrot.lane.b32.xlu0 %v5990_v41, %s6321_s5 }
0x16d2   :  { %v5992_v42 = vpop.eup %5991 }
0x16d3   :  { %2234 = vrot.lane.b32.xlu1 %v5992_v42, %s6321_s5 }
0x1741   :  { %v2355_v58 = vpop.permute.xlu0 %2354 }
0x1742   :  { %v2357_v59 = vmul.f32 %v5986_v25, %v2355_v58  ;;  %v6910_v25 = vpack.c.bf16 %v2852_v21, %v2851_v19 }
0x1744   :  { %2359 = vrot.lane.b32.xlu0 %v2357_v59, %s6320_s22 }
0x1745   :  { %v2235_v60 = vpop.permute.xlu1 %2234 }
0x1746   :  { %v2237_v20 = vmul.f32 %v5988_v28, %v2235_v60 }
0x1748   :  { %2364 = vrot.lane.b32.xlu0 %v2351_v34, %s6322_s0  ;;  %2239 = vrot.lane.b32.xlu1 %v2237_v20, %s6320_s22 }
0x174c   :  { %2244 = vrot.lane.b32.xlu1 %v2231_v40, %s6322_s0 }
0x17b6   :  { %v2360_v61 = vpop.permute.xlu0 %2359 }
0x17b7   :  { %2362 = vst.msk [vmem:[#allocation9] sm:$0x3] %vm444_vm2, %v2360_v61  ;;  %2368 = vst.msk [vmem:[#allocation4] sm:$0x3] %vm444_vm2, %v2360_v61 }
0x17b8   :  { %2725 = vst.msk [vmem:[#allocation9] sm:$0x3] %vm444_vm2, %v6318_v17 }
0x17ba   :  { %v2365_v62 = vpop.permute.xlu0 %2364  ;;  %v2240_v63 = vpop.permute.xlu1 %2239 }
0x17bb   :  { %2367 = vst.msk [vmem:[#allocation10] sm:$0x3] %vm444_vm2, %v2365_v62  ;;  %2242 = vst.msk [vmem:[#allocation7] sm:$0x3] %vm444_vm2, %v2240_v63 }
0x17bc   :  { %2248 = vst.msk [vmem:[#allocation3 + $0xe] sm:$0x3] %vm444_vm2, %v2240_v63  ;;  %2726 = vst.msk [vmem:[#allocation10] sm:$0x3] %vm444_vm2, %v6318_v17 }
0x17bd   :  { %2723 = vst.msk [vmem:[#allocation7] sm:$0x3] %vm444_vm2, %v6318_v17 }
0x17be   :  { %v2245_v4 = vpop.permute.xlu1 %2244  ;;  %v2371_v5 = vld [vmem:[#allocation4] sm:$0xff] }
0x17bf   :  { %2247 = vst.msk [vmem:[#allocation8] sm:$0x3] %vm444_vm2, %v2245_v4  ;;  %5353 = vmatprep.mubr.msk.f32.mxu1 %vm257_vm4, %v2371_v5  ;;  %5375 = vmatprep.mubr.msk.f32.mxu0 %vm257_vm4, %v2371_v5  ;;  %v2848_v27 = vld [vmem:[#allocation9] sm:$0x3] }
0x17c0   :  { %2724 = vst.msk [vmem:[#allocation8] sm:$0x3] %vm444_vm2, %v6318_v17  ;;  %5354 = vmatmul.mubr.msk.f32.vlgmr.msra.gmra.mrb[16].mxu1 %vm257_vm4, %v2372_v6  ;;  %5376 = vmatmul.mubr.msk.f32.vlgmr.msra.gmra.mrb[22].mxu0 %vm257_vm4, %v2372_v6 }
0x17c1   :  { %5726 = vmatpush3.bf16.msra.mxu0 %v5723_v55  ;;  %5710 = vmatpush3.bf16.msra.mxu1 %v5707_v57 }
0x17c2   :  { %5364 = vmatprep.mubr.msk.f32.mxu1 %vm257_vm4, %v2369_v9  ;;  %5386 = vmatprep.mubr.msk.f32.mxu0 %vm257_vm4, %v2369_v9 }
0x17c3   :  { %5728 = vmatprep.subr.bf16.mxu0 %v5727_v7  ;;  %5712 = vmatprep.subr.bf16.mxu1 %v5711_v8  ;;  %v2370_v24 = vld [vmem:[#allocation3 + $0x8] sm:$0xff]  ;;  %v2927_v51 = vld [vmem:[#allocation10] sm:$0x3] }
0x17c4   :  { %v2728_v28 = vld [vmem:[#allocation7] sm:$0x3] }
0x17c5   :  { %5730 = vmatpush3.bf16.msra.mxu0 %v5727_v7  ;;  %5714 = vmatpush3.bf16.msra.mxu1 %v5711_v8 }
0x17c6   :  { %5737 = vmatprep.subr.bf16.mxu0 %v6317_v15  ;;  %5731 = vmatprep.subr.bf16.mxu1 %v6317_v15 }
0x17c7   :  { %v2807_v35 = vld [vmem:[#allocation8] sm:$0x3] }
0x17c8   :  { %5365 = vmatmul.mubr.msk.f32.vlgmr.msra.gmra.mrb[16].mxu1 %vm257_vm4, %v2370_v24  ;;  %5387 = vmatmul.mubr.msk.f32.vlgmr.msra.gmra.mrb[22].mxu0 %vm257_vm4, %v2370_v24 }
0x17c9   :  { %5739 = vmatpush3.bf16.msra.mxu0 %v6900_v14  ;;  %5733 = vmatpush3.bf16.msra.mxu1 %v6902_v18 }
0x17ca   :  { %5740 = vmatprep.subr.bf16.mxu0 %v6317_v15  ;;  %5734 = vmatprep.subr.bf16.mxu1 %v6317_v15 }
0x17cb   :  { %5408 = vmatprep.mubr.msk.f32.mxu0 %vm6319_vm3, %v6318_v17  ;;  %5397 = vmatprep.mubr.msk.f32.mxu1 %vm6319_vm3, %v6318_v17 }
0x17cd   :  { %5742 = vmatpush3.bf16.msra.mxu0 %v6910_v25  ;;  %5736 = vmatpush3.bf16.msra.mxu1 %v6912_v26 }
0x17ce   :  { %5749 = vmatprep.subr.bf16.mxu0 %v6317_v15  ;;  %5743 = vmatprep.subr.bf16.mxu1 %v6317_v15 }
0x17d0   :  { %5409 = vmatmul.mubr.msk.f32.vlgmr.msra.gmra.mrb[24].mxu0 %vm257_vm4, %v2848_v27  ;;  %5398 = vmatmul.mubr.msk.f32.vlgmr.msra.gmra.mrb[18].mxu1 %vm257_vm4, %v2728_v28 }
0x17d1   :  { %5751 = vmatpush3.bf16.msra.mxu0 %v6900_v14  ;;  %5745 = vmatpush3.bf16.msra.mxu1 %v6902_v18 }
0x17d2   :  { %5752 = vmatprep.subr.bf16.mxu0 %v6317_v15  ;;  %5430 = vmatprep.mubr.msk.f32.mxu0 %vm6319_vm3, %v6318_v17 }
0x17d3   :  { %5746 = vmatprep.subr.bf16.mxu1 %v6317_v15  ;;  %5419 = vmatprep.mubr.msk.f32.mxu1 %vm6319_vm3, %v6318_v17 }
0x17d5   :  { %5754 = vmatpush3.bf16.msra.mxu0 %v6910_v25  ;;  %5748 = vmatpush3.bf16.msra.mxu1 %v6912_v26 }
0x17d6   :  { %5761 = vmatprep.subr.bf16.mxu0 %v6317_v15  ;;  %5755 = vmatprep.subr.bf16.mxu1 %v6317_v15 }
0x189b   :  { %v5366_v31 = vpop.f32.mrb[16].mxu1  ;;  %v5388_v32 = vpop.f32.mrb[22].mxu0 }
0x189c   :  { %v2551_v33 = vadd.f32 %v5366_v31, %v4888_v29  ;;  %v2720_v34 = vadd.f32 %v5388_v32, %v4893_v30  ;;  %v2534_v36 = vpop.f32.mrb[17].mxu1  ;;  %v2703_v37 = vpop.f32.mrb[23].mxu0 }
0x189d   :  { %v2550_v39 = vadd.f32 %v4888_v29, %v2534_v36  ;;  %v2719_v40 = vadd.f32 %v4893_v30, %v2703_v37 }
0x189e   :  { %2553 = vst [vmem:[#allocation5 + $0x8] sm:$0xff] %v2551_v33  ;;  %2722 = vst [vmem:[#allocation6 + $0x8] sm:$0xff] %v2720_v34 }
0x189f   :  { %2552 = vst [vmem:[#allocation5] sm:$0xff] %v2550_v39  ;;  %2721 = vst [vmem:[#allocation6] sm:$0xff] %v2719_v40 }
0x18a3   :  { %v2922_v41 = vpop.f32.mrb[24].mxu0  ;;  %v2802_v42 = vpop.f32.mrb[18].mxu1 }
0x18a4   :  { %v5410_v43 = vpop.f32.mrb[25].mxu0  ;;  %v5399_v44 = vpop.f32.mrb[19].mxu1 }
0x18a5   :  { %v2847_v45 = vld [vmem:[#allocation6 + $0xe] sm:$0x3]  ;;  %v3087_v27 = vld [vmem:[#allocation6 + $0xc] sm:$0x3] }
0x18a6   :  { %v2926_v46 = vadd.f32 %v2922_v41, %v2847_v45  ;;  %v2727_v47 = vld [vmem:[#allocation5] sm:$0x3]  ;;  %v2967_v31 = vld [vmem:[#allocation5 + $0x2] sm:$0x3] }
0x18a7   :  { %v2806_v48 = vadd.f32 %v2802_v42, %v2727_v47 }
0x18a8   :  { %5993 = vtanh.f32 %v2926_v46  ;;  %v4897_v52 = vmul.f32 -1.442695, %v2926_v46 }
0x18a9   :  { %5995 = vtanh.f32 %v2806_v48  ;;  %v4895_v53 = vmul.f32 -1.442695, %v2806_v48 }
0x18aa   :  { %5997 = vpow2.f32 %v4897_v52 }
0x18ab   :  { %5999 = vpow2.f32 %v4895_v53 }
0x18b2   :  { %v5994_v49 = vpop.eup %5993 }
0x18b3   :  { %v5996_v50 = vpop.eup %5995  ;;  %2941 = vrot.lane.b32.xlu0 %v5994_v49, %s6321_s5 }
0x18b4   :  { %2821 = vrot.lane.b32.xlu1 %v5996_v50, %s6321_s5  ;;  %v5998_v54 = vpop.eup %5997 }
0x18b5   :  { %v2931_v16 = vadd.f32 1.0, %v5998_v54  ;;  %v6000_v38 = vpop.eup %5999 }
0x18b6   :  { %v2811_v55 = vadd.f32 1.0, %v6000_v38 }
0x18b7   :  { %2936 = vrot.lane.b32.xlu0 %v2927_v51, %s6320_s22  ;;  %6001 = vrcp.f32 %v2931_v16 }
0x18b8   :  { %6003 = vrcp.f32 %v2811_v55 }
0x18bb   :  { %2816 = vrot.lane.b32.xlu0 %v2807_v35, %s6320_s22 }
0x18c1   :  { %v6002_v56 = vpop.eup %6001 }
0x18c2   :  { %v6004_v60 = vpop.eup %6003 }
0x1925   :  { %v2942_v57 = vpop.permute.xlu0 %2941 }
0x1926   :  { %v2944_v58 = vmul.f32 %v6002_v56, %v2942_v57  ;;  %v2822_v59 = vpop.permute.xlu1 %2821 }
0x1927   :  { %v2824_v20 = vmul.f32 %v6004_v60, %v2822_v59 }
0x1928   :  { %2946 = vrot.lane.b32.xlu1 %v2944_v58, %s6320_s22 }
0x1929   :  { %v2937_v61 = vpop.permute.xlu0 %2936 }
0x192a   :  { %v2939_v62 = vmul.f32 %v6002_v56, %v2937_v61 }
0x192c   :  { %2826 = vrot.lane.b32.xlu1 %v2824_v20, %s6320_s22 }
0x192d   :  { %v2817_v63 = vpop.permute.xlu0 %2816 }
0x192e   :  { %v2819_v2 = vmul.f32 %v6004_v60, %v2817_v63 }
0x199a   :  { %v2947_v0 = vpop.permute.xlu1 %2946 }
0x199b   :  { %v2949_v1 = vadd.f32 %v2947_v0, %v2939_v62 }
0x199d   :  { %6005 = vtanh.f32 %v2949_v1 }
0x199e   :  { %v2827_v3 = vpop.permute.xlu1 %2826 }
0x199f   :  { %v2829_v4 = vadd.f32 %v2827_v3, %v2819_v2 }
0x19a1   :  { %6007 = vtanh.f32 %v2829_v4 }
0x19a7   :  { %v6006_v5 = vpop.eup %6005 }
0x19a8   :  { %2952 = vrot.lane.b32.xlu0 %v6006_v5, %s6321_s5  ;;  %v3327_v5 = vld [vmem:[#allocation6 + $0xa] sm:$0x3] }
0x19ab   :  { %v6008_v6 = vpop.eup %6007 }
0x19ac   :  { %2832 = vrot.lane.b32.xlu1 %v6008_v6, %s6321_s5 }
0x1a1a   :  { %v2953_v7 = vpop.permute.xlu0 %2952 }
0x1a1b   :  { %v2955_v8 = vmul.f32 %v6002_v56, %v2953_v7 }
0x1a1d   :  { %2957 = vrot.lane.b32.xlu0 %v2955_v8, %s6320_s22 }
0x1a1e   :  { %v2833_v9 = vpop.permute.xlu1 %2832 }
0x1a1f   :  { %v2835_v10 = vmul.f32 %v6004_v60, %v2833_v9  ;;  %v3207_v9 = vld [vmem:[#allocation5 + $0x4] sm:$0x3] }
0x1a21   :  { %2962 = vrot.lane.b32.xlu0 %v2949_v1, %s6322_s0  ;;  %2837 = vrot.lane.b32.xlu1 %v2835_v10, %s6320_s22 }
0x1a25   :  { %2842 = vrot.lane.b32.xlu0 %v2829_v4, %s6322_s0 }
0x1a8f   :  { %v2958_v11 = vpop.permute.xlu0 %2957 }
0x1a90   :  { %2960 = vst.msk [vmem:[#allocation9] sm:$0x3] %vm444_vm2, %v2958_v11  ;;  %2966 = vst.msk [vmem:[#allocation4 + $0xe] sm:$0x3] %vm444_vm2, %v2958_v11 }
0x1a93   :  { %v2963_v12 = vpop.permute.xlu0 %2962  ;;  %v2838_v13 = vpop.permute.xlu1 %2837 }
0x1a94   :  { %2965 = vst.msk [vmem:[#allocation10] sm:$0x3] %vm444_vm2, %v2963_v12  ;;  %2840 = vst.msk [vmem:[#allocation7] sm:$0x3] %vm444_vm2, %v2838_v13 }
0x1a95   :  { %2846 = vst.msk [vmem:[#allocation3] sm:$0x3] %vm444_vm2, %v2838_v13 }
0x1a97   :  { %v2843_v19 = vpop.permute.xlu0 %2842  ;;  %v3088_v21 = vld [vmem:[#allocation9] sm:$0x3] }
0x1a98   :  { %2845 = vst.msk [vmem:[#allocation8] sm:$0x3] %vm444_vm2, %v2843_v19  ;;  %5431 = vmatmul.mubr.msk.f32.vlgmr.msra.gmra.mrb[26].mxu0 %vm257_vm4, %v3088_v21 }
0x1a99   :  { %5763 = vmatpush3.bf16.msra.mxu0 %v6900_v14  ;;  %5452 = vmatprep.mubr.msk.f32.mxu0 %vm6319_vm3, %v6318_v17 }
0x1a9a   :  { %5764 = vmatprep.subr.bf16.mxu0 %v6317_v15 }
0x1a9b   :  { %v3167_v22 = vld [vmem:[#allocation10] sm:$0x3]  ;;  %v2968_v23 = vld [vmem:[#allocation7] sm:$0x3] }
0x1a9c   :  { %3176 = vrot.lane.b32.xlu0 %v3167_v22, %s6320_s22  ;;  %5420 = vmatmul.mubr.msk.f32.vlgmr.msra.gmra.mrb[20].mxu1 %vm257_vm4, %v2968_v23 }
0x1a9d   :  { %5757 = vmatpush3.bf16.msra.mxu1 %v6902_v18  ;;  %5766 = vmatpush3.bf16.msra.mxu0 %v6910_v25 }
0x1a9e   :  { %5758 = vmatprep.subr.bf16.mxu1 %v6317_v15  ;;  %5441 = vmatprep.mubr.msk.f32.mxu1 %vm6319_vm3, %v6318_v17 }
0x1a9f   :  { %v3047_v24 = vld [vmem:[#allocation8] sm:$0x3]  ;;  %5773 = vmatprep.subr.bf16.mxu0 %v6317_v15 }
0x1aa0   :  { %3056 = vrot.lane.b32.xlu0 %v3047_v24, %s6320_s22 }
0x1aa1   :  { %5760 = vmatpush3.bf16.msra.mxu1 %v6912_v26 }
0x1aa2   :  { %5767 = vmatprep.subr.bf16.mxu1 %v6317_v15 }
0x1b0e   :  { %v3177_v51 = vpop.permute.xlu0 %3176 }
0x1b12   :  { %v3057_v54 = vpop.permute.xlu0 %3056 }
0x1b6b   :  { %v3162_v28 = vpop.f32.mrb[26].mxu0 }
0x1b6c   :  { %v3166_v29 = vadd.f32 %v3162_v28, %v3087_v27  ;;  %v5432_v30 = vpop.f32.mrb[27].mxu0 }
0x1b6e   :  { %6009 = vtanh.f32 %v3166_v29  ;;  %v4901_v39 = vmul.f32 -1.442695, %v3166_v29 }
0x1b6f   :  { %v3042_v32 = vpop.f32.mrb[20].mxu1 }
0x1b70   :  { %v3046_v33 = vadd.f32 %v3042_v32, %v2967_v31  ;;  %v5421_v34 = vpop.f32.mrb[21].mxu1 }
0x1b72   :  { %6011 = vtanh.f32 %v3046_v33  ;;  %v4899_v40 = vmul.f32 -1.442695, %v3046_v33 }
0x1b73   :  { %6013 = vpow2.f32 %v4901_v39 }
0x1b74   :  { %6015 = vpow2.f32 %v4899_v40 }
0x1b78   :  { %v6010_v36 = vpop.eup %6009 }
0x1b79   :  { %3181 = vrot.lane.b32.xlu1 %v6010_v36, %s6321_s5 }
0x1b7c   :  { %v6012_v37 = vpop.eup %6011 }
0x1b7d   :  { %3061 = vrot.lane.b32.xlu1 %v6012_v37, %s6321_s5  ;;  %v6014_v41 = vpop.eup %6013 }
0x1b7e   :  { %v3171_v42 = vadd.f32 1.0, %v6014_v41  ;;  %v6016_v43 = vpop.eup %6015 }
0x1b7f   :  { %v3051_v44 = vadd.f32 1.0, %v6016_v43 }
0x1b80   :  { %6017 = vrcp.f32 %v3171_v42 }
0x1b81   :  { %6019 = vrcp.f32 %v3051_v44 }
0x1b8a   :  { %v6018_v45 = vpop.eup %6017 }
0x1b8b   :  { %v6020_v48 = vpop.eup %6019  ;;  %v3179_v35 = vmul.f32 %v6018_v45, %v3177_v51 }
0x1b8c   :  { %v3059_v16 = vmul.f32 %v6020_v48, %v3057_v54 }
0x1beb   :  { %v3182_v46 = vpop.permute.xlu1 %3181 }
0x1bec   :  { %v3184_v47 = vmul.f32 %v6018_v45, %v3182_v46 }
0x1bee   :  { %3186 = vrot.lane.b32.xlu1 %v3184_v47, %s6320_s22 }
0x1bef   :  { %v3062_v49 = vpop.permute.xlu1 %3061 }
0x1bf0   :  { %v3064_v50 = vmul.f32 %v6020_v48, %v3062_v49 }
0x1bf2   :  { %3066 = vrot.lane.b32.xlu1 %v3064_v50, %s6320_s22 }
0x1c60   :  { %v3187_v52 = vpop.permute.xlu1 %3186 }
0x1c61   :  { %v3189_v53 = vadd.f32 %v3187_v52, %v3179_v35 }
0x1c63   :  { %6021 = vtanh.f32 %v3189_v53 }
0x1c64   :  { %v3067_v38 = vpop.permute.xlu1 %3066 }
0x1c65   :  { %v3069_v55 = vadd.f32 %v3067_v38, %v3059_v16 }
0x1c67   :  { %6023 = vtanh.f32 %v3069_v55 }
0x1c6d   :  { %v6022_v56 = vpop.eup %6021 }
0x1c6e   :  { %3192 = vrot.lane.b32.xlu0 %v6022_v56, %s6321_s5  ;;  %v3567_v56 = vld [vmem:[#allocation6 + $0x8] sm:$0x3] }
0x1c71   :  { %v6024_v57 = vpop.eup %6023 }
0x1c72   :  { %3072 = vrot.lane.b32.xlu1 %v6024_v57, %s6321_s5 }
0x1ce0   :  { %v3193_v58 = vpop.permute.xlu0 %3192 }
0x1ce1   :  { %v3195_v59 = vmul.f32 %v6018_v45, %v3193_v58 }
0x1ce3   :  { %3197 = vrot.lane.b32.xlu0 %v3195_v59, %s6320_s22 }
0x1ce4   :  { %v3073_v60 = vpop.permute.xlu1 %3072 }
0x1ce5   :  { %v3075_v20 = vmul.f32 %v6020_v48, %v3073_v60  ;;  %v3447_v60 = vld [vmem:[#allocation5 + $0x6] sm:$0x3] }
0x1ce7   :  { %3202 = vrot.lane.b32.xlu0 %v3189_v53, %s6322_s0  ;;  %3077 = vrot.lane.b32.xlu1 %v3075_v20, %s6320_s22 }
0x1ceb   :  { %3082 = vrot.lane.b32.xlu0 %v3069_v55, %s6322_s0 }
0x1d55   :  { %v3198_v61 = vpop.permute.xlu0 %3197 }
0x1d56   :  { %3206 = vst.msk [vmem:[#allocation4 + $0xc] sm:$0x3] %vm444_vm2, %v3198_v61  ;;  %3200 = vst.msk [vmem:[#allocation9] sm:$0x3] %vm444_vm2, %v3198_v61 }
0x1d59   :  { %v3203_v62 = vpop.permute.xlu0 %3202  ;;  %v3078_v63 = vpop.permute.xlu1 %3077 }
0x1d5a   :  { %3205 = vst.msk [vmem:[#allocation10] sm:$0x3] %vm444_vm2, %v3203_v62  ;;  %3086 = vst.msk [vmem:[#allocation3 + $0x2] sm:$0x3] %vm444_vm2, %v3078_v63 }
0x1d5b   :  { %3080 = vst.msk [vmem:[#allocation7] sm:$0x3] %vm444_vm2, %v3078_v63 }
0x1d5d   :  { %v3083_v0 = vpop.permute.xlu0 %3082  ;;  %v3328_v1 = vld [vmem:[#allocation9] sm:$0x3] }
0x1d5e   :  { %3085 = vst.msk [vmem:[#allocation8] sm:$0x3] %vm444_vm2, %v3083_v0  ;;  %5453 = vmatmul.mubr.msk.f32.vlgmr.msra.gmra.mrb[28].mxu0 %vm257_vm4, %v3328_v1 }
0x1d5f   :  { %5775 = vmatpush3.bf16.msra.mxu0 %v6900_v14  ;;  %5474 = vmatprep.mubr.msk.f32.mxu0 %vm6319_vm3, %v6318_v17 }
0x1d60   :  { %5776 = vmatprep.subr.bf16.mxu0 %v6317_v15 }
0x1d61   :  { %v3407_v2 = vld [vmem:[#allocation10] sm:$0x3] }
0x1d62   :  { %v3208_v3 = vld [vmem:[#allocation7] sm:$0x3]  ;;  %3416 = vrot.lane.b32.xlu0 %v3407_v2, %s6320_s22 }
0x1d63   :  { %5442 = vmatmul.mubr.msk.f32.vlgmr.msra.gmra.mrb[22].mxu1 %vm257_vm4, %v3208_v3  ;;  %5778 = vmatpush3.bf16.msra.mxu0 %v6910_v25 }
0x1d64   :  { %5769 = vmatpush3.bf16.msra.mxu1 %v6902_v18  ;;  %5463 = vmatprep.mubr.msk.f32.mxu1 %vm6319_vm3, %v6318_v17 }
0x1d65   :  { %5770 = vmatprep.subr.bf16.mxu1 %v6317_v15  ;;  %v3287_v4 = vld [vmem:[#allocation8] sm:$0x3]  ;;  %5785 = vmatprep.subr.bf16.mxu0 %v6317_v15 }
0x1d66   :  { %3296 = vrot.lane.b32.xlu0 %v3287_v4, %s6320_s22 }
0x1d68   :  { %5772 = vmatpush3.bf16.msra.mxu1 %v6912_v26 }
0x1d69   :  { %5779 = vmatprep.subr.bf16.mxu1 %v6317_v15 }
0x1dd4   :  { %v3417_v36 = vpop.permute.xlu0 %3416 }
0x1dd8   :  { %v3297_v41 = vpop.permute.xlu0 %3296 }
0x1e31   :  { %v3402_v6 = vpop.f32.mrb[28].mxu0 }
0x1e32   :  { %v3406_v7 = vadd.f32 %v3402_v6, %v3327_v5  ;;  %v5454_v8 = vpop.f32.mrb[29].mxu0 }
0x1e34   :  { %6025 = vtanh.f32 %v3406_v7  ;;  %v4905_v21 = vmul.f32 -1.442695, %v3406_v7 }
0x1e36   :  { %v3282_v10 = vpop.f32.mrb[22].mxu1 }
0x1e37   :  { %v3286_v11 = vadd.f32 %v3282_v10, %v3207_v9  ;;  %v5443_v12 = vpop.f32.mrb[23].mxu1 }
0x1e39   :  { %6027 = vtanh.f32 %v3286_v11  ;;  %v4903_v22 = vmul.f32 -1.442695, %v3286_v11 }
0x1e3a   :  { %6029 = vpow2.f32 %v4905_v21 }
0x1e3b   :  { %6031 = vpow2.f32 %v4903_v22 }
0x1e3e   :  { %v6026_v13 = vpop.eup %6025 }
0x1e3f   :  { %3421 = vrot.lane.b32.xlu1 %v6026_v13, %s6321_s5 }
0x1e43   :  { %v6028_v19 = vpop.eup %6027 }
0x1e44   :  { %3301 = vrot.lane.b32.xlu1 %v6028_v19, %s6321_s5  ;;  %v6030_v23 = vpop.eup %6029 }
0x1e45   :  { %v3411_v24 = vadd.f32 1.0, %v6030_v23  ;;  %v6032_v27 = vpop.eup %6031 }
0x1e46   :  { %v3291_v28 = vadd.f32 1.0, %v6032_v27 }
0x1e47   :  { %6033 = vrcp.f32 %v3411_v24 }
0x1e48   :  { %6035 = vrcp.f32 %v3291_v28 }
0x1e51   :  { %v6034_v29 = vpop.eup %6033 }
0x1e52   :  { %v6036_v32 = vpop.eup %6035  ;;  %v3419_v37 = vmul.f32 %v6034_v29, %v3417_v36 }
0x1e53   :  { %v3299_v42 = vmul.f32 %v6036_v32, %v3297_v41 }
0x1eb1   :  { %v3422_v30 = vpop.permute.xlu1 %3421 }
0x1eb2   :  { %v3424_v31 = vmul.f32 %v6034_v29, %v3422_v30 }
0x1eb4   :  { %3426 = vrot.lane.b32.xlu1 %v3424_v31, %s6320_s22 }
0x1eb6   :  { %v3302_v33 = vpop.permute.xlu1 %3301 }
0x1eb7   :  { %v3304_v34 = vmul.f32 %v6036_v32, %v3302_v33 }
0x1eb9   :  { %3306 = vrot.lane.b32.xlu1 %v3304_v34, %s6320_s22 }
0x1f26   :  { %v3427_v39 = vpop.permute.xlu1 %3426 }
0x1f27   :  { %v3429_v40 = vadd.f32 %v3427_v39, %v3419_v37 }
0x1f29   :  { %6037 = vtanh.f32 %v3429_v40 }
0x1f2b   :  { %v3307_v43 = vpop.permute.xlu1 %3306 }
0x1f2c   :  { %v3309_v44 = vadd.f32 %v3307_v43, %v3299_v42 }
0x1f2e   :  { %6039 = vtanh.f32 %v3309_v44 }
0x1f33   :  { %v6038_v45 = vpop.eup %6037 }
0x1f34   :  { %3432 = vrot.lane.b32.xlu0 %v6038_v45, %s6321_s5 }
0x1f38   :  { %v6040_v46 = vpop.eup %6039 }
0x1f39   :  { %3312 = vrot.lane.b32.xlu1 %v6040_v46, %s6321_s5 }
0x1fa6   :  { %v3433_v47 = vpop.permute.xlu0 %3432 }
0x1fa7   :  { %v3435_v48 = vmul.f32 %v6034_v29, %v3433_v47 }
0x1fa9   :  { %3437 = vrot.lane.b32.xlu0 %v3435_v48, %s6320_s22 }
0x1fab   :  { %v3313_v49 = vpop.permute.xlu1 %3312 }
0x1fac   :  { %v3315_v50 = vmul.f32 %v6036_v32, %v3313_v49 }
0x1fad   :  { %3442 = vrot.lane.b32.xlu0 %v3429_v40, %s6322_s0 }
0x1fae   :  { %3317 = vrot.lane.b32.xlu1 %v3315_v50, %s6320_s22 }
0x1fb1   :  { %3322 = vrot.lane.b32.xlu0 %v3309_v44, %s6322_s0  ;;  %v3807_v44 = vld [vmem:[#allocation6 + $0x6] sm:$0x3] }
0x201b   :  { %v3438_v51 = vpop.permute.xlu0 %3437 }
0x201c   :  { %3446 = vst.msk [vmem:[#allocation4 + $0xa] sm:$0x3] %vm444_vm2, %v3438_v51  ;;  %3440 = vst.msk [vmem:[#allocation9] sm:$0x3] %vm444_vm2, %v3438_v51 }
0x201f   :  { %v3443_v35 = vpop.permute.xlu0 %3442 }
0x2020   :  { %v3318_v52 = vpop.permute.xlu1 %3317  ;;  %3445 = vst.msk [vmem:[#allocation10] sm:$0x3] %vm444_vm2, %v3443_v35 }
0x2021   :  { %3326 = vst.msk [vmem:[#allocation3 + $0x4] sm:$0x3] %vm444_vm2, %v3318_v52  ;;  %3320 = vst.msk [vmem:[#allocation7] sm:$0x3] %vm444_vm2, %v3318_v52 }
0x2023   :  { %v3323_v53 = vpop.permute.xlu0 %3322  ;;  %v3568_v54 = vld [vmem:[#allocation9] sm:$0x3] }
0x2024   :  { %3325 = vst.msk [vmem:[#allocation8] sm:$0x3] %vm444_vm2, %v3323_v53  ;;  %5475 = vmatmul.mubr.msk.f32.vlgmr.msra.gmra.mrb[30].mxu0 %vm257_vm4, %v3568_v54 }
0x2025   :  { %5787 = vmatpush3.bf16.msra.mxu0 %v6900_v14  ;;  %5496 = vmatprep.mubr.msk.f32.mxu0 %vm6319_vm3, %v6318_v17 }
0x2026   :  { %5788 = vmatprep.subr.bf16.mxu0 %v6317_v15 }
0x2027   :  { %v3647_v16 = vld [vmem:[#allocation10] sm:$0x3] }
0x2028   :  { %v3448_v38 = vld [vmem:[#allocation7] sm:$0x3]  ;;  %3656 = vrot.lane.b32.xlu0 %v3647_v16, %s6320_s22 }
0x2029   :  { %5464 = vmatmul.mubr.msk.f32.vlgmr.msra.gmra.mrb[24].mxu1 %vm257_vm4, %v3448_v38  ;;  %5790 = vmatpush3.bf16.msra.mxu0 %v6910_v25 }
0x202a   :  { %5781 = vmatpush3.bf16.msra.mxu1 %v6902_v18  ;;  %5485 = vmatprep.mubr.msk.f32.mxu1 %vm6319_vm3, %v6318_v17 }
0x202b   :  { %5782 = vmatprep.subr.bf16.mxu1 %v6317_v15  ;;  %v3527_v55 = vld [vmem:[#allocation8] sm:$0x3]  ;;  %5797 = vmatprep.subr.bf16.mxu0 %v6317_v15 }
0x202c   :  { %3536 = vrot.lane.b32.xlu0 %v3527_v55, %s6320_s22 }
0x202e   :  { %5784 = vmatpush3.bf16.msra.mxu1 %v6912_v26 }
0x202f   :  { %5791 = vmatprep.subr.bf16.mxu1 %v6317_v15 }
0x209a   :  { %v3657_v13 = vpop.permute.xlu0 %3656 }
0x209e   :  { %v3537_v23 = vpop.permute.xlu0 %3536 }
0x20f7   :  { %v3642_v57 = vpop.f32.mrb[30].mxu0 }
0x20f8   :  { %v3646_v58 = vadd.f32 %v3642_v57, %v3567_v56  ;;  %v5476_v59 = vpop.f32.mrb[31].mxu0 }
0x20fa   :  { %6041 = vtanh.f32 %v3646_v58  ;;  %v4909_v1 = vmul.f32 -1.442695, %v3646_v58 }
0x20fc   :  { %v3522_v20 = vpop.f32.mrb[24].mxu1 }
0x20fd   :  { %v3526_v61 = vadd.f32 %v3522_v20, %v3447_v60  ;;  %v5465_v62 = vpop.f32.mrb[25].mxu1 }
0x20ff   :  { %6043 = vtanh.f32 %v3526_v61  ;;  %v4907_v2 = vmul.f32 -1.442695, %v3526_v61 }
0x2100   :  { %6045 = vpow2.f32 %v4909_v1 }
0x2101   :  { %6047 = vpow2.f32 %v4907_v2 }
0x2104   :  { %v6042_v63 = vpop.eup %6041 }
0x2105   :  { %3661 = vrot.lane.b32.xlu1 %v6042_v63, %s6321_s5 }
0x2109   :  { %v6044_v0 = vpop.eup %6043 }
0x210a   :  { %3541 = vrot.lane.b32.xlu1 %v6044_v0, %s6321_s5  ;;  %v6046_v3 = vpop.eup %6045 }
0x210b   :  { %v3651_v4 = vadd.f32 1.0, %v6046_v3  ;;  %v6048_v5 = vpop.eup %6047 }
0x210c   :  { %v3531_v6 = vadd.f32 1.0, %v6048_v5 }
0x210d   :  { %6049 = vrcp.f32 %v3651_v4 }
0x210e   :  { %6051 = vrcp.f32 %v3531_v6 }
0x2117   :  { %v6050_v7 = vpop.eup %6049 }
0x2118   :  { %v6052_v10 = vpop.eup %6051  ;;  %v3659_v19 = vmul.f32 %v6050_v7, %v3657_v13 }
0x2119   :  { %v3539_v24 = vmul.f32 %v6052_v10, %v3537_v23  ;;  %v4047_v23 = vld [vmem:[#allocation6 + $0x4] sm:$0x3] }
0x2177   :  { %v3662_v8 = vpop.permute.xlu1 %3661 }
0x2178   :  { %v3664_v9 = vmul.f32 %v6050_v7, %v3662_v8 }
0x217a   :  { %3666 = vrot.lane.b32.xlu1 %v3664_v9, %s6320_s22 }
0x217c   :  { %v3542_v11 = vpop.permute.xlu1 %3541 }
0x217d   :  { %v3544_v12 = vmul.f32 %v6052_v10, %v3542_v11 }
0x217f   :  { %3546 = vrot.lane.b32.xlu1 %v3544_v12, %s6320_s22 }
0x21ec   :  { %v3667_v21 = vpop.permute.xlu1 %3666 }
0x21ed   :  { %v3669_v22 = vadd.f32 %v3667_v21, %v3659_v19 }
0x21ef   :  { %6053 = vtanh.f32 %v3669_v22 }
0x21f1   :  { %v3547_v27 = vpop.permute.xlu1 %3546 }
0x21f2   :  { %v3549_v28 = vadd.f32 %v3547_v27, %v3539_v24 }
0x21f4   :  { %6055 = vtanh.f32 %v3549_v28 }
0x21f9   :  { %v6054_v29 = vpop.eup %6053 }
0x21fa   :  { %3672 = vrot.lane.b32.xlu0 %v6054_v29, %s6321_s5  ;;  %v3927_v29 = vld [vmem:[#allocation5 + $0xa] sm:$0x3] }
0x21fe   :  { %v6056_v30 = vpop.eup %6055 }
0x21ff   :  { %3552 = vrot.lane.b32.xlu1 %v6056_v30, %s6321_s5 }
0x226c   :  { %v3673_v31 = vpop.permute.xlu0 %3672 }
0x226d   :  { %v3675_v32 = vmul.f32 %v6050_v7, %v3673_v31 }
0x226f   :  { %3677 = vrot.lane.b32.xlu0 %v3675_v32, %s6320_s22 }
0x2271   :  { %v3553_v33 = vpop.permute.xlu1 %3552 }
0x2272   :  { %v3555_v34 = vmul.f32 %v6052_v10, %v3553_v33 }
0x2273   :  { %3682 = vrot.lane.b32.xlu0 %v3669_v22, %s6322_s0 }
0x2274   :  { %3557 = vrot.lane.b32.xlu1 %v3555_v34, %s6320_s22 }
0x2277   :  { %3562 = vrot.lane.b32.xlu0 %v3549_v28, %s6322_s0 }
0x22e1   :  { %v3678_v36 = vpop.permute.xlu0 %3677 }
0x22e2   :  { %3686 = vst.msk [vmem:[#allocation4 + $0x8] sm:$0x3] %vm444_vm2, %v3678_v36  ;;  %3680 = vst.msk [vmem:[#allocation9] sm:$0x3] %vm444_vm2, %v3678_v36 }
0x22e5   :  { %v3683_v37 = vpop.permute.xlu0 %3682 }
0x22e6   :  { %v3558_v39 = vpop.permute.xlu1 %3557  ;;  %3685 = vst.msk [vmem:[#allocation10] sm:$0x3] %vm444_vm2, %v3683_v37 }
0x22e7   :  { %3566 = vst.msk [vmem:[#allocation3 + $0x6] sm:$0x3] %vm444_vm2, %v3558_v39  ;;  %3560 = vst.msk [vmem:[#allocation7] sm:$0x3] %vm444_vm2, %v3558_v39 }
0x22e9   :  { %v3563_v40 = vpop.permute.xlu0 %3562  ;;  %v3808_v41 = vld [vmem:[#allocation9] sm:$0x3] }
0x22ea   :  { %3565 = vst.msk [vmem:[#allocation8] sm:$0x3] %vm444_vm2, %v3563_v40  ;;  %5497 = vmatmul.mubr.msk.f32.vlgmr.msra.gmra.mrb[32].mxu0 %vm257_vm4, %v3808_v41 }
0x22eb   :  { %5799 = vmatpush3.bf16.msra.mxu0 %v6900_v14  ;;  %5518 = vmatprep.mubr.msk.f32.mxu0 %vm6319_vm3, %v6318_v17 }
0x22ec   :  { %5800 = vmatprep.subr.bf16.mxu0 %v6317_v15 }
0x22ed   :  { %v3887_v42 = vld [vmem:[#allocation10] sm:$0x3] }
0x22ee   :  { %v3688_v43 = vld [vmem:[#allocation7] sm:$0x3]  ;;  %3896 = vrot.lane.b32.xlu0 %v3887_v42, %s6320_s22 }
0x22ef   :  { %5486 = vmatmul.mubr.msk.f32.vlgmr.msra.gmra.mrb[26].mxu1 %vm257_vm4, %v3688_v43  ;;  %5802 = vmatpush3.bf16.msra.mxu0 %v6910_v25  ;;  %v3687_v25 = vld [vmem:[#allocation5 + $0x8] sm:$0x3] }
0x22f0   :  { %5793 = vmatpush3.bf16.msra.mxu1 %v6902_v18  ;;  %5507 = vmatprep.mubr.msk.f32.mxu1 %vm6319_vm3, %v6318_v17 }
0x22f1   :  { %5794 = vmatprep.subr.bf16.mxu1 %v6317_v15  ;;  %v3767_v14 = vld [vmem:[#allocation8] sm:$0x3]  ;;  %5809 = vmatprep.subr.bf16.mxu0 %v6317_v15 }
0x22f2   :  { %3776 = vrot.lane.b32.xlu0 %v3767_v14, %s6320_s22 }
0x22f4   :  { %5796 = vmatpush3.bf16.msra.mxu1 %v6912_v26 }
0x22f5   :  { %5803 = vmatprep.subr.bf16.mxu1 %v6317_v15 }
0x2360   :  { %v3897_v60 = vpop.permute.xlu0 %3896 }
0x2364   :  { %v3777_v63 = vpop.permute.xlu0 %3776 }
0x23bd   :  { %v3882_v45 = vpop.f32.mrb[32].mxu0 }
0x23be   :  { %v3886_v46 = vadd.f32 %v3882_v45, %v3807_v44  ;;  %v5498_v18 = vpop.f32.mrb[33].mxu0 }
0x23c0   :  { %6057 = vtanh.f32 %v3886_v46  ;;  %v4913_v35 = vmul.f32 -1.442695, %v3886_v46 }
0x23c2   :  { %v3762_v47 = vpop.f32.mrb[26].mxu1 }
0x23c3   :  { %v3766_v48 = vadd.f32 %v3762_v47, %v3687_v25  ;;  %v5487_v49 = vpop.f32.mrb[27].mxu1 }
0x23c5   :  { %6059 = vtanh.f32 %v3766_v48  ;;  %v4911_v26 = vmul.f32 -1.442695, %v3766_v48 }
0x23c6   :  { %6061 = vpow2.f32 %v4913_v35 }
0x23c7   :  { %6063 = vpow2.f32 %v4911_v26 }
0x23ca   :  { %v6058_v50 = vpop.eup %6057 }
0x23cb   :  { %3901 = vrot.lane.b32.xlu1 %v6058_v50, %s6321_s5 }
0x23cf   :  { %v6060_v51 = vpop.eup %6059 }
0x23d0   :  { %3781 = vrot.lane.b32.xlu1 %v6060_v51, %s6321_s5  ;;  %v6062_v52 = vpop.eup %6061 }
0x23d1   :  { %v3891_v53 = vadd.f32 1.0, %v6062_v52  ;;  %v6064_v54 = vpop.eup %6063 }
0x23d2   :  { %v3771_v16 = vadd.f32 1.0, %v6064_v54  ;;  %v4289_v54 = vld [vmem:[#allocation22] sm:$0xff] }
0x23d3   :  { %6065 = vrcp.f32 %v3891_v53 }
0x23d4   :  { %6067 = vrcp.f32 %v3771_v16  ;;  %v4290_v16 = vld [vmem:[#allocation22 + $0x8] sm:$0xff] }
0x23dd   :  { %v6066_v38 = vpop.eup %6065 }
0x23de   :  { %v6068_v57 = vpop.eup %6067  ;;  %v3899_v20 = vmul.f32 %v6066_v38, %v3897_v60 }
0x23df   :  { %v3779_v0 = vmul.f32 %v6068_v57, %v3777_v63 }
0x243d   :  { %v3902_v55 = vpop.permute.xlu1 %3901 }
0x243e   :  { %v3904_v56 = vmul.f32 %v6066_v38, %v3902_v55  ;;  %v4169_v55 = vld [vmem:[#allocation17] sm:$0xff] }
0x2440   :  { %3906 = vrot.lane.b32.xlu1 %v3904_v56, %s6320_s22  ;;  %v4170_v56 = vld [vmem:[#allocation17 + $0x8] sm:$0xff] }
0x2442   :  { %v3782_v58 = vpop.permute.xlu1 %3781 }
0x2443   :  { %v3784_v59 = vmul.f32 %v6068_v57, %v3782_v58  ;;  %v5804_v58 = vpack.c.bf16 %v4170_v56, %v4169_v55  ;;  %v4527_v56 = vld [vmem:[#allocation6] sm:$0x3] }
0x2445   :  { %3786 = vrot.lane.b32.xlu1 %v3784_v59, %s6320_s22  ;;  %v4292_v59 = vld [vmem:[#allocation22 + $0x18] sm:$0xff] }
0x24b2   :  { %v3907_v61 = vpop.permute.xlu1 %3906 }
0x24b3   :  { %v3909_v62 = vadd.f32 %v3907_v61, %v3899_v20  ;;  %v4171_v20 = vld [vmem:[#allocation17 + $0x10] sm:$0xff]  ;;  %v4172_v61 = vld [vmem:[#allocation17 + $0x18] sm:$0xff] }
0x24b5   :  { %6069 = vtanh.f32 %v3909_v62 }
0x24b7   :  { %v3787_v1 = vpop.permute.xlu1 %3786 }
0x24b8   :  { %v3789_v2 = vadd.f32 %v3787_v1, %v3779_v0 }
0x24ba   :  { %6071 = vtanh.f32 %v3789_v2 }
0x24bf   :  { %v6070_v3 = vpop.eup %6069 }
0x24c0   :  { %3912 = vrot.lane.b32.xlu0 %v6070_v3, %s6321_s5 }
0x24c4   :  { %v6072_v4 = vpop.eup %6071 }
0x24c5   :  { %3792 = vrot.lane.b32.xlu1 %v6072_v4, %s6321_s5 }
0x2532   :  { %v3913_v5 = vpop.permute.xlu0 %3912 }
0x2533   :  { %v3915_v6 = vmul.f32 %v6066_v38, %v3913_v5  ;;  %v5810_v38 = vpack.c.bf16 %v4290_v16, %v4289_v54 }
0x2535   :  { %3917 = vrot.lane.b32.xlu0 %v3915_v6, %s6320_s22 }
0x2537   :  { %v3793_v7 = vpop.permute.xlu1 %3792 }
0x2538   :  { %v3795_v8 = vmul.f32 %v6068_v57, %v3793_v7  ;;  %v4291_v57 = vld [vmem:[#allocation22 + $0x10] sm:$0xff] }
0x2539   :  { %3922 = vrot.lane.b32.xlu0 %v3909_v62, %s6322_s0  ;;  %v5813_v60 = vpack.c.bf16 %v4292_v59, %v4291_v57  ;;  %v5807_v62 = vpack.c.bf16 %v4172_v61, %v4171_v20 }
0x253a   :  { %3797 = vrot.lane.b32.xlu1 %v3795_v8, %s6320_s22 }
0x253d   :  { %3802 = vrot.lane.b32.xlu0 %v3789_v2, %s6322_s0 }
0x25a7   :  { %v3918_v9 = vpop.permute.xlu0 %3917 }
0x25a8   :  { %3926 = vst.msk [vmem:[#allocation4 + $0x6] sm:$0x3] %vm444_vm2, %v3918_v9  ;;  %3920 = vst.msk [vmem:[#allocation9] sm:$0x3] %vm444_vm2, %v3918_v9 }
0x25ab   :  { %v3923_v10 = vpop.permute.xlu0 %3922 }
0x25ac   :  { %v3798_v11 = vpop.permute.xlu1 %3797  ;;  %3925 = vst.msk [vmem:[#allocation10] sm:$0x3] %vm444_vm2, %v3923_v10 }
0x25ad   :  { %3806 = vst.msk [vmem:[#allocation3 + $0x8] sm:$0x3] %vm444_vm2, %v3798_v11  ;;  %3800 = vst.msk [vmem:[#allocation7] sm:$0x3] %vm444_vm2, %v3798_v11  ;;  %v4287_v11 = vld [vmem:[#allocation6 + $0x2] sm:$0x3] }
0x25af   :  { %v3803_v12 = vpop.permute.xlu0 %3802  ;;  %v4048_v13 = vld [vmem:[#allocation9] sm:$0x3] }
0x25b0   :  { %3805 = vst.msk [vmem:[#allocation8] sm:$0x3] %vm444_vm2, %v3803_v12  ;;  %5519 = vmatmul.mubr.msk.f32.vlgmr.msra.gmra.mrb[34].mxu0 %vm257_vm4, %v4048_v13 }
0x25b1   :  { %5540 = vmatprep.mubr.msk.f32.mxu0 %vm6319_vm3, %v6318_v17  ;;  %5811 = vmatpush3.bf16.msra.mxu0 %v5810_v38 }
0x25b2   :  { %5812 = vmatprep.subr.bf16.mxu0 %v6317_v15 }
0x25b3   :  { %v4127_v19 = vld [vmem:[#allocation10] sm:$0x3] }
0x25b4   :  { %v3928_v21 = vld [vmem:[#allocation7] sm:$0x3]  ;;  %4136 = vrot.lane.b32.xlu0 %v4127_v19, %s6320_s22 }
0x25b5   :  { %5508 = vmatmul.mubr.msk.f32.vlgmr.msra.gmra.mrb[28].mxu1 %vm257_vm4, %v3928_v21  ;;  %5814 = vmatpush3.bf16.msra.mxu0 %v5813_v60  ;;  %v4167_v21 = vld [vmem:[#allocation5 + $0xc] sm:$0x3] }
0x25b6   :  { %5529 = vmatprep.mubr.msk.f32.mxu1 %vm6319_vm3, %v6318_v17  ;;  %5805 = vmatpush3.bf16.msra.mxu1 %v5804_v58 }
0x25b7   :  { %v4007_v22 = vld [vmem:[#allocation8] sm:$0x3]  ;;  %5806 = vmatprep.subr.bf16.mxu1 %v6317_v15  ;;  %5821 = vmatprep.subr.bf16.mxu0 %v6317_v15 }
0x25b8   :  { %4016 = vrot.lane.b32.xlu0 %v4007_v22, %s6320_s22 }
0x25ba   :  { %5808 = vmatpush3.bf16.msra.mxu1 %v5807_v62 }
0x25bb   :  { %5815 = vmatprep.subr.bf16.mxu1 %v6317_v15 }
0x2626   :  { %v4137_v25 = vpop.permute.xlu0 %4136 }
0x262a   :  { %v4017_v50 = vpop.permute.xlu0 %4016 }
0x2683   :  { %v4122_v24 = vpop.f32.mrb[34].mxu0 }
0x2684   :  { %v4126_v27 = vadd.f32 %v4122_v24, %v4047_v23  ;;  %v5520_v28 = vpop.f32.mrb[35].mxu0 }
0x2686   :  { %6073 = vtanh.f32 %v4126_v27  ;;  %v4917_v36 = vmul.f32 -1.442695, %v4126_v27 }
0x2688   :  { %v4002_v30 = vpop.f32.mrb[28].mxu1 }
0x2689   :  { %v4006_v31 = vadd.f32 %v4002_v30, %v3927_v29  ;;  %v5509_v32 = vpop.f32.mrb[29].mxu1 }
0x268b   :  { %6075 = vtanh.f32 %v4006_v31  ;;  %v4915_v37 = vmul.f32 -1.442695, %v4006_v31 }
0x268c   :  { %6077 = vpow2.f32 %v4917_v36 }
0x268d   :  { %6079 = vpow2.f32 %v4915_v37 }
0x2690   :  { %v6074_v33 = vpop.eup %6073 }
0x2691   :  { %4141 = vrot.lane.b32.xlu1 %v6074_v33, %s6321_s5 }
0x2695   :  { %v6076_v34 = vpop.eup %6075 }
0x2696   :  { %4021 = vrot.lane.b32.xlu1 %v6076_v34, %s6321_s5  ;;  %v6078_v39 = vpop.eup %6077 }
0x2697   :  { %v4131_v40 = vadd.f32 1.0, %v6078_v39  ;;  %v6080_v41 = vpop.eup %6079 }
0x2698   :  { %v4011_v42 = vadd.f32 1.0, %v6080_v41 }
0x2699   :  { %6081 = vrcp.f32 %v4131_v40 }
0x269a   :  { %6083 = vrcp.f32 %v4011_v42 }
0x26a3   :  { %v6082_v43 = vpop.eup %6081 }
0x26a4   :  { %v6084_v45 = vpop.eup %6083  ;;  %v4139_v47 = vmul.f32 %v6082_v43, %v4137_v25 }
0x26a5   :  { %v4019_v51 = vmul.f32 %v6084_v45, %v4017_v50 }
0x2703   :  { %v4142_v14 = vpop.permute.xlu1 %4141 }
0x2704   :  { %v4144_v44 = vmul.f32 %v6082_v43, %v4142_v14 }
0x2706   :  { %4146 = vrot.lane.b32.xlu1 %v4144_v44, %s6320_s22 }
0x2708   :  { %v4022_v46 = vpop.permute.xlu1 %4021 }
0x2709   :  { %v4024_v18 = vmul.f32 %v6084_v45, %v4022_v46 }
0x270b   :  { %4026 = vrot.lane.b32.xlu1 %v4024_v18, %s6320_s22 }
0x2778   :  { %v4147_v48 = vpop.permute.xlu1 %4146 }
0x2779   :  { %v4149_v49 = vadd.f32 %v4147_v48, %v4139_v47 }
0x277b   :  { %6085 = vtanh.f32 %v4149_v49 }
0x277d   :  { %v4027_v35 = vpop.permute.xlu1 %4026 }
0x277e   :  { %v4029_v26 = vadd.f32 %v4027_v35, %v4019_v51 }
0x2780   :  { %6087 = vtanh.f32 %v4029_v26 }
0x2785   :  { %v6086_v52 = vpop.eup %6085 }
0x2786   :  { %4152 = vrot.lane.b32.xlu0 %v6086_v52, %s6321_s5 }
0x278a   :  { %v6088_v53 = vpop.eup %6087 }
0x278b   :  { %4032 = vrot.lane.b32.xlu1 %v6088_v53, %s6321_s5 }
0x27f8   :  { %v4153_v63 = vpop.permute.xlu0 %4152 }
0x27f9   :  { %v4155_v0 = vmul.f32 %v6082_v43, %v4153_v63 }
0x27fb   :  { %4157 = vrot.lane.b32.xlu0 %v4155_v0, %s6320_s22 }
0x27fd   :  { %v4033_v1 = vpop.permute.xlu1 %4032 }
0x27fe   :  { %v4035_v2 = vmul.f32 %v6084_v45, %v4033_v1 }
0x27ff   :  { %4162 = vrot.lane.b32.xlu0 %v4149_v49, %s6322_s0 }
0x2800   :  { %4037 = vrot.lane.b32.xlu1 %v4035_v2, %s6320_s22 }
0x2803   :  { %4042 = vrot.lane.b32.xlu0 %v4029_v26, %s6322_s0 }
0x286d   :  { %v4158_v3 = vpop.permute.xlu0 %4157 }
0x286e   :  { %4166 = vst.msk [vmem:[#allocation4 + $0x4] sm:$0x3] %vm444_vm2, %v4158_v3  ;;  %4160 = vst.msk [vmem:[#allocation9] sm:$0x3] %vm444_vm2, %v4158_v3 }
0x2871   :  { %v4163_v4 = vpop.permute.xlu0 %4162 }
0x2872   :  { %v4038_v5 = vpop.permute.xlu1 %4037  ;;  %4165 = vst.msk [vmem:[#allocation10] sm:$0x3] %vm444_vm2, %v4163_v4 }
0x2873   :  { %4046 = vst.msk [vmem:[#allocation3 + $0xa] sm:$0x3] %vm444_vm2, %v4038_v5  ;;  %4040 = vst.msk [vmem:[#allocation7] sm:$0x3] %vm444_vm2, %v4038_v5 }
0x2875   :  { %v4043_v6 = vpop.permute.xlu0 %4042  ;;  %v4288_v7 = vld [vmem:[#allocation9] sm:$0x3] }
0x2876   :  { %4045 = vst.msk [vmem:[#allocation8] sm:$0x3] %vm444_vm2, %v4043_v6  ;;  %5541 = vmatmul.mubr.msk.f32.vlgmr.msra.gmra.mrb[36].mxu0 %vm257_vm4, %v4288_v7 }
0x2877   :  { %5823 = vmatpush3.bf16.msra.mxu0 %v5810_v38  ;;  %5562 = vmatprep.mubr.msk.f32.mxu0 %vm6319_vm3, %v6318_v17 }
0x2878   :  { %5824 = vmatprep.subr.bf16.mxu0 %v6317_v15 }
0x2879   :  { %v4367_v8 = vld [vmem:[#allocation10] sm:$0x3] }
0x287a   :  { %v4168_v9 = vld [vmem:[#allocation7] sm:$0x3]  ;;  %4376 = vrot.lane.b32.xlu0 %v4367_v8, %s6320_s22 }
0x287b   :  { %5530 = vmatmul.mubr.msk.f32.vlgmr.msra.gmra.mrb[30].mxu1 %vm257_vm4, %v4168_v9  ;;  %5826 = vmatpush3.bf16.msra.mxu0 %v5813_v60  ;;  %v4407_v60 = vld [vmem:[#allocation5 + $0xe] sm:$0x3] }
0x287c   :  { %5817 = vmatpush3.bf16.msra.mxu1 %v5804_v58  ;;  %5551 = vmatprep.mubr.msk.f32.mxu1 %vm6319_vm3, %v6318_v17 }
0x287d   :  { %5818 = vmatprep.subr.bf16.mxu1 %v6317_v15  ;;  %v4247_v10 = vld [vmem:[#allocation8] sm:$0x3] }
0x287e   :  { %4256 = vrot.lane.b32.xlu0 %v4247_v10, %s6320_s22 }
0x2880   :  { %5820 = vmatpush3.bf16.msra.mxu1 %v5807_v62 }
0x28ec   :  { %v4377_v41 = vpop.permute.xlu0 %4376 }
0x28f0   :  { %v4257_v44 = vpop.permute.xlu0 %4256 }
0x2949   :  { %v4362_v12 = vpop.f32.mrb[36].mxu0 }
0x294a   :  { %v4366_v13 = vadd.f32 %v4362_v12, %v4287_v11  ;;  %v5542_v19 = vpop.f32.mrb[37].mxu0 }
0x294c   :  { %6089 = vtanh.f32 %v4366_v13  ;;  %v4921_v17 = vmul.f32 -1.442695, %v4366_v13 }
0x294e   :  { %v4242_v22 = vpop.f32.mrb[30].mxu1 }
0x294f   :  { %v4246_v23 = vadd.f32 %v4242_v22, %v4167_v21  ;;  %v5531_v24 = vpop.f32.mrb[31].mxu1 }
0x2951   :  { %6091 = vtanh.f32 %v4246_v23  ;;  %v4919_v28 = vmul.f32 -1.442695, %v4246_v23 }
0x2952   :  { %6093 = vpow2.f32 %v4921_v17 }
0x2953   :  { %6095 = vpow2.f32 %v4919_v28 }
0x2956   :  { %v6090_v27 = vpop.eup %6089 }
0x2957   :  { %4381 = vrot.lane.b32.xlu1 %v6090_v27, %s6321_s5 }
0x295b   :  { %v6092_v15 = vpop.eup %6091 }
0x295c   :  { %4261 = vrot.lane.b32.xlu1 %v6092_v15, %s6321_s5  ;;  %v6094_v29 = vpop.eup %6093 }
0x295d   :  { %v4371_v30 = vadd.f32 1.0, %v6094_v29  ;;  %v6096_v31 = vpop.eup %6095  ;;  %v4655_v29 = vld [vmem:[%s7207_s15 + $0x20] sm:$0xff] }
0x295e   :  { %v4251_v32 = vadd.f32 1.0, %v6096_v31 }
0x295f   :  { %6097 = vrcp.f32 %v4371_v30  ;;  %v4656_v30 = vld [vmem:[%s7207_s15 + $0x28] sm:$0xff] }
0x2960   :  { %6099 = vrcp.f32 %v4251_v32  ;;  %v5827_v31 = vpack.c.bf16 %v4656_v30, %v4655_v29  ;;  %v4657_v32 = vld [vmem:[%s7207_s15 + $0x30] sm:$0xff] }
0x2962   :  { %5828 = vmatprep.subr.bf16.mxu1 %v5827_v31 }
0x2969   :  { %v6098_v33 = vpop.eup %6097 }
0x296a   :  { %v6100_v37 = vpop.eup %6099  ;;  %v4379_v42 = vmul.f32 %v6098_v33, %v4377_v41 }
0x296b   :  { %v4259_v45 = vmul.f32 %v6100_v37, %v4257_v44 }
0x29c9   :  { %v4382_v34 = vpop.permute.xlu1 %4381 }
0x29ca   :  { %v4384_v36 = vmul.f32 %v6098_v33, %v4382_v34 }
0x29cc   :  { %4386 = vrot.lane.b32.xlu1 %v4384_v36, %s6320_s22  ;;  %v4649_v36 = vld [vmem:[%s7207_s15] sm:$0xff] }
0x29ce   :  { %v4262_v39 = vpop.permute.xlu1 %4261 }
0x29cf   :  { %v4264_v40 = vmul.f32 %v6100_v37, %v4262_v39 }
0x29d1   :  { %4266 = vrot.lane.b32.xlu1 %v4264_v40, %s6320_s22 }
0x2a3e   :  { %v4387_v43 = vpop.permute.xlu1 %4386 }
0x2a3f   :  { %v4389_v14 = vadd.f32 %v4387_v43, %v4379_v42 }
0x2a41   :  { %6101 = vtanh.f32 %v4389_v14 }
0x2a43   :  { %v4267_v46 = vpop.permute.xlu1 %4266 }
0x2a44   :  { %v4269_v18 = vadd.f32 %v4267_v46, %v4259_v45  ;;  %v4651_v46 = vld [vmem:[%s7207_s15 + $0x10] sm:$0xff] }
0x2a46   :  { %6103 = vtanh.f32 %v4269_v18 }
0x2a4b   :  { %v6102_v25 = vpop.eup %6101 }
0x2a4c   :  { %4392 = vrot.lane.b32.xlu0 %v6102_v25, %s6321_s5 }
0x2a50   :  { %v6104_v47 = vpop.eup %6103 }
0x2a51   :  { %4272 = vrot.lane.b32.xlu1 %v6104_v47, %s6321_s5 }
0x2abe   :  { %v4393_v48 = vpop.permute.xlu0 %4392 }
0x2abf   :  { %v4395_v49 = vmul.f32 %v6098_v33, %v4393_v48  ;;  %v4658_v33 = vld [vmem:[%s7207_s15 + $0x38] sm:$0xff] }
0x2ac0   :  { %v5831_v34 = vpack.c.bf16 %v4658_v33, %v4657_v32 }
0x2ac1   :  { %4397 = vrot.lane.b32.xlu0 %v4395_v49, %s6320_s22  ;;  %v4654_v49 = vld [vmem:[#allocation4 + $0x8] sm:$0xff] }
0x2ac3   :  { %v4273_v50 = vpop.permute.xlu1 %4272 }
0x2ac4   :  { %v4275_v51 = vmul.f32 %v6100_v37, %v4273_v50  ;;  %v4650_v37 = vld [vmem:[%s7207_s15 + $0x8] sm:$0xff]  ;;  %v4647_v50 = vld [vmem:[#allocation3] sm:$0xff] }
0x2ac5   :  { %4402 = vrot.lane.b32.xlu0 %v4389_v14, %s6322_s0  ;;  %v5835_v39 = vpack.c.bf16 %v4650_v37, %v4649_v36 }
0x2ac6   :  { %4277 = vrot.lane.b32.xlu1 %v4275_v51, %s6320_s22 }
0x2ac9   :  { %4282 = vrot.lane.b32.xlu0 %v4269_v18, %s6322_s0  ;;  %v4652_v18 = vld [vmem:[%s7207_s15 + $0x18] sm:$0xff] }
0x2aca   :  { %v5839_v48 = vpack.c.bf16 %v4652_v18, %v4651_v46 }
0x2b33   :  { %v4398_v35 = vpop.permute.xlu0 %4397 }
0x2b34   :  { %4406 = vst.msk [vmem:[#allocation4 + $0x2] sm:$0x3] %vm444_vm2, %v4398_v35  ;;  %4400 = vst.msk [vmem:[#allocation9] sm:$0x3] %vm444_vm2, %v4398_v35  ;;  %v4930_v35 = vld [vmem:[#allocation11] ss:$0 sm:$0xff] }
0x2b37   :  { %v4403_v26 = vpop.permute.xlu0 %4402 }
0x2b38   :  { %v4278_v52 = vpop.permute.xlu1 %4277  ;;  %4405 = vst.msk [vmem:[#allocation10] sm:$0x3] %vm444_vm2, %v4403_v26 }
0x2b39   :  { %4286 = vst.msk [vmem:[#allocation3 + $0xc] sm:$0x3] %vm444_vm2, %v4278_v52  ;;  %4280 = vst.msk [vmem:[#allocation7] sm:$0x3] %vm444_vm2, %v4278_v52 }
0x2b3b   :  { %v4283_v53 = vpop.permute.xlu0 %4282  ;;  %v4528_v54 = vld [vmem:[#allocation9] sm:$0x3] }
0x2b3c   :  { %4285 = vst.msk [vmem:[#allocation8] sm:$0x3] %vm444_vm2, %v4283_v53  ;;  %5563 = vmatmul.mubr.msk.f32.vlgmr.msra.gmra.mrb[38].mxu0 %vm257_vm4, %v4528_v54 }
0x2b3f   :  { %v4607_v16 = vld [vmem:[#allocation10] sm:$0x3] }
0x2b40   :  { %v4408_v38 = vld [vmem:[#allocation7] sm:$0x3]  ;;  %4616 = vrot.lane.b32.xlu0 %v4607_v16, %s6320_s22 }
0x2b41   :  { %5552 = vmatmul.mubr.msk.f32.vlgmr.msra.gmra.mrb[32].mxu1 %vm257_vm4, %v4408_v38 }
0x2b42   :  { %5830 = vmatpush3.bf16.msra.mxu1 %v5827_v31 }
0x2b43   :  { %v4487_v55 = vld [vmem:[#allocation8] sm:$0x3]  ;;  %5832 = vmatprep.subr.bf16.mxu1 %v5831_v34 }
0x2b44   :  { %4496 = vrot.lane.b32.xlu0 %v4487_v55, %s6320_s22 }
0x2b46   :  { %5834 = vmatpush3.bf16.msra.mxu1 %v5831_v34 }
0x2b47   :  { %5836 = vmatprep.subr.bf16.mxu1 %v5835_v39 }
0x2bb2   :  { %v4617_v13 = vpop.permute.xlu0 %4616 }
0x2bb6   :  { %v4497_v23 = vpop.permute.xlu0 %4496 }
0x2c0f   :  { %v4602_v57 = vpop.f32.mrb[38].mxu0 }
0x2c10   :  { %v4606_v58 = vadd.f32 %v4602_v57, %v4527_v56  ;;  %v5564_v59 = vpop.f32.mrb[39].mxu0 }
0x2c12   :  { %6105 = vtanh.f32 %v4606_v58  ;;  %v4925_v1 = vmul.f32 -1.442695, %v4606_v58 }
0x2c14   :  { %v4482_v20 = vpop.f32.mrb[32].mxu1 }
0x2c15   :  { %v4486_v61 = vadd.f32 %v4482_v20, %v4407_v60  ;;  %v5553_v62 = vpop.f32.mrb[33].mxu1 }
0x2c17   :  { %6107 = vtanh.f32 %v4486_v61  ;;  %v4923_v2 = vmul.f32 -1.442695, %v4486_v61 }
0x2c18   :  { %6109 = vpow2.f32 %v4925_v1 }
0x2c19   :  { %6111 = vpow2.f32 %v4923_v2 }
0x2c1c   :  { %v6106_v63 = vpop.eup %6105 }
0x2c1d   :  { %4621 = vrot.lane.b32.xlu1 %v6106_v63, %s6321_s5 }
0x2c21   :  { %v6108_v0 = vpop.eup %6107 }
0x2c22   :  { %4501 = vrot.lane.b32.xlu1 %v6108_v0, %s6321_s5  ;;  %v6110_v3 = vpop.eup %6109 }
0x2c23   :  { %v4611_v4 = vadd.f32 1.0, %v6110_v3  ;;  %v6112_v5 = vpop.eup %6111 }
0x2c24   :  { %v4491_v6 = vadd.f32 1.0, %v6112_v5 }
0x2c25   :  { %6113 = vrcp.f32 %v4611_v4 }
0x2c26   :  { %6115 = vrcp.f32 %v4491_v6 }
0x2c2f   :  { %v6114_v7 = vpop.eup %6113 }
0x2c30   :  { %v6116_v10 = vpop.eup %6115  ;;  %v4619_v19 = vmul.f32 %v6114_v7, %v4617_v13 }
0x2c31   :  { %v4499_v24 = vmul.f32 %v6116_v10, %v4497_v23 }
0x2c8f   :  { %v4622_v8 = vpop.permute.xlu1 %4621 }
0x2c90   :  { %v4624_v9 = vmul.f32 %v6114_v7, %v4622_v8 }
0x2c92   :  { %4626 = vrot.lane.b32.xlu1 %v4624_v9, %s6320_s22 }
0x2c94   :  { %v4502_v11 = vpop.permute.xlu1 %4501 }
0x2c95   :  { %v4504_v12 = vmul.f32 %v6116_v10, %v4502_v11 }
0x2c97   :  { %4506 = vrot.lane.b32.xlu1 %v4504_v12, %s6320_s22 }
0x2d04   :  { %v4627_v21 = vpop.permute.xlu1 %4626 }
0x2d05   :  { %v4629_v22 = vadd.f32 %v4627_v21, %v4619_v19 }
0x2d07   :  { %6117 = vtanh.f32 %v4629_v22 }
0x2d09   :  { %v4507_v27 = vpop.permute.xlu1 %4506 }
0x2d0a   :  { %v4509_v15 = vadd.f32 %v4507_v27, %v4499_v24 }
0x2d0c   :  { %6119 = vtanh.f32 %v4509_v15 }
0x2d11   :  { %v6118_v17 = vpop.eup %6117 }
0x2d12   :  { %4632 = vrot.lane.b32.xlu0 %v6118_v17, %s6321_s5 }
0x2d16   :  { %v6120_v28 = vpop.eup %6119 }
0x2d17   :  { %4512 = vrot.lane.b32.xlu1 %v6120_v28, %s6321_s5 }
0x2d84   :  { %v4633_v40 = vpop.permute.xlu0 %4632 }
0x2d85   :  { %v4635_v41 = vmul.f32 %v6114_v7, %v4633_v40 }
0x2d87   :  { %4637 = vrot.lane.b32.xlu0 %v4635_v41, %s6320_s22 }
0x2d89   :  { %v4513_v42 = vpop.permute.xlu1 %4512 }
0x2d8a   :  { %v4515_v43 = vmul.f32 %v6116_v10, %v4513_v42 }
0x2d8b   :  { %4522 = vrot.lane.b32.xlu0 %v4509_v15, %s6322_s0 }
0x2d8c   :  { %4517 = vrot.lane.b32.xlu1 %v4515_v43, %s6320_s22 }
0x2d90   :  { %4642 = vrot.lane.b32.xlu1 %v4629_v22, %s6322_s0 }
0x2df9   :  { %v4638_v14 = vpop.permute.xlu0 %4637 }
0x2dfa   :  { %4640 = vst.msk [vmem:[#allocation9] sm:$0x3] %vm444_vm2, %v4638_v14  ;;  %4646 = vst.msk [vmem:[#allocation4] sm:$0x3] %vm444_vm2, %v4638_v14 }
0x2dfd   :  { %v4523_v44 = vpop.permute.xlu0 %4522 }
0x2dfe   :  { %v4518_v45 = vpop.permute.xlu1 %4517  ;;  %4525 = vst.msk [vmem:[#allocation8] sm:$0x3] %vm444_vm2, %v4523_v44 }
0x2dff   :  { %4520 = vst.msk [vmem:[#allocation7] sm:$0x3] %vm444_vm2, %v4518_v45  ;;  %4526 = vst.msk [vmem:[#allocation3 + $0xe] sm:$0x3] %vm444_vm2, %v4518_v45 }
0x2e01   :  { %v4653_v47 = vld [vmem:[#allocation4] sm:$0xff] }
0x2e02   :  { %v4643_v25 = vpop.permute.xlu1 %4642  ;;  %5573 = vmatprep.mubr.msk.f32.mxu1 %vm257_vm4, %v4653_v47 }
0x2e03   :  { %4645 = vst.msk [vmem:[#allocation10] sm:$0x3] %vm444_vm2, %v4643_v25  ;;  %5574 = vmatmul.mubr.msk.f32.vlgmr.msra.gmra.mrb[34].mxu1 %vm257_vm4, %v4654_v49 }
0x2e04   :  { %5838 = vmatpush3.bf16.msra.mxu1 %v5835_v39  ;;  %5584 = vmatprep.mubr.msk.f32.mxu1 %vm257_vm4, %v4647_v50 }
0x2e05   :  { %5840 = vmatprep.subr.bf16.mxu1 %v5839_v48 }
0x2e06   :  { %v4648_v51 = vld [vmem:[#allocation3 + $0x8] sm:$0xff] }
0x2e08   :  { %5842 = vmatpush3.bf16.msra.mxu1 %v5839_v48 }
0x2e0b   :  { %5585 = vmatmul.mubr.msk.f32.vlgmr.msra.gmra.mrb[34].mxu1 %vm257_vm4, %v4648_v51 }
0x2ede   :  { %v5586_v26 = vpop.f32.mrb[34].mxu1 }
0x2edf   :  { %v4829_v52 = vadd.f32 %v5586_v26, %v4930_v35  ;;  %v4812_v53 = vpop.f32.mrb[35].mxu1 }
0x2ee0   :  { %v4828_v54 = vadd.f32 %v4930_v35, %v4812_v53 }
0x2ee1   :  { %4832 = vst.msk [vmem:[%s7209_s17 + $0x8] sm:$0xff] %vm4830_vm5, %v4829_v52 }
0x2ee2   :  { %4831 = vst.msk [vmem:[%s7209_s17] sm:$0xff] %vm4830_vm5, %v4828_v54 }
0x2ee3   :  { %4837 = vsyncpa [#allocation13], 1 }
0x2ee4   :  { %4838 = vsyncpa [#allocation15], 1 }
0x2ee5   :  { %4839 = vsyncpa [#allocation18], 1 }
0x2ee6   :  { %4840 = vsyncpa [#allocation21], 1 }
0x2ee7   :  { %4841 = vsyncpa [#allocation24], 1 }

</bundles_post_ra>
